<compile_context>
chip_gen: v7x
topology: tpu7x:2x2x1
jax: 0.10.0
libtpu: 0.0.40
codegen_flags: <defaults>
</compile_context>

<pallas_src>
import functools

import jax
import jax.numpy as jnp
from jax import lax
from jax.experimental import pallas as pl
from jax.experimental.pallas import tpu as pltpu


# --------------------------------- helpers -----------------------------------

def _round_up(x, m):
    return (x + m - 1) // m * m


def _pick_tile(dim, target):
    """Largest divisor of `dim` that is <= target and 128- (or 8-) aligned.

    Falls back to the full dimension (single tile) for awkward sizes such as
    ViT's N = 197: that stays numerically correct, just untiled, and the
    explicit vmem_limit below makes the footprint visible at compile time.
    # TODO(synk): pad/mask a ragged tail tile instead of the full-dim fallback.
    """
    if dim <= target:
        return dim
    for quantum in (128, 8):
        t = target - target % quantum
        while t >= quantum:
            if dim % t == 0:
                return t
            t -= quantum
    return dim


def _buf_bytes(shape, dtype, copies=2):
    """Rough VMEM bytes of a (default double-buffered) block, lane/sublane padded."""
    s = list(shape)
    s[-1] = _round_up(s[-1], 128)
    if len(s) >= 2:
        s[-2] = _round_up(s[-2], 8)
    n = 1
    for d in s:
        n *= d
    return copies * n * jnp.dtype(dtype).itemsize


def _vmem_limit(estimate_bytes):
    """Explicit scoped-VMEM budget: only raise above the 16 MiB v5e default when
    the chosen tiles need it, and cap at 48 MiB so it still fits v7x (64 MiB/TC)."""
    need = int(estimate_bytes * 1.3)
    if need <= 16 * 1024 * 1024:
        return None
    return min(_round_up(need, 1 << 20), 48 * 1024 * 1024)


# ---------------------- qkv linear + head-split kernel -----------------------

def _qkv_head_split_kernel(x_ref, w_ref, b_ref, q_ref, k_ref, v_ref, *, num_heads):
    # x_ref: (1, tm, C); w_ref: (3C, C) (PyTorch (out, in)); b_ref: (1, 3C)
    # q/k/v_ref: (1, H, tm, hd) head-major output slabs.
    C = w_ref.shape[0] // 3
    hd = C // num_heads
    y = lax.dot_general(
        x_ref[0], w_ref[...],
        dimension_numbers=(((1,), (1,)), ((), ())),       # x @ W.T on the MXU
        preferred_element_type=jnp.float32)
    y = (y + b_ref[...]).astype(q_ref.dtype)              # (tm, 3C)
    # Head-split epilogue: pay the sub-128-lane extracts ONCE per token here
    # instead of once per (q-tile, kv-step) inside the attention inner loop.
    for sel, out in enumerate((q_ref, k_ref, v_ref)):
        base = sel * C
        for h in range(num_heads):
            out[0, h] = y[:, base + h * hd: base + (h + 1) * hd]


def qkv_projection(x, w_qkv, b_qkv, num_heads, *, block_m=256):
    """x: (B, N, C); w_qkv: (3C, C); b_qkv: (3C,) -> q, k, v each (B, H, N, hd)."""
    B, N, C = x.shape
    H = num_heads
    hd = C // H
    dtype = x.dtype
    tm = _pick_tile(N, block_m)

    est = (_buf_bytes((tm, C), dtype) + _buf_bytes((3 * C, C), dtype)
           + _buf_bytes((1, 3 * C), dtype) + 3 * _buf_bytes((H, tm, hd), dtype))

    out_sd = jax.ShapeDtypeStruct((B, H, N, hd), dtype)
    out_spec = pl.BlockSpec((1, H, tm, hd), lambda b, i: (b, 0, i, 0))
    grid_spec = pltpu.PrefetchScalarGridSpec(
        num_scalar_prefetch=0,
        grid=(B, N // tm),
        in_specs=[
            pl.BlockSpec((1, tm, C), lambda b, i: (b, i, 0)),
            # Whole weight resident (constant block index): fetched from HBM
            # once for the whole call, not re-streamed per M tile.
            pl.BlockSpec((3 * C, C), lambda b, i: (0, 0)),
            pl.BlockSpec((1, 3 * C), lambda b, i: (0, 0)),
        ],
        out_specs=(out_spec, out_spec, out_spec),
    )
    return pl.pallas_call(
        functools.partial(_qkv_head_split_kernel, num_heads=num_heads),
        out_shape=(out_sd, out_sd, out_sd),
        grid_spec=grid_spec,
        compiler_params=pltpu.CompilerParams(
            dimension_semantics=("parallel", "parallel"),
            vmem_limit_bytes=_vmem_limit(est)),
    )(x, w_qkv, b_qkv.reshape(1, 3 * C))


# ------------------ fused flash-attention + output projection ----------------

def _flash_attn_proj_kernel(q_ref, k_ref, v_ref, wp_ref, bp_ref, o_ref,
                            m_scr, l_scr, acc_scr, proj_scr, *, approx_recip):
    # q_ref: (1, 1, tq, hd); k_ref/v_ref: (1, 1, tkv, hd); wp_ref: (1, C, hd)
    # bp_ref: (1, C) f32; o_ref: (1, tq, C)
    # scratch: m/l (tq, 1) f32, acc (tq, hd) f32, proj (tq, C) f32 (lane-dense)
    h, kv = pl.program_id(2), pl.program_id(3)
    nh, nkv = pl.num_programs(2), pl.num_programs(3)

    @pl.when(jnp.logical_and(h == 0, kv == 0))
    def _zero_projection_acc():
        proj_scr[...] = jnp.zeros(proj_scr.shape, dtype=proj_scr.dtype)

    @pl.when(kv == 0)
    def _reset_flash_state():
        m_scr[...] = jnp.full(m_scr.shape, -jnp.inf, dtype=m_scr.dtype)
        l_scr[...] = jnp.zeros(l_scr.shape, dtype=l_scr.dtype)
        acc_scr[...] = jnp.zeros(acc_scr.shape, dtype=acc_scr.dtype)

    q = q_ref[0, 0]          # (tq, hd); scale already folded into w_qkv/b_qkv
    k = k_ref[0, 0]          # (tkv, hd)
    v = v_ref[0, 0]          # (tkv, hd)

    # scores = q @ k.T; operands stay in the storage dtype (bf16 in the
    # production path), accumulation is f32 on the MXU.
    s = lax.dot_general(q, k, (((1,), (1,)), ((), ())),
                        preferred_element_type=jnp.float32)        # (tq, tkv)

    m_prev = m_scr[...]
    m_new = jnp.maximum(m_prev, jnp.max(s, axis=-1, keepdims=True))
    alpha = jnp.exp(m_prev - m_new)                                # (tq, 1)
    p = jnp.exp(s - m_new)                                         # f32
    l_scr[...] = alpha * l_scr[...] + jnp.sum(p, axis=-1, keepdims=True)
    acc_scr[...] = alpha * acc_scr[...] + jnp.dot(
        p.astype(v_ref.dtype), v, preferred_element_type=jnp.float32)
    m_scr[...] = m_new

    @pl.when(kv == nkv - 1)
    def _fold_head_into_projection():
        inv = pl.reciprocal(l_scr[...], approx=approx_recip)       # (tq, 1)
        o_h = (acc_scr[...] * inv).astype(wp_ref.dtype)            # (tq, hd)
        # out += o_h @ W_proj[:, h*hd:(h+1)*hd].T  -> lane-dense (tq, C) acc.
        proj_scr[...] += lax.dot_general(
            o_h, wp_ref[0], (((1,), (1,)), ((), ())),
            preferred_element_type=jnp.float32)

    @pl.when(jnp.logical_and(h == nh - 1, kv == nkv - 1))
    def _store_output():
        o_ref[0] = (proj_scr[...] + bp_ref[...]).astype(o_ref.dtype)


def flash_attention_proj(q, k, v, w_proj, b_proj, *, block_q=256, block_kv=512):
    """q/k/v: (B, H, N, hd); w_proj: (C, C); b_proj: (C,) -> (B, N, C)."""
    B, H, N, hd = q.shape
    C = H * hd
    dtype = q.dtype
    tq = _pick_tile(N, block_q)
    tkv = _pick_tile(N, block_kv)

    # (H, C, hd): wp_r[h] == w_proj[:, h*hd:(h+1)*hd] (head slice of the proj
    # input dim), so the per-head weight block has a full (= hd) last dim.
    wp_r = w_proj.reshape(C, H, hd).transpose(1, 0, 2).astype(dtype)
    bp = b_proj.reshape(1, C).astype(jnp.float32)

    est = (_buf_bytes((tq, hd), dtype) + 2 * _buf_bytes((tkv, hd), dtype)
           + _buf_bytes((C, hd), dtype) + _buf_bytes((1, C), jnp.float32)
           + _buf_bytes((tq, C), dtype)
           + _buf_bytes((tq, 1), jnp.float32, copies=2)
           + _buf_bytes((tq, hd), jnp.float32, copies=1)
           + _buf_bytes((tq, C), jnp.float32, copies=1))

    grid_spec = pltpu.PrefetchScalarGridSpec(
        num_scalar_prefetch=0,
        grid=(B, N // tq, H, N // tkv),
        in_specs=[
            pl.BlockSpec((1, 1, tq, hd), lambda b, qi, h, kv: (b, h, qi, 0)),
            pl.BlockSpec((1, 1, tkv, hd), lambda b, qi, h, kv: (b, h, kv, 0)),
            pl.BlockSpec((1, 1, tkv, hd), lambda b, qi, h, kv: (b, h, kv, 0)),
            pl.BlockSpec((1, C, hd), lambda b, qi, h, kv: (h, 0, 0)),
            pl.BlockSpec((1, C), lambda b, qi, h, kv: (0, 0)),
        ],
        out_specs=pl.BlockSpec((1, tq, C), lambda b, qi, h, kv: (b, qi, 0)),
        scratch_shapes=[
            pltpu.VMEM((tq, 1), jnp.float32),    # running max
            pltpu.VMEM((tq, 1), jnp.float32),    # running denom
            pltpu.VMEM((tq, hd), jnp.float32),   # per-head numerator
            pltpu.VMEM((tq, C), jnp.float32),    # projected-output accumulator
        ],
    )
    kernel = functools.partial(_flash_attn_proj_kernel,
                               approx_recip=(dtype != jnp.float32))
    return pl.pallas_call(
        kernel,
        out_shape=jax.ShapeDtypeStruct((B, N, C), dtype),
        grid_spec=grid_spec,
        compiler_params=pltpu.CompilerParams(
            # head and kv axes carry reductions (flash state / proj accumulator).
            dimension_semantics=("parallel", "parallel", "arbitrary", "arbitrary"),
            vmem_limit_bytes=_vmem_limit(est)),
    )(q, k, v, wp_r, bp)


# ------------------------------- module forward -------------------------------

def attention_forward(x, params, num_heads, *,
                      block_m=256, block_q=256, block_kv=512):
    """Pallas forward for the PyTorch Attention module (attn/proj dropout = 0)."""
    B, N, C = x.shape
    assert C % num_heads == 0, "dim should be divisible by num_heads"
    assert C % 128 == 0, "kernel assumes lane-dense channel blocks (C % 128 == 0)"
    hd = C // num_heads
    scale = hd ** (-0.5)
    dtype = x.dtype

    # Fold the softmax scale into the q rows of the qkv projection (one-time
    # XLA op) so the kernel never rescales q inside its KV loop.
    w_qkv = jnp.concatenate(
        [params["w_qkv"][:C] * scale, params["w_qkv"][C:]], axis=0).astype(dtype)
    b_qkv = jnp.concatenate(
        [params["b_qkv"][:C] * scale, params["b_qkv"][C:]], axis=0).astype(dtype)

    q, k, v = qkv_projection(x, w_qkv, b_qkv, num_heads, block_m=block_m)
    return flash_attention_proj(q, k, v, params["w_proj"], params["b_proj"],
                                block_q=block_q, block_kv=block_kv)


# ------------------------------ pure-JAX reference -----------------------------

def attention_reference(x, params, num_heads):
    B, N, C = x.shape
    hd = C // num_heads
    scale = hd ** (-0.5)
    qkv = x @ params["w_qkv"].T + params["b_qkv"]
    qkv = qkv.reshape(B, N, 3, num_heads, hd).transpose(2, 0, 3, 1, 4)
    q, k, v = qkv[0], qkv[1], qkv[2]
    attn = jnp.einsum("bhqd,bhkd->bhqk", q, k) * scale
    attn = jax.nn.softmax(attn, axis=-1)
    out = jnp.einsum("bhqk,bhkd->bhqd", attn, v)
    out = out.transpose(0, 2, 1, 3).reshape(B, N, C)
    return out @ params["w_proj"].T + params["b_proj"]


# ------------------------------------ main -------------------------------------

if __name__ == "__main__":
    # Small, TPU-aligned shapes: C % 128 == 0; module-default num_heads = 8.
    B, N, C = 2, 256, 128
    num_heads = 8                       # head_dim = 16

    key = jax.random.PRNGKey(0)
    kx, k1, k2, k3, k4 = jax.random.split(key, 5)
    x = jax.random.normal(kx, (B, N, C), dtype=jnp.float32)
    params = {
        "w_qkv": jax.random.normal(k1, (3 * C, C), jnp.float32) * (C ** -0.5),
        "b_qkv": jax.random.normal(k2, (3 * C,), jnp.float32) * 0.02,
        "w_proj": jax.random.normal(k3, (C, C), jnp.float32) * (C ** -0.5),
        "b_proj": jax.random.normal(k4, (C,), jnp.float32) * 0.02,
    }

    # --- production path: bf16 MXU operands, f32 softmax state / accumulators ---
    x_bf = x.astype(jnp.bfloat16)
    params_bf = jax.tree.map(lambda a: a.astype(jnp.bfloat16), params)
    out_bf = jax.block_until_ready(attention_forward(x_bf, params_bf, num_heads))
    ref_bf = attention_reference(
        x_bf.astype(jnp.float32),
        jax.tree.map(lambda a: a.astype(jnp.float32), params_bf), num_heads)
    assert out_bf.shape == (B, N, C) and out_bf.dtype == jnp.bfloat16
    err_bf = jnp.max(jnp.abs(out_bf.astype(jnp.float32) - ref_bf))
    assert jnp.allclose(out_bf.astype(jnp.float32), ref_bf, atol=1e-1, rtol=1e-1), (
        f"bf16 mismatch vs reference: max abs err = {err_bf:.3e}")

    # --- f32 parity path (smaller tiles exercise multi-step online softmax) ---
    out_f32 = jax.block_until_ready(
        attention_forward(x, params, num_heads, block_q=128, block_kv=128))
    ref_f32 = attention_reference(x, params, num_heads)
    err_f32 = jnp.max(jnp.abs(out_f32 - ref_f32))
    assert jnp.allclose(out_f32, ref_f32, atol=2e-3, rtol=2e-3), (
        f"f32 mismatch vs reference: max abs err = {err_f32:.3e}")

    print("KERNEL_OK")
</pallas_src>

<mosaic_0001>
module attributes {stable_mosaic.version = 11 : i64} {
  func.func @_qkv_head_split_kernel(%arg0: i32, %arg1: i32, %arg2: memref<1x256x128xbf16, #tpu.memory_space<vmem>>, %arg3: memref<384x128xbf16, #tpu.memory_space<vmem>>, %arg4: memref<1x384xbf16, #tpu.memory_space<vmem>>, %arg5: memref<1x8x256x16xbf16, #tpu.memory_space<vmem>>, %arg6: memref<1x8x256x16xbf16, #tpu.memory_space<vmem>>, %arg7: memref<1x8x256x16xbf16, #tpu.memory_space<vmem>>) attributes {dimension_semantics = [#tpu.dimension_semantics<parallel>, #tpu.dimension_semantics<parallel>], iteration_bounds = array<i64: 2, 1>, scalar_prefetch = 0 : i64, scratch_operands = 0 : i64, tpu.core_type = #tpu.core_type<tc>, window_params = [{transform_indices = @transform_0, window_bounds = array<i64: 1, 256, 128>}, {pipeline_mode = #tpu.pipeline_mode<synchronous>, transform_indices = @transform_1, window_bounds = array<i64: 384, 128>}, {pipeline_mode = #tpu.pipeline_mode<synchronous>, transform_indices = @transform_2, window_bounds = array<i64: 1, 384>}, {transform_indices = @transform_3, window_bounds = array<i64: 1, 8, 256, 16>}, {transform_indices = @transform_4, window_bounds = array<i64: 1, 8, 256, 16>}, {transform_indices = @transform_5, window_bounds = array<i64: 1, 8, 256, 16>}]} {
    %c0 = arith.constant 0 : index
    %c0_0 = arith.constant 0 : index
    %c0_1 = arith.constant 0 : index
    %0 = vector.load %arg2[%c0, %c0_0, %c0_1] : memref<1x256x128xbf16, #tpu.memory_space<vmem>>, vector<1x256x128xbf16>
    %1 = vector.shape_cast %0 : vector<1x256x128xbf16> to vector<256x128xbf16>
    %c0_2 = arith.constant 0 : index
    %c0_3 = arith.constant 0 : index
    %2 = vector.load %arg3[%c0_2, %c0_3] : memref<384x128xbf16, #tpu.memory_space<vmem>>, vector<384x128xbf16>
    %cst = arith.constant dense<0.000000e+00> : vector<256x384xf32>
    %3 = tpu.matmul %1, %2, %cst {dimension_numbers = #tpu.dot_dimension_numbers<[1], [1], [0], [0], [0, 0, 1, 0], [], []>} : vector<256x128xbf16>, vector<384x128xbf16>, vector<256x384xf32> -> vector<256x384xf32>
    %c0_4 = arith.constant 0 : index
    %c0_5 = arith.constant 0 : index
    %4 = vector.load %arg4[%c0_4, %c0_5] : memref<1x384xbf16, #tpu.memory_space<vmem>>, vector<1x384xbf16>
    %5 = arith.extf %4 : vector<1x384xbf16> to vector<1x384xf32>
    %6 = vector.broadcast %5 : vector<1x384xf32> to vector<256x384xf32>
    %7 = arith.addf %3, %6 : vector<256x384xf32>
    %8 = arith.truncf %7 : vector<256x384xf32> to vector<256x384xbf16>
    %9 = vector.extract_strided_slice %8 {offsets = [0, 0], sizes = [256, 16], strides = [1, 1]} : vector<256x384xbf16> to vector<256x16xbf16>
    %c0_6 = arith.constant 0 : index
    %c0_7 = arith.constant 0 : index
    %c0_8 = arith.constant 0 : index
    %c0_9 = arith.constant 0 : index
    %10 = vector.load %arg5[%c0_6, %c0_7, %c0_8, %c0_9] : memref<1x8x256x16xbf16, #tpu.memory_space<vmem>>, vector<1x1x256x16xbf16>
    %11 = vector.shape_cast %10 : vector<1x1x256x16xbf16> to vector<256x16xbf16>
    %12 = vector.shape_cast %9 : vector<256x16xbf16> to vector<1x1x256x16xbf16>
    tpu.vector_store %arg5[%c0_6, %c0_7, %c0_8, %c0_9], %12 {strides = array<i32>} : memref<1x8x256x16xbf16, #tpu.memory_space<vmem>>, vector<1x1x256x16xbf16>,
    %13 = vector.extract_strided_slice %8 {offsets = [0, 16], sizes = [256, 16], strides = [1, 1]} : vector<256x384xbf16> to vector<256x16xbf16>
    %c0_10 = arith.constant 0 : index
    %c1 = arith.constant 1 : index
    %c0_11 = arith.constant 0 : index
    %c0_12 = arith.constant 0 : index
    %14 = vector.load %arg5[%c0_10, %c1, %c0_11, %c0_12] : memref<1x8x256x16xbf16, #tpu.memory_space<vmem>>, vector<1x1x256x16xbf16>
    %15 = vector.shape_cast %14 : vector<1x1x256x16xbf16> to vector<256x16xbf16>
    %16 = vector.shape_cast %13 : vector<256x16xbf16> to vector<1x1x256x16xbf16>
    tpu.vector_store %arg5[%c0_10, %c1, %c0_11, %c0_12], %16 {strides = array<i32>} : memref<1x8x256x16xbf16, #tpu.memory_space<vmem>>, vector<1x1x256x16xbf16>,
    %17 = vector.extract_strided_slice %8 {offsets = [0, 32], sizes = [256, 16], strides = [1, 1]} : vector<256x384xbf16> to vector<256x16xbf16>
    %c0_13 = arith.constant 0 : index
    %c2 = arith.constant 2 : index
    %c0_14 = arith.constant 0 : index
    %c0_15 = arith.constant 0 : index
    %18 = vector.load %arg5[%c0_13, %c2, %c0_14, %c0_15] : memref<1x8x256x16xbf16, #tpu.memory_space<vmem>>, vector<1x1x256x16xbf16>
    %19 = vector.shape_cast %18 : vector<1x1x256x16xbf16> to vector<256x16xbf16>
    %20 = vector.shape_cast %17 : vector<256x16xbf16> to vector<1x1x256x16xbf16>
    tpu.vector_store %arg5[%c0_13, %c2, %c0_14, %c0_15], %20 {strides = array<i32>} : memref<1x8x256x16xbf16, #tpu.memory_space<vmem>>, vector<1x1x256x16xbf16>,
    %21 = vector.extract_strided_slice %8 {offsets = [0, 48], sizes = [256, 16], strides = [1, 1]} : vector<256x384xbf16> to vector<256x16xbf16>
    %c0_16 = arith.constant 0 : index
    %c3 = arith.constant 3 : index
    %c0_17 = arith.constant 0 : index
    %c0_18 = arith.constant 0 : index
    %22 = vector.load %arg5[%c0_16, %c3, %c0_17, %c0_18] : memref<1x8x256x16xbf16, #tpu.memory_space<vmem>>, vector<1x1x256x16xbf16>
    %23 = vector.shape_cast %22 : vector<1x1x256x16xbf16> to vector<256x16xbf16>
    %24 = vector.shape_cast %21 : vector<256x16xbf16> to vector<1x1x256x16xbf16>
    tpu.vector_store %arg5[%c0_16, %c3, %c0_17, %c0_18], %24 {strides = array<i32>} : memref<1x8x256x16xbf16, #tpu.memory_space<vmem>>, vector<1x1x256x16xbf16>,
    %25 = vector.extract_strided_slice %8 {offsets = [0, 64], sizes = [256, 16], strides = [1, 1]} : vector<256x384xbf16> to vector<256x16xbf16>
    %c0_19 = arith.constant 0 : index
    %c4 = arith.constant 4 : index
    %c0_20 = arith.constant 0 : index
    %c0_21 = arith.constant 0 : index
    %26 = vector.load %arg5[%c0_19, %c4, %c0_20, %c0_21] : memref<1x8x256x16xbf16, #tpu.memory_space<vmem>>, vector<1x1x256x16xbf16>
    %27 = vector.shape_cast %26 : vector<1x1x256x16xbf16> to vector<256x16xbf16>
    %28 = vector.shape_cast %25 : vector<256x16xbf16> to vector<1x1x256x16xbf16>
    tpu.vector_store %arg5[%c0_19, %c4, %c0_20, %c0_21], %28 {strides = array<i32>} : memref<1x8x256x16xbf16, #tpu.memory_space<vmem>>, vector<1x1x256x16xbf16>,
    %29 = vector.extract_strided_slice %8 {offsets = [0, 80], sizes = [256, 16], strides = [1, 1]} : vector<256x384xbf16> to vector<256x16xbf16>
    %c0_22 = arith.constant 0 : index
    %c5 = arith.constant 5 : index
    %c0_23 = arith.constant 0 : index
    %c0_24 = arith.constant 0 : index
    %30 = vector.load %arg5[%c0_22, %c5, %c0_23, %c0_24] : memref<1x8x256x16xbf16, #tpu.memory_space<vmem>>, vector<1x1x256x16xbf16>
    %31 = vector.shape_cast %30 : vector<1x1x256x16xbf16> to vector<256x16xbf16>
    %32 = vector.shape_cast %29 : vector<256x16xbf16> to vector<1x1x256x16xbf16>
    tpu.vector_store %arg5[%c0_22, %c5, %c0_23, %c0_24], %32 {strides = array<i32>} : memref<1x8x256x16xbf16, #tpu.memory_space<vmem>>, vector<1x1x256x16xbf16>,
    %33 = vector.extract_strided_slice %8 {offsets = [0, 96], sizes = [256, 16], strides = [1, 1]} : vector<256x384xbf16> to vector<256x16xbf16>
    %c0_25 = arith.constant 0 : index
    %c6 = arith.constant 6 : index
    %c0_26 = arith.constant 0 : index
    %c0_27 = arith.constant 0 : index
    %34 = vector.load %arg5[%c0_25, %c6, %c0_26, %c0_27] : memref<1x8x256x16xbf16, #tpu.memory_space<vmem>>, vector<1x1x256x16xbf16>
    %35 = vector.shape_cast %34 : vector<1x1x256x16xbf16> to vector<256x16xbf16>
    %36 = vector.shape_cast %33 : vector<256x16xbf16> to vector<1x1x256x16xbf16>
    tpu.vector_store %arg5[%c0_25, %c6, %c0_26, %c0_27], %36 {strides = array<i32>} : memref<1x8x256x16xbf16, #tpu.memory_space<vmem>>, vector<1x1x256x16xbf16>,
    %37 = vector.extract_strided_slice %8 {offsets = [0, 112], sizes = [256, 16], strides = [1, 1]} : vector<256x384xbf16> to vector<256x16xbf16>
    %c0_28 = arith.constant 0 : index
    %c7 = arith.constant 7 : index
    %c0_29 = arith.constant 0 : index
    %c0_30 = arith.constant 0 : index
    %38 = vector.load %arg5[%c0_28, %c7, %c0_29, %c0_30] : memref<1x8x256x16xbf16, #tpu.memory_space<vmem>>, vector<1x1x256x16xbf16>
    %39 = vector.shape_cast %38 : vector<1x1x256x16xbf16> to vector<256x16xbf16>
    %40 = vector.shape_cast %37 : vector<256x16xbf16> to vector<1x1x256x16xbf16>
    tpu.vector_store %arg5[%c0_28, %c7, %c0_29, %c0_30], %40 {strides = array<i32>} : memref<1x8x256x16xbf16, #tpu.memory_space<vmem>>, vector<1x1x256x16xbf16>,
    %41 = vector.extract_strided_slice %8 {offsets = [0, 128], sizes = [256, 16], strides = [1, 1]} : vector<256x384xbf16> to vector<256x16xbf16>
    %c0_31 = arith.constant 0 : index
    %c0_32 = arith.constant 0 : index
    %c0_33 = arith.constant 0 : index
    %c0_34 = arith.constant 0 : index
    %42 = vector.load %arg6[%c0_31, %c0_32, %c0_33, %c0_34] : memref<1x8x256x16xbf16, #tpu.memory_space<vmem>>, vector<1x1x256x16xbf16>
    %43 = vector.shape_cast %42 : vector<1x1x256x16xbf16> to vector<256x16xbf16>
    %44 = vector.shape_cast %41 : vector<256x16xbf16> to vector<1x1x256x16xbf16>
    tpu.vector_store %arg6[%c0_31, %c0_32, %c0_33, %c0_34], %44 {strides = array<i32>} : memref<1x8x256x16xbf16, #tpu.memory_space<vmem>>, vector<1x1x256x16xbf16>,
    %45 = vector.extract_strided_slice %8 {offsets = [0, 144], sizes = [256, 16], strides = [1, 1]} : vector<256x384xbf16> to vector<256x16xbf16>
    %c0_35 = arith.constant 0 : index
    %c1_36 = arith.constant 1 : index
    %c0_37 = arith.constant 0 : index
    %c0_38 = arith.constant 0 : index
    %46 = vector.load %arg6[%c0_35, %c1_36, %c0_37, %c0_38] : memref<1x8x256x16xbf16, #tpu.memory_space<vmem>>, vector<1x1x256x16xbf16>
    %47 = vector.shape_cast %46 : vector<1x1x256x16xbf16> to vector<256x16xbf16>
    %48 = vector.shape_cast %45 : vector<256x16xbf16> to vector<1x1x256x16xbf16>
    tpu.vector_store %arg6[%c0_35, %c1_36, %c0_37, %c0_38], %48 {strides = array<i32>} : memref<1x8x256x16xbf16, #tpu.memory_space<vmem>>, vector<1x1x256x16xbf16>,
    %49 = vector.extract_strided_slice %8 {offsets = [0, 160], sizes = [256, 16], strides = [1, 1]} : vector<256x384xbf16> to vector<256x16xbf16>
    %c0_39 = arith.constant 0 : index
    %c2_40 = arith.constant 2 : index
    %c0_41 = arith.constant 0 : index
    %c0_42 = arith.constant 0 : index
    %50 = vector.load %arg6[%c0_39, %c2_40, %c0_41, %c0_42] : memref<1x8x256x16xbf16, #tpu.memory_space<vmem>>, vector<1x1x256x16xbf16>
    %51 = vector.shape_cast %50 : vector<1x1x256x16xbf16> to vector<256x16xbf16>
    %52 = vector.shape_cast %49 : vector<256x16xbf16> to vector<1x1x256x16xbf16>
    tpu.vector_store %arg6[%c0_39, %c2_40, %c0_41, %c0_42], %52 {strides = array<i32>} : memref<1x8x256x16xbf16, #tpu.memory_space<vmem>>, vector<1x1x256x16xbf16>,
    %53 = vector.extract_strided_slice %8 {offsets = [0, 176], sizes = [256, 16], strides = [1, 1]} : vector<256x384xbf16> to vector<256x16xbf16>
    %c0_43 = arith.constant 0 : index
    %c3_44 = arith.constant 3 : index
    %c0_45 = arith.constant 0 : index
    %c0_46 = arith.constant 0 : index
    %54 = vector.load %arg6[%c0_43, %c3_44, %c0_45, %c0_46] : memref<1x8x256x16xbf16, #tpu.memory_space<vmem>>, vector<1x1x256x16xbf16>
    %55 = vector.shape_cast %54 : vector<1x1x256x16xbf16> to vector<256x16xbf16>
    %56 = vector.shape_cast %53 : vector<256x16xbf16> to vector<1x1x256x16xbf16>
    tpu.vector_store %arg6[%c0_43, %c3_44, %c0_45, %c0_46], %56 {strides = array<i32>} : memref<1x8x256x16xbf16, #tpu.memory_space<vmem>>, vector<1x1x256x16xbf16>,
    %57 = vector.extract_strided_slice %8 {offsets = [0, 192], sizes = [256, 16], strides = [1, 1]} : vector<256x384xbf16> to vector<256x16xbf16>
    %c0_47 = arith.constant 0 : index
    %c4_48 = arith.constant 4 : index
    %c0_49 = arith.constant 0 : index
    %c0_50 = arith.constant 0 : index
    %58 = vector.load %arg6[%c0_47, %c4_48, %c0_49, %c0_50] : memref<1x8x256x16xbf16, #tpu.memory_space<vmem>>, vector<1x1x256x16xbf16>
    %59 = vector.shape_cast %58 : vector<1x1x256x16xbf16> to vector<256x16xbf16>
    %60 = vector.shape_cast %57 : vector<256x16xbf16> to vector<1x1x256x16xbf16>
    tpu.vector_store %arg6[%c0_47, %c4_48, %c0_49, %c0_50], %60 {strides = array<i32>} : memref<1x8x256x16xbf16, #tpu.memory_space<vmem>>, vector<1x1x256x16xbf16>,
    %61 = vector.extract_strided_slice %8 {offsets = [0, 208], sizes = [256, 16], strides = [1, 1]} : vector<256x384xbf16> to vector<256x16xbf16>
    %c0_51 = arith.constant 0 : index
    %c5_52 = arith.constant 5 : index
    %c0_53 = arith.constant 0 : index
    %c0_54 = arith.constant 0 : index
    %62 = vector.load %arg6[%c0_51, %c5_52, %c0_53, %c0_54] : memref<1x8x256x16xbf16, #tpu.memory_space<vmem>>, vector<1x1x256x16xbf16>
    %63 = vector.shape_cast %62 : vector<1x1x256x16xbf16> to vector<256x16xbf16>
    %64 = vector.shape_cast %61 : vector<256x16xbf16> to vector<1x1x256x16xbf16>
    tpu.vector_store %arg6[%c0_51, %c5_52, %c0_53, %c0_54], %64 {strides = array<i32>} : memref<1x8x256x16xbf16, #tpu.memory_space<vmem>>, vector<1x1x256x16xbf16>,
    %65 = vector.extract_strided_slice %8 {offsets = [0, 224], sizes = [256, 16], strides = [1, 1]} : vector<256x384xbf16> to vector<256x16xbf16>
    %c0_55 = arith.constant 0 : index
    %c6_56 = arith.constant 6 : index
    %c0_57 = arith.constant 0 : index
    %c0_58 = arith.constant 0 : index
    %66 = vector.load %arg6[%c0_55, %c6_56, %c0_57, %c0_58] : memref<1x8x256x16xbf16, #tpu.memory_space<vmem>>, vector<1x1x256x16xbf16>
    %67 = vector.shape_cast %66 : vector<1x1x256x16xbf16> to vector<256x16xbf16>
    %68 = vector.shape_cast %65 : vector<256x16xbf16> to vector<1x1x256x16xbf16>
    tpu.vector_store %arg6[%c0_55, %c6_56, %c0_57, %c0_58], %68 {strides = array<i32>} : memref<1x8x256x16xbf16, #tpu.memory_space<vmem>>, vector<1x1x256x16xbf16>,
    %69 = vector.extract_strided_slice %8 {offsets = [0, 240], sizes = [256, 16], strides = [1, 1]} : vector<256x384xbf16> to vector<256x16xbf16>
    %c0_59 = arith.constant 0 : index
    %c7_60 = arith.constant 7 : index
    %c0_61 = arith.constant 0 : index
    %c0_62 = arith.constant 0 : index
    %70 = vector.load %arg6[%c0_59, %c7_60, %c0_61, %c0_62] : memref<1x8x256x16xbf16, #tpu.memory_space<vmem>>, vector<1x1x256x16xbf16>
    %71 = vector.shape_cast %70 : vector<1x1x256x16xbf16> to vector<256x16xbf16>
    %72 = vector.shape_cast %69 : vector<256x16xbf16> to vector<1x1x256x16xbf16>
    tpu.vector_store %arg6[%c0_59, %c7_60, %c0_61, %c0_62], %72 {strides = array<i32>} : memref<1x8x256x16xbf16, #tpu.memory_space<vmem>>, vector<1x1x256x16xbf16>,
    %73 = vector.extract_strided_slice %8 {offsets = [0, 256], sizes = [256, 16], strides = [1, 1]} : vector<256x384xbf16> to vector<256x16xbf16>
    %c0_63 = arith.constant 0 : index
    %c0_64 = arith.constant 0 : index
    %c0_65 = arith.constant 0 : index
    %c0_66 = arith.constant 0 : index
    %74 = vector.load %arg7[%c0_63, %c0_64, %c0_65, %c0_66] : memref<1x8x256x16xbf16, #tpu.memory_space<vmem>>, vector<1x1x256x16xbf16>
    %75 = vector.shape_cast %74 : vector<1x1x256x16xbf16> to vector<256x16xbf16>
    %76 = vector.shape_cast %73 : vector<256x16xbf16> to vector<1x1x256x16xbf16>
    tpu.vector_store %arg7[%c0_63, %c0_64, %c0_65, %c0_66], %76 {strides = array<i32>} : memref<1x8x256x16xbf16, #tpu.memory_space<vmem>>, vector<1x1x256x16xbf16>,
    %77 = vector.extract_strided_slice %8 {offsets = [0, 272], sizes = [256, 16], strides = [1, 1]} : vector<256x384xbf16> to vector<256x16xbf16>
    %c0_67 = arith.constant 0 : index
    %c1_68 = arith.constant 1 : index
    %c0_69 = arith.constant 0 : index
    %c0_70 = arith.constant 0 : index
    %78 = vector.load %arg7[%c0_67, %c1_68, %c0_69, %c0_70] : memref<1x8x256x16xbf16, #tpu.memory_space<vmem>>, vector<1x1x256x16xbf16>
    %79 = vector.shape_cast %78 : vector<1x1x256x16xbf16> to vector<256x16xbf16>
    %80 = vector.shape_cast %77 : vector<256x16xbf16> to vector<1x1x256x16xbf16>
    tpu.vector_store %arg7[%c0_67, %c1_68, %c0_69, %c0_70], %80 {strides = array<i32>} : memref<1x8x256x16xbf16, #tpu.memory_space<vmem>>, vector<1x1x256x16xbf16>,
    %81 = vector.extract_strided_slice %8 {offsets = [0, 288], sizes = [256, 16], strides = [1, 1]} : vector<256x384xbf16> to vector<256x16xbf16>
    %c0_71 = arith.constant 0 : index
    %c2_72 = arith.constant 2 : index
    %c0_73 = arith.constant 0 : index
    %c0_74 = arith.constant 0 : index
    %82 = vector.load %arg7[%c0_71, %c2_72, %c0_73, %c0_74] : memref<1x8x256x16xbf16, #tpu.memory_space<vmem>>, vector<1x1x256x16xbf16>
    %83 = vector.shape_cast %82 : vector<1x1x256x16xbf16> to vector<256x16xbf16>
    %84 = vector.shape_cast %81 : vector<256x16xbf16> to vector<1x1x256x16xbf16>
    tpu.vector_store %arg7[%c0_71, %c2_72, %c0_73, %c0_74], %84 {strides = array<i32>} : memref<1x8x256x16xbf16, #tpu.memory_space<vmem>>, vector<1x1x256x16xbf16>,
    %85 = vector.extract_strided_slice %8 {offsets = [0, 304], sizes = [256, 16], strides = [1, 1]} : vector<256x384xbf16> to vector<256x16xbf16>
    %c0_75 = arith.constant 0 : index
    %c3_76 = arith.constant 3 : index
    %c0_77 = arith.constant 0 : index
    %c0_78 = arith.constant 0 : index
    %86 = vector.load %arg7[%c0_75, %c3_76, %c0_77, %c0_78] : memref<1x8x256x16xbf16, #tpu.memory_space<vmem>>, vector<1x1x256x16xbf16>
    %87 = vector.shape_cast %86 : vector<1x1x256x16xbf16> to vector<256x16xbf16>
    %88 = vector.shape_cast %85 : vector<256x16xbf16> to vector<1x1x256x16xbf16>
    tpu.vector_store %arg7[%c0_75, %c3_76, %c0_77, %c0_78], %88 {strides = array<i32>} : memref<1x8x256x16xbf16, #tpu.memory_space<vmem>>, vector<1x1x256x16xbf16>,
    %89 = vector.extract_strided_slice %8 {offsets = [0, 320], sizes = [256, 16], strides = [1, 1]} : vector<256x384xbf16> to vector<256x16xbf16>
    %c0_79 = arith.constant 0 : index
    %c4_80 = arith.constant 4 : index
    %c0_81 = arith.constant 0 : index
    %c0_82 = arith.constant 0 : index
    %90 = vector.load %arg7[%c0_79, %c4_80, %c0_81, %c0_82] : memref<1x8x256x16xbf16, #tpu.memory_space<vmem>>, vector<1x1x256x16xbf16>
    %91 = vector.shape_cast %90 : vector<1x1x256x16xbf16> to vector<256x16xbf16>
    %92 = vector.shape_cast %89 : vector<256x16xbf16> to vector<1x1x256x16xbf16>
    tpu.vector_store %arg7[%c0_79, %c4_80, %c0_81, %c0_82], %92 {strides = array<i32>} : memref<1x8x256x16xbf16, #tpu.memory_space<vmem>>, vector<1x1x256x16xbf16>,
    %93 = vector.extract_strided_slice %8 {offsets = [0, 336], sizes = [256, 16], strides = [1, 1]} : vector<256x384xbf16> to vector<256x16xbf16>
    %c0_83 = arith.constant 0 : index
    %c5_84 = arith.constant 5 : index
    %c0_85 = arith.constant 0 : index
    %c0_86 = arith.constant 0 : index
    %94 = vector.load %arg7[%c0_83, %c5_84, %c0_85, %c0_86] : memref<1x8x256x16xbf16, #tpu.memory_space<vmem>>, vector<1x1x256x16xbf16>
    %95 = vector.shape_cast %94 : vector<1x1x256x16xbf16> to vector<256x16xbf16>
    %96 = vector.shape_cast %93 : vector<256x16xbf16> to vector<1x1x256x16xbf16>
    tpu.vector_store %arg7[%c0_83, %c5_84, %c0_85, %c0_86], %96 {strides = array<i32>} : memref<1x8x256x16xbf16, #tpu.memory_space<vmem>>, vector<1x1x256x16xbf16>,
    %97 = vector.extract_strided_slice %8 {offsets = [0, 352], sizes = [256, 16], strides = [1, 1]} : vector<256x384xbf16> to vector<256x16xbf16>
    %c0_87 = arith.constant 0 : index
    %c6_88 = arith.constant 6 : index
    %c0_89 = arith.constant 0 : index
    %c0_90 = arith.constant 0 : index
    %98 = vector.load %arg7[%c0_87, %c6_88, %c0_89, %c0_90] : memref<1x8x256x16xbf16, #tpu.memory_space<vmem>>, vector<1x1x256x16xbf16>
    %99 = vector.shape_cast %98 : vector<1x1x256x16xbf16> to vector<256x16xbf16>
    %100 = vector.shape_cast %97 : vector<256x16xbf16> to vector<1x1x256x16xbf16>
    tpu.vector_store %arg7[%c0_87, %c6_88, %c0_89, %c0_90], %100 {strides = array<i32>} : memref<1x8x256x16xbf16, #tpu.memory_space<vmem>>, vector<1x1x256x16xbf16>,
    %101 = vector.extract_strided_slice %8 {offsets = [0, 368], sizes = [256, 16], strides = [1, 1]} : vector<256x384xbf16> to vector<256x16xbf16>
    %c0_91 = arith.constant 0 : index
    %c7_92 = arith.constant 7 : index
    %c0_93 = arith.constant 0 : index
    %c0_94 = arith.constant 0 : index
    %102 = vector.load %arg7[%c0_91, %c7_92, %c0_93, %c0_94] : memref<1x8x256x16xbf16, #tpu.memory_space<vmem>>, vector<1x1x256x16xbf16>
    %103 = vector.shape_cast %102 : vector<1x1x256x16xbf16> to vector<256x16xbf16>
    %104 = vector.shape_cast %101 : vector<256x16xbf16> to vector<1x1x256x16xbf16>
    tpu.vector_store %arg7[%c0_91, %c7_92, %c0_93, %c0_94], %104 {strides = array<i32>} : memref<1x8x256x16xbf16, #tpu.memory_space<vmem>>, vector<1x1x256x16xbf16>,
    return
  }
  func.func @transform_0(%arg0: i32, %arg1: i32) -> (i32, i32, i32) {
    %c0_i32 = arith.constant 0 : i32
    %c0_i32_0 = arith.constant 0 : i32
    return %arg0, %arg1, %c0_i32 : i32, i32, i32
  }
  func.func @transform_1(%arg0: i32, %arg1: i32) -> (i32, i32) {
    %c0_i32 = arith.constant 0 : i32
    %c0_i32_0 = arith.constant 0 : i32
    %c0_i32_1 = arith.constant 0 : i32
    return %c0_i32, %c0_i32_0 : i32, i32
  }
  func.func @transform_2(%arg0: i32, %arg1: i32) -> (i32, i32) {
    %c0_i32 = arith.constant 0 : i32
    %c0_i32_0 = arith.constant 0 : i32
    %c0_i32_1 = arith.constant 0 : i32
    return %c0_i32, %c0_i32_0 : i32, i32
  }
  func.func @transform_3(%arg0: i32, %arg1: i32) -> (i32, i32, i32, i32) {
    %c0_i32 = arith.constant 0 : i32
    %c0_i32_0 = arith.constant 0 : i32
    %c0_i32_1 = arith.constant 0 : i32
    return %arg0, %c0_i32, %arg1, %c0_i32_0 : i32, i32, i32, i32
  }
  func.func @transform_4(%arg0: i32, %arg1: i32) -> (i32, i32, i32, i32) {
    %c0_i32 = arith.constant 0 : i32
    %c0_i32_0 = arith.constant 0 : i32
    %c0_i32_1 = arith.constant 0 : i32
    return %arg0, %c0_i32, %arg1, %c0_i32_0 : i32, i32, i32, i32
  }
  func.func @transform_5(%arg0: i32, %arg1: i32) -> (i32, i32, i32, i32) {
    %c0_i32 = arith.constant 0 : i32
    %c0_i32_0 = arith.constant 0 : i32
    %c0_i32_1 = arith.constant 0 : i32
    return %arg0, %c0_i32, %arg1, %c0_i32_0 : i32, i32, i32, i32
  }
}

</mosaic_0001>

<bundles_post_ra>
// kernel: tpu_custom_call.1
= control target key start
LH: loop header
LB: loop body
LE: loop exit
PB: predicated region body
PF: predicated region fallthrough
CT: control target
= control target key end

     0   :  { %11 = vsyncpa [#allocation3], 0  ;;  %s9270_s0 = inlined_call_operand.hbm [shape: bf16[2,256,128], index: 0, kind: input, shape index: {}]   ;;  %s9271_s1 = inlined_call_operand.hbm [shape: bf16[384,128], index: 1, kind: input, shape index: {}]   ;;  %s9272_s2 = inlined_call_operand.vmem [shape: bf16[1,384], index: 2, kind: input, shape index: {}]   ;;  %s9273_s3 = inlined_call_operand.vmem [shape: bf16[2,8,256,16], index: 3, kind: output, shape index: {0}]   ;;  %s9274_s4 = inlined_call_operand.vmem [shape: bf16[2,8,256,16], index: 4, kind: output, shape index: {1}]   ;;  %s9275_s5 = inlined_call_operand.vmem [shape: bf16[2,8,256,16], index: 5, kind: output, shape index: {2}]  }
   0x1   :  { %13 = vsyncpa [#allocation3 + $0x1], 0 }
   0x2   :  { %14 = vsyncpa [#allocation5], 0  ;;  %s5767_s18 = smov 0   ;;  %s5769_s19 = smov 0  }
   0x3   :  { %s5771_s20 = smov 0   ;;  %s5773_s21 = smov 0  }
   0x4   :  { %s5775_s22 = smov 0   ;;  %s5777_s23 = smov 0  }
   0x5 LB: > { %s4435_s24 = sadd.s32 4294967295, %s5724_s23   ;;  %p54_p0 = scmp.ne.s32.totalorder %s5708_s19, %s5704_s18  ;;  %s5724_s23 = sphi %s5777_s23, %s20_s23   ;;  %s5720_s22 = sphi %s5775_s22, %s9320_s22   ;;  %s5716_s21 = sphi %s5773_s21, %s9319_s21   ;;  %s5712_s20 = sphi %s5771_s20, %s9318_s20   ;;  %s5708_s19 = sphi %s5769_s19, %s9317_s19   ;;  %s5704_s18 = sphi %s5767_s18, %s9316_s18  }
   0x6   : > { %p5797_p1 = scmp.eq.s32.totalorder %s4435_s24, 0  ;;  %p4437_p2 = scmp.ge.s32.totalorder %s5724_s23, 1 }
   0x7   : > { %p191_p3 = scmp.lt.s32.totalorder %s5724_s23, 3  ;;  %s5726_s28 = smov [#allocation4]  }
   0x8   : > { %s9294_s25 = scalar_select %p5797_p1, 1, 0 }
   0x9   : > { %p5805_p4 = por %p5797_p1, %p54_p0  ;;  %p5809_p5 = pnand %p4437_p2, %p191_p3 }
   0xa   : > { %s203_s29 = sshll.u32 %s5726_s28, 4  ;;  %s32_s6 = sadd.s32 1, %s5720_s22  ;;  %s204_s29 = int_to_ptr.vmem [resolvable:$true] %s203_s29 }
   0xb   : > { %s9295_s26 = scalar_select %p5805_p4, 1, 0 }
   0xc   : > { %s9296_s27 = scalar_select %p5809_p5, 1, 0 }
   0xd   : > { %p5488_p6 = pneg %p5809_p5  ;;  %s5612_s9 = scalar_lea.hbm %s9271_s1, 3072 }
   0xe   : > { %p5613_p8 = scmp.ne.s32.totalorder %s9271_s1, %s5612_s9  ;;  %p5619_p12 = scmp.lt.u32.totalorder %s5612_s9, %s9271_s1 }
   0xf   : > { %p5817_p7 = pnand %p5488_p6, %p5797_p1 }
  0x11   : > { %p5614_p9 = pneg %p5817_p7 }
  0x13   : > { %p5615_p10 = pnand %p5614_p9, %p5613_p8 }
  0x15   : > { %p5616_p11 = pneg %p5615_p10 }
  0x17   : > { %p5621_p13 = pnand %p5619_p12, %p5616_p11 }
  0x19   : > { %5624 = shalt.err (!%p5621_p13)
}
  0x1a   : > { %s5625_s14 = scalar_lea.vmem %s204_s29, 3072  ;;  %p5633_p6 = scmp.lt.s32.totalorder %s204_s29, %s204_s29 }
  0x1b   : > { %p5626_p0 = scmp.ne.s32.totalorder %s204_s29, %s5625_s14  ;;  %p5634_p1 = scmp.lt.s32.totalorder %s5625_s14, %s5625_s14 }
  0x1d   : > { %p5628_p2 = pnand %p5626_p0, %p5614_p9  ;;  %p5635_p4 = por %p5634_p1, %p5633_p6 }
  0x1f   : > { %p5629_p3 = pneg %p5628_p2 }
  0x21   : > { %p5636_p5 = pnand %p5635_p4, %p5629_p3 }
  0x23   : > { %5639 = shalt.err (!%p5636_p5)
}
  0x24   : > { %s5727_s15 = smov 64   ;;  %s5728_s16 = smov 4  }
  0x25   : > { %5491 = dma.hbm_to_vmem [thread:$0]  (!%p5817_p7), %s9271_s1, 3072, %s204_s29, [#allocation5], %s5727_s15, %s5727_s15, %s5728_s16  }
  0x26   : > { %p34_p1 = scmp.ge.s32.totalorder %s32_s6, 2  ;;  %s41_s24 = sadd.s32 1, %s5712_s20 }
  0x27   : > { %p48_p4 = scmp.ne.s32.totalorder %s5712_s20, %s5708_s19  ;;  %p49_p5 = scmp.eq.s32.totalorder %s5724_s23, 0 }
  0x28   : > { %s9322_s6 = smov (%p34_p1, %s32_s6), 0  ;;  %p5497_p9 = scmp.lt.s32.totalorder %s5724_s23, 2 }
  0x29   : > { %p50_p8 = por %p49_p5, %p48_p4  ;;  %s36_s28 = ssub.s32 %s5720_s22, %s9322_s6 }
  0x2a   : > { %s220_s7 = sand.u32 1, %s5712_s20   ;;  %p39_p10 = scmp.eq.s32.totalorder %s36_s28, 0 }
  0x2b   : > { %s4440_s30 = sshll.u32 %s220_s7, 7  ;;  %s5262_s8 = sshll.u32 %s5720_s22, 11 }
  0x2c   : > { %s5853_s9 = scalar_select %p39_p10, %s5712_s20, %s41_s24  }
  0x2d   : > { %s5858_s29 = scalar_lea.hbm %s9270_s0, %s5262_s8  ;;  %s224_s12 = scalar_lea.vmem [#allocation2], %s4440_s30 }
  0x2e   : > { %s233_s13 = sshll.u32 %s224_s12, 4  ;;  %p5860_p7 = pnand %p5497_p9, %p50_p8  ;;  %s5864_s13 = int_to_ptr.vmem [resolvable:$true] %s233_s13 }
  0x2f   : > { %s5866_s17 = scalar_lea.sflag [#allocation3], %s220_s7  ;;  %s5640_s18 = scalar_lea.hbm %s5858_s29, 2048 }
  0x30   : > { %p5641_p11 = scmp.ne.s32.totalorder %s5858_s29, %s5640_s18  ;;  %p5642_p12 = pneg %p5860_p7 }
  0x31   : > { %s5645_s30 = scalar_lea.hbm %s9270_s0, 4096  ;;  %p5646_p2 = scmp.lt.u32.totalorder %s5858_s29, %s9270_s0 }
  0x32   : > { %p5643_p13 = pnand %p5642_p12, %p5641_p11  ;;  %p5647_p3 = scmp.lt.u32.totalorder %s5645_s30, %s5640_s18 }
  0x33   : > { %p5649_p1 = scmp.lt.u32.totalorder %s5640_s18, %s5858_s29 }
  0x34   : > { %p5644_p0 = pneg %p5643_p13  ;;  %p5648_p6 = por %p5647_p3, %p5646_p2 }
  0x36   : > { %p5650_p4 = por %p5649_p1, %p5648_p6 }
  0x38   : > { %p5651_p5 = pnand %p5650_p4, %p5644_p0 }
  0x3a   : > { %5654 = shalt.err (!%p5651_p5)
}
  0x3b   : > { %s5655_s7 = scalar_lea.vmem %s5864_s13, 2048  ;;  %s5729_s11 = smov [#allocation2]  }
  0x3c   : > { %p5656_p8 = scmp.ne.s32.totalorder %s5864_s13, %s5655_s7  ;;  %s5660_s12 = sshll.u32 %s5729_s11, 4  ;;  %s5661_s12 = int_to_ptr.vmem [resolvable:$false] %s5660_s12 }
  0x3d   : > { %s5662_s24 = scalar_lea.vmem %s5661_s12, 4096  ;;  %p5663_p11 = scmp.lt.s32.totalorder %s5864_s13, %s5661_s12 }
  0x3e   : > { %p5658_p9 = pnand %p5656_p8, %p5642_p12  ;;  %p5664_p13 = scmp.lt.s32.totalorder %s5662_s24, %s5655_s7 }
  0x40   : > { %p5659_p10 = pneg %p5658_p9  ;;  %p5665_p2 = por %p5664_p13, %p5663_p11 }
  0x42   : > { %p5666_p3 = pnand %p5665_p2, %p5659_p10 }
  0x44   : > { %5669 = shalt.err (!%p5666_p3)
}
  0x45   : > { %5495 = dma.hbm_to_vmem [thread:$0]  (!%p5860_p7), %s5858_s29, 2048, %s5864_s13, %s5866_s17, %s5727_s15, %s5727_s15, %s5728_s16  }
  0x46   : > { %p9299_p12 = scmp.ne.s32.totalorder %s9296_s27, 0 }
  0x48   : > { %245 = sbr.rel (%p9299_p12) target bundleno = 1825 (0x721), region = 32 }
  0x4f   : > { %s247_s18 = sand.u32 1, %s5708_s19   ;;  %p9300_p0 = scmp.ne.s32.totalorder %s9295_s26, 0 }
  0x50   : > { %s4444_s28 = sshll.u32 %s247_s18, 7  ;;  %s248_s30 = scalar_lea.sflag [#allocation3], %s247_s18 }
  0x51   : > { %s5900_s8 = scalar_lea.vmem [#allocation2], %s4444_s28 }
  0x52   : > { %5695 = dma.done.wait (%p9300_p0), %s248_s30, 2048  }
  0x53   : > { %5697 = vsyncadd (%p9300_p0), %s248_s30, 4294965248  ;;  %p9301_p6 = scmp.ne.s32.totalorder %s9294_s25, 0 }
  0x55   : > { %5699 = dma.done.wait (%p9301_p6), [#allocation5], 3072  }
  0x56   : > { %5701 = vsyncadd (%p9301_p6), [#allocation5], 4294964224  ;;  %v5557_v0 = vld [vmem:[#allocation4 + $0x40] sm:$0xff]   ;;  %v5559_v2 = vld [vmem:[#allocation4 + $0x48] sm:$0xff]   ;;  %v419_v29 = vlaneseq  ;;  %p306_p7 = scmp.lt.s32.totalorder %s5716_s21, 1  ;;  %vm1200_vm0 = vcmask 125952  }
  0x57   : > { %v5558_v1 = vld [vmem:[#allocation4] sm:$0xff]   ;;  %5362 = vmatprep.subr.bf16.mxu0 %v5557_v0  ;;  %v5560_v3 = vld [vmem:[#allocation4 + $0x8] sm:$0xff]   ;;  %v5561_v4 = vld [vmem:[#allocation4 + $0x50] sm:$0xff]   ;;  %s5730_s17 = smov 112   ;;  %s5731_s10 = smov 96  }
  0x58   : > { %5363 = vmatpush3.bf16.xpose.msra.mxu0 %v5558_v1  ;;  %v5562_v5 = vld [vmem:[#allocation4 + $0x10] sm:$0xff]   ;;  %v5563_v6 = vld [vmem:[#allocation4 + $0x58] sm:$0xff]   ;;  %v5573_v7 = vld [vmem:[%s5900_s8] sm:$0xff]   ;;  %v5923_v30 = vshrl.u32 %v419_v29, 7  ;;  %s9324_s21 = smov (!%p306_p7, %s5716_s21), 1  ;;  %s5732_s7 = smov 80  }
  0x59   : > { %5364 = vmatprep.subr.bf16.mxu0 %v5559_v2  ;;  %5378 = vmatprep.mubr.bf16.mxu0 %v5573_v7  ;;  %v5564_v8 = vld [vmem:[#allocation4 + $0x18] sm:$0xff]   ;;  %v5565_v9 = vld [vmem:[#allocation4 + $0x60] sm:$0xff]   ;;  %v5567_v11 = vld [vmem:[#allocation4 + $0x68] sm:$0xff]   ;;  %s5946_s27 = sshll.u32 %s9324_s21, 10  ;;  %s5733_s11 = smov 64  }
  0x5a   : > { %5450 = vmatprep.mubr.bf16.mxu1 %v5573_v7  ;;  %v5566_v10 = vld [vmem:[#allocation4 + $0x20] sm:$0xff]   ;;  %v5568_v12 = vld [vmem:[#allocation4 + $0x28] sm:$0xff]   ;;  %v5569_v13 = vld [vmem:[#allocation4 + $0x70] sm:$0xff]   ;;  %v5931_v33 = vsub.s32 0, %v5923_v30  ;;  %v425_v34 = vsub.s32 2, %v5923_v30  ;;  %s5953_s29 = scalar_lea.vmem %s9273_s3, %s5946_s27  ;;  %s5962_s14 = scalar_lea.vmem %s9274_s4, %s5946_s27 }
  0x5b   : > { %v5570_v14 = vld [vmem:[#allocation4 + $0x30] sm:$0xff]   ;;  %v5571_v15 = vld [vmem:[#allocation4 + $0x78] sm:$0xff]   ;;  %v5574_v17 = vld [vmem:[%s5900_s8 + $0x8] sm:$0xff]   ;;  %s5734_s12 = smov 48   ;;  %s5735_s24 = smov 32  }
  0x5c   : > { %v5572_v16 = vld [vmem:[#allocation4 + $0x38] sm:$0xff]   ;;  %v5575_v18 = vld [vmem:[%s5900_s8 + $0x10] sm:$0xff]   ;;  %v5577_v20 = vld [vmem:[%s5900_s8 + $0x20] sm:$0xff]   ;;  %s5736_s18 = smov 16  }
  0x5d   : > { %v5576_v19 = vld [vmem:[%s5900_s8 + $0x18] sm:$0xff]   ;;  %v5578_v21 = vld [vmem:[%s5900_s8 + $0x28] sm:$0xff]   ;;  %v5579_v22 = vld [vmem:[%s5900_s8 + $0x30] sm:$0xff]  }
  0x5e   : > { %v5580_v23 = vld [vmem:[%s5900_s8 + $0x38] sm:$0xff]   ;;  %v5581_v24 = vld [vmem:[%s5900_s8 + $0x40] sm:$0xff]   ;;  %v5582_v25 = vld [vmem:[%s5900_s8 + $0x48] sm:$0xff]  }
  0x5f   : > { %v5583_v26 = vld [vmem:[%s5900_s8 + $0x50] sm:$0xff]   ;;  %v5584_v27 = vld [vmem:[%s5900_s8 + $0x58] sm:$0xff]   ;;  %v5585_v28 = vld [vmem:[%s5900_s8 + $0x60] sm:$0xff]  }
  0x60   : > { %5365 = vmatpush3.bf16.xpose.msra.mxu0 %v5560_v3  ;;  %v416_v31 = vld [vmem:[%s9272_s2] sm:$0x7]  ;;  %v5586_v37 = vld [vmem:[%s5900_s8 + $0x68] sm:$0xff]  }
  0x61   : > { %5366 = vmatprep.subr.bf16.mxu0 %v5561_v4  ;;  %v5928_v32 = vunpack.c.l.bf16 %v416_v31 }
  0x63   : > { %v422_v35 = vrot.slane %v5928_v32, %v5931_v33  ;;  %v426_v36 = vrot.slane %v5928_v32, %v425_v34 }
  0x65   : > { %v5941_v38 = vrot.slane %v422_v35, %v5931_v33  ;;  %v5944_v39 = vrot.slane %v426_v36, %v5931_v33 }
  0x68   : > { %5367 = vmatpush3.bf16.xpose.msra.mxu0 %v5562_v5 }
  0x69   : > { %5368 = vmatprep.subr.bf16.mxu0 %v5563_v6 }
  0x70   : > { %5369 = vmatpush3.bf16.xpose.msra.mxu0 %v5564_v8  ;;  %v5587_v8 = vld [vmem:[%s5900_s8 + $0x70] sm:$0xff]  }
  0x71   : > { %5370 = vmatprep.subr.bf16.mxu0 %v5565_v9 }
  0x78   : > { %5371 = vmatpush3.bf16.xpose.msra.mxu0 %v5566_v10 }
  0x79   : > { %5372 = vmatprep.subr.bf16.mxu0 %v5567_v11 }
  0x80   : > { %5373 = vmatpush3.bf16.xpose.msra.mxu0 %v5568_v12 }
  0x81   : > { %5374 = vmatprep.subr.bf16.mxu0 %v5569_v13 }
  0x88   : > { %5375 = vmatpush3.bf16.xpose.msra.mxu0 %v5570_v14 }
  0x89   : > { %5376 = vmatprep.subr.bf16.mxu0 %v5571_v15 }
  0x90   : > { %5377 = vmatpush3.bf16.xpose.msra.mxu0 %v5572_v16 }
  0x97   : > { %5379 = vmatmul.mubr.bf16.vlgmr.msra.gmra.mrb[0].mxu0 %v5573_v7 }
  0x98   : > { %5380 = vmatprep.mubr.bf16.mxu0 %v5574_v17 }
  0x9f   : > { %5381 = vmatmul.mubr.bf16.gmra.mrb[4].mxu0 %v5574_v17 }
  0xa0   : > { %5382 = vmatprep.mubr.bf16.mxu0 %v5575_v18 }
  0xa7   : > { %5383 = vmatmul.mubr.bf16.gmra.mrb[8].mxu0 %v5575_v18 }
  0xa8   : > { %5384 = vmatprep.mubr.bf16.mxu0 %v5576_v19 }
  0xaf   : > { %5385 = vmatmul.mubr.bf16.gmra.mrb[12].mxu0 %v5576_v19 }
  0xb0   : > { %5386 = vmatprep.mubr.bf16.mxu0 %v5577_v20 }
  0xb7   : > { %5387 = vmatmul.mubr.bf16.gmra.mrb[16].mxu0 %v5577_v20 }
  0xb8   : > { %5388 = vmatprep.mubr.bf16.mxu0 %v5578_v21 }
  0xbf   : > { %5389 = vmatmul.mubr.bf16.gmra.mrb[20].mxu0 %v5578_v21 }
  0xc0   : > { %5390 = vmatprep.mubr.bf16.mxu0 %v5579_v22 }
  0xc7   : > { %5391 = vmatmul.mubr.bf16.gmra.mrb[24].mxu0 %v5579_v22 }
  0xc8   : > { %5392 = vmatprep.mubr.bf16.mxu0 %v5580_v23 }
  0xcf   : > { %5393 = vmatmul.mubr.bf16.gmra.mrb[28].mxu0 %v5580_v23 }
  0xd0   : > { %5394 = vmatprep.mubr.bf16.mxu0 %v5581_v24 }
  0xd7   : > { %5395 = vmatmul.mubr.bf16.gmra.mrb[32].mxu0 %v5581_v24 }
  0xd8   : > { %5396 = vmatprep.mubr.bf16.mxu0 %v5582_v25 }
  0xdf   : > { %5397 = vmatmul.mubr.bf16.gmra.mrb[36].mxu0 %v5582_v25 }
  0xe0   : > { %5398 = vmatprep.mubr.bf16.mxu0 %v5583_v26 }
  0xe7   : > { %5399 = vmatmul.mubr.bf16.gmra.mrb[40].mxu0 %v5583_v26 }
  0xe8   : > { %5400 = vmatprep.mubr.bf16.mxu0 %v5584_v27 }
  0xef   : > { %5401 = vmatmul.mubr.bf16.gmra.mrb[44].mxu0 %v5584_v27 }
  0xf0   : > { %5402 = vmatprep.mubr.bf16.mxu0 %v5585_v28 }
  0xf7   : > { %5403 = vmatmul.mubr.bf16.gmra.mrb[48].mxu0 %v5585_v28 }
  0xf8   : > { %5404 = vmatprep.mubr.bf16.mxu0 %v5586_v37 }
  0xff   : > { %5405 = vmatmul.mubr.bf16.gmra.mrb[52].mxu0 %v5586_v37 }
 0x100   : > { %5406 = vmatprep.mubr.bf16.mxu0 %v5587_v8 }
 0x107   : > { %5407 = vmatmul.mubr.bf16.gmra.mrb[56].mxu0 %v5587_v8 }
 0x16a   : > { %v720_v40 = vpop.f32.mrb[0].mxu0 }
 0x16b   : > { %v721_v41 = vadd.f32 %v720_v40, %v5941_v38  ;;  %v722_v42 = vpop.f32.mrb[1].mxu0 }
 0x16c   : > { %v723_v43 = vadd.f32 %v722_v42, %v5944_v39  ;;  %v724_v44 = vpop.f32.mrb[2].mxu0 }
 0x16d   : > { %v5956_v45 = vpack.c.bf16 %v721_v41, %v721_v41  ;;  %v725_v46 = vadd.f32 %v724_v44, %v5941_v38  ;;  %v726_v47 = vpop.f32.mrb[3].mxu0 }
 0x16e   : > { %v5965_v48 = vpack.c.bf16 %v723_v43, %v723_v43  ;;  %v727_v49 = vadd.f32 %v726_v47, %v5944_v39 }
 0x16f   : > { %1201 = vst.msk [vmem:[%s5953_s29] sm:$0xf] %vm1200_vm0, %v5956_v45  ;;  %v5971_v50 = vpack.c.bf16 %v725_v46, %v725_v46  ;;  %1233 = vrot.lane.b32.xlu0 %v5956_v45, %s5730_s17 }
 0x170   : > { %2248 = vst.msk [vmem:[%s5962_s14] sm:$0xf] %vm1200_vm0, %v5965_v48  ;;  %v5978_v51 = vpack.c.bf16 %v727_v49, %v727_v49 }
 0x171   : > { %1202 = vst.msk [vmem:[%s5953_s29 + $0x4] sm:$0xf] %vm1200_vm0, %v5971_v50  ;;  %1364 = vrot.lane.b32.xlu1 %v5971_v50, %s5731_s10 }
 0x172   : > { %2249 = vst.msk [vmem:[%s5962_s14 + $0x4] sm:$0xf] %vm1200_vm0, %v5978_v51  ;;  %v730_v52 = vpop.f32.mrb[4].mxu0 }
 0x173   : > { %1362 = vrot.lane.b32.xlu0 %v5956_v45, %s5731_s10  ;;  %v731_v53 = vadd.f32 %v730_v52, %v5941_v38  ;;  %v732_v54 = vpop.f32.mrb[5].mxu0 }
 0x174   : > { %v733_v55 = vadd.f32 %v732_v54, %v5944_v39  ;;  %v734_v56 = vpop.f32.mrb[6].mxu0 }
 0x175   : > { %1493 = vrot.lane.b32.xlu1 %v5971_v50, %s5732_s7  ;;  %v5994_v57 = vpack.c.bf16 %v731_v53, %v731_v53  ;;  %v735_v58 = vadd.f32 %v734_v56, %v5941_v38  ;;  %v736_v59 = vpop.f32.mrb[7].mxu0 }
 0x176   : > { %v5997_v60 = vpack.c.bf16 %v733_v55, %v733_v55  ;;  %v737_v61 = vadd.f32 %v736_v59, %v5944_v39  ;;  %v5588_v55 = vld [vmem:[%s5900_s8 + $0x78] sm:$0xff]  }
 0x177   : > { %1491 = vrot.lane.b32.xlu0 %v5956_v45, %s5732_s7  ;;  %1203 = vst.msk [vmem:[%s5953_s29 + $0x8] sm:$0xf] %vm1200_vm0, %v5994_v57  ;;  %v6005_v62 = vpack.c.bf16 %v735_v58, %v735_v58  ;;  %5408 = vmatprep.mubr.bf16.mxu0 %v5588_v55 }
 0x178   : > { %2250 = vst.msk [vmem:[%s5962_s14 + $0x8] sm:$0xf] %vm1200_vm0, %v5997_v60  ;;  %v6010_v63 = vpack.c.bf16 %v737_v61, %v737_v61  ;;  %5409 = vmatmul.mubr.bf16.gmra.mrb[60].mxu0 %v5588_v55 }
 0x179   : > { %1622 = vrot.lane.b32.xlu1 %v5971_v50, %s5733_s11  ;;  %1204 = vst.msk [vmem:[%s5953_s29 + $0xc] sm:$0xf] %vm1200_vm0, %v6005_v62 }
 0x17a   : > { %2251 = vst.msk [vmem:[%s5962_s14 + $0xc] sm:$0xf] %vm1200_vm0, %v6010_v63  ;;  %v740_v0 = vpop.f32.mrb[8].mxu0 }
 0x17b   : > { %1620 = vrot.lane.b32.xlu0 %v5956_v45, %s5733_s11  ;;  %v741_v1 = vadd.f32 %v740_v0, %v5941_v38  ;;  %v742_v2 = vpop.f32.mrb[9].mxu0 }
 0x17c   : > { %v743_v3 = vadd.f32 %v742_v2, %v5944_v39  ;;  %v744_v4 = vpop.f32.mrb[10].mxu0 }
 0x17d   : > { %1751 = vrot.lane.b32.xlu1 %v5971_v50, %s5734_s12  ;;  %v6026_v5 = vpack.c.bf16 %v741_v1, %v741_v1  ;;  %v745_v6 = vadd.f32 %v744_v4, %v5941_v38  ;;  %v746_v7 = vpop.f32.mrb[11].mxu0 }
 0x17e   : > { %v6030_v9 = vpack.c.bf16 %v743_v3, %v743_v3  ;;  %v747_v10 = vadd.f32 %v746_v7, %v5944_v39 }
 0x17f   : > { %1749 = vrot.lane.b32.xlu0 %v5956_v45, %s5734_s12  ;;  %1205 = vst.msk [vmem:[%s5953_s29 + $0x10] sm:$0xf] %vm1200_vm0, %v6026_v5  ;;  %v6038_v11 = vpack.c.bf16 %v745_v6, %v745_v6 }
 0x180   : > { %2252 = vst.msk [vmem:[%s5962_s14 + $0x10] sm:$0xf] %vm1200_vm0, %v6030_v9  ;;  %v6043_v12 = vpack.c.bf16 %v747_v10, %v747_v10 }
 0x181   : > { %1880 = vrot.lane.b32.xlu1 %v5971_v50, %s5735_s24  ;;  %1206 = vst.msk [vmem:[%s5953_s29 + $0x14] sm:$0xf] %vm1200_vm0, %v6038_v11 }
 0x182   : > { %2253 = vst.msk [vmem:[%s5962_s14 + $0x14] sm:$0xf] %vm1200_vm0, %v6043_v12  ;;  %v750_v13 = vpop.f32.mrb[12].mxu0 }
 0x183   : > { %1878 = vrot.lane.b32.xlu0 %v5956_v45, %s5735_s24  ;;  %v751_v14 = vadd.f32 %v750_v13, %v5941_v38  ;;  %v752_v15 = vpop.f32.mrb[13].mxu0 }
 0x184   : > { %v753_v16 = vadd.f32 %v752_v15, %v5944_v39  ;;  %v754_v17 = vpop.f32.mrb[14].mxu0 }
 0x185   : > { %2009 = vrot.lane.b32.xlu1 %v5971_v50, %s5736_s18  ;;  %v6059_v18 = vpack.c.bf16 %v751_v14, %v751_v14  ;;  %v755_v19 = vadd.f32 %v754_v17, %v5941_v38  ;;  %v756_v20 = vpop.f32.mrb[15].mxu0 }
 0x186   : > { %v6062_v21 = vpack.c.bf16 %v753_v16, %v753_v16  ;;  %v757_v22 = vadd.f32 %v756_v20, %v5944_v39 }
 0x187   : > { %2007 = vrot.lane.b32.xlu0 %v5956_v45, %s5736_s18  ;;  %1207 = vst.msk [vmem:[%s5953_s29 + $0x18] sm:$0xf] %vm1200_vm0, %v6059_v18  ;;  %v6070_v23 = vpack.c.bf16 %v755_v19, %v755_v19 }
 0x188   : > { %2254 = vst.msk [vmem:[%s5962_s14 + $0x18] sm:$0xf] %vm1200_vm0, %v6062_v21  ;;  %v6075_v24 = vpack.c.bf16 %v757_v22, %v757_v22 }
 0x189   : > { %1237 = vrot.lane.b32.xlu1 %v5994_v57, %s5730_s17  ;;  %1208 = vst.msk [vmem:[%s5953_s29 + $0x1c] sm:$0xf] %vm1200_vm0, %v6070_v23 }
 0x18a   : > { %2255 = vst.msk [vmem:[%s5962_s14 + $0x1c] sm:$0xf] %vm1200_vm0, %v6075_v24  ;;  %v760_v25 = vpop.f32.mrb[16].mxu0 }
 0x18b   : > { %1235 = vrot.lane.b32.xlu0 %v5971_v50, %s5730_s17  ;;  %v761_v26 = vadd.f32 %v760_v25, %v5941_v38  ;;  %v762_v27 = vpop.f32.mrb[17].mxu0 }
 0x18c   : > { %v763_v28 = vadd.f32 %v762_v27, %v5944_v39  ;;  %v764_v29 = vpop.f32.mrb[18].mxu0 }
 0x18d   : > { %1239 = vrot.lane.b32.xlu1 %v6005_v62, %s5730_s17  ;;  %v6091_v31 = vpack.c.bf16 %v761_v26, %v761_v26  ;;  %v765_v34 = vadd.f32 %v764_v29, %v5941_v38  ;;  %v766_v35 = vpop.f32.mrb[19].mxu0 }
 0x18e   : > { %v6094_v36 = vpack.c.bf16 %v763_v28, %v763_v28  ;;  %v767_v37 = vadd.f32 %v766_v35, %v5944_v39 }
 0x18f   : > { %1366 = vrot.lane.b32.xlu0 %v5994_v57, %s5731_s10  ;;  %1209 = vst.msk [vmem:[%s5953_s29 + $0x20] sm:$0xf] %vm1200_vm0, %v6091_v31  ;;  %v6102_v40 = vpack.c.bf16 %v765_v34, %v765_v34 }
 0x190   : > { %2256 = vst.msk [vmem:[%s5962_s14 + $0x20] sm:$0xf] %vm1200_vm0, %v6094_v36  ;;  %v6107_v41 = vpack.c.bf16 %v767_v37, %v767_v37 }
 0x191   : > { %1368 = vrot.lane.b32.xlu1 %v6005_v62, %s5731_s10  ;;  %1210 = vst.msk [vmem:[%s5953_s29 + $0x24] sm:$0xf] %vm1200_vm0, %v6102_v40 }
 0x192   : > { %2257 = vst.msk [vmem:[%s5962_s14 + $0x24] sm:$0xf] %vm1200_vm0, %v6107_v41  ;;  %v770_v42 = vpop.f32.mrb[20].mxu0 }
 0x193   : > { %1495 = vrot.lane.b32.xlu0 %v5994_v57, %s5732_s7  ;;  %v771_v43 = vadd.f32 %v770_v42, %v5941_v38  ;;  %v772_v44 = vpop.f32.mrb[21].mxu0 }
 0x194   : > { %v773_v45 = vadd.f32 %v772_v44, %v5944_v39  ;;  %v774_v46 = vpop.f32.mrb[22].mxu0 }
 0x195   : > { %1497 = vrot.lane.b32.xlu1 %v6005_v62, %s5732_s7  ;;  %v6123_v47 = vpack.c.bf16 %v771_v43, %v771_v43  ;;  %v775_v49 = vadd.f32 %v774_v46, %v5941_v38  ;;  %v776_v50 = vpop.f32.mrb[23].mxu0 }
 0x196   : > { %v6126_v52 = vpack.c.bf16 %v773_v45, %v773_v45  ;;  %v777_v53 = vadd.f32 %v776_v50, %v5944_v39 }
 0x197   : > { %1624 = vrot.lane.b32.xlu0 %v5994_v57, %s5733_s11  ;;  %1211 = vst.msk [vmem:[%s5953_s29 + $0x28] sm:$0xf] %vm1200_vm0, %v6123_v47  ;;  %v6134_v54 = vpack.c.bf16 %v775_v49, %v775_v49 }
 0x198   : > { %2258 = vst.msk [vmem:[%s5962_s14 + $0x28] sm:$0xf] %vm1200_vm0, %v6126_v52  ;;  %v6140_v56 = vpack.c.bf16 %v777_v53, %v777_v53 }
 0x199   : > { %1626 = vrot.lane.b32.xlu1 %v6005_v62, %s5733_s11  ;;  %1212 = vst.msk [vmem:[%s5953_s29 + $0x2c] sm:$0xf] %vm1200_vm0, %v6134_v54 }
 0x19a   : > { %2259 = vst.msk [vmem:[%s5962_s14 + $0x2c] sm:$0xf] %vm1200_vm0, %v6140_v56  ;;  %v780_v58 = vpop.f32.mrb[24].mxu0 }
 0x19b   : > { %1753 = vrot.lane.b32.xlu0 %v5994_v57, %s5734_s12  ;;  %v781_v59 = vadd.f32 %v780_v58, %v5941_v38  ;;  %v782_v61 = vpop.f32.mrb[25].mxu0 }
 0x19c   : > { %v783_v0 = vadd.f32 %v782_v61, %v5944_v39  ;;  %v784_v1 = vpop.f32.mrb[26].mxu0 }
 0x19d   : > { %1755 = vrot.lane.b32.xlu1 %v6005_v62, %s5734_s12  ;;  %v6156_v2 = vpack.c.bf16 %v781_v59, %v781_v59  ;;  %v785_v3 = vadd.f32 %v784_v1, %v5941_v38  ;;  %v786_v4 = vpop.f32.mrb[27].mxu0 }
 0x19e   : > { %v6159_v6 = vpack.c.bf16 %v783_v0, %v783_v0  ;;  %v787_v7 = vadd.f32 %v786_v4, %v5944_v39 }
 0x19f   : > { %1882 = vrot.lane.b32.xlu0 %v5994_v57, %s5735_s24  ;;  %1213 = vst.msk [vmem:[%s5953_s29 + $0x30] sm:$0xf] %vm1200_vm0, %v6156_v2  ;;  %v6167_v8 = vpack.c.bf16 %v785_v3, %v785_v3 }
 0x1a0   : > { %2260 = vst.msk [vmem:[%s5962_s14 + $0x30] sm:$0xf] %vm1200_vm0, %v6159_v6  ;;  %v6172_v10 = vpack.c.bf16 %v787_v7, %v787_v7 }
 0x1a1   : > { %1884 = vrot.lane.b32.xlu1 %v6005_v62, %s5735_s24  ;;  %1214 = vst.msk [vmem:[%s5953_s29 + $0x34] sm:$0xf] %vm1200_vm0, %v6167_v8 }
 0x1a2   : > { %2261 = vst.msk [vmem:[%s5962_s14 + $0x34] sm:$0xf] %vm1200_vm0, %v6172_v10  ;;  %v790_v13 = vpop.f32.mrb[28].mxu0 }
 0x1a3   : > { %2011 = vrot.lane.b32.xlu0 %v5994_v57, %s5736_s18  ;;  %v791_v14 = vadd.f32 %v790_v13, %v5941_v38  ;;  %v792_v15 = vpop.f32.mrb[29].mxu0 }
 0x1a4   : > { %v794_v16 = vpop.f32.mrb[30].mxu0 }
 0x1a5   : > { %2013 = vrot.lane.b32.xlu1 %v6005_v62, %s5736_s18  ;;  %v6195_v57 = vpack.c.bf16 %v791_v14, %v791_v14  ;;  %v793_v62 = vadd.f32 %v792_v15, %v5944_v39  ;;  %v795_v17 = vadd.f32 %v794_v16, %v5941_v38  ;;  %v796_v19 = vpop.f32.mrb[31].mxu0 }
 0x1a6   : > { %v797_v22 = vadd.f32 %v796_v19, %v5944_v39 }
 0x1a7   : > { %1241 = vrot.lane.b32.xlu0 %v6026_v5, %s5730_s17  ;;  %1215 = vst.msk [vmem:[%s5953_s29 + $0x38] sm:$0xf] %vm1200_vm0, %v6195_v57  ;;  %v6204_v20 = vpack.c.bf16 %v793_v62, %v793_v62  ;;  %v6207_v25 = vpack.c.bf16 %v795_v17, %v795_v17 }
 0x1a8   : > { %v6214_v26 = vpack.c.bf16 %v797_v22, %v797_v22 }
 0x1a9   : > { %1243 = vrot.lane.b32.xlu1 %v6038_v11, %s5730_s17  ;;  %2262 = vst.msk [vmem:[%s5962_s14 + $0x38] sm:$0xf] %vm1200_vm0, %v6204_v20  ;;  %1216 = vst.msk [vmem:[%s5953_s29 + $0x3c] sm:$0xf] %vm1200_vm0, %v6207_v25 }
 0x1aa   : > { %2263 = vst.msk [vmem:[%s5962_s14 + $0x3c] sm:$0xf] %vm1200_vm0, %v6214_v26  ;;  %v800_v27 = vpop.f32.mrb[32].mxu0 }
 0x1ab   : > { %1370 = vrot.lane.b32.xlu0 %v6026_v5, %s5731_s10  ;;  %v801_v28 = vadd.f32 %v800_v27, %v5941_v38  ;;  %v802_v29 = vpop.f32.mrb[33].mxu0 }
 0x1ac   : > { %v803_v34 = vadd.f32 %v802_v29, %v5944_v39  ;;  %v804_v35 = vpop.f32.mrb[34].mxu0 }
 0x1ad   : > { %1372 = vrot.lane.b32.xlu1 %v6038_v11, %s5731_s10  ;;  %v806_v37 = vpop.f32.mrb[35].mxu0 }
 0x1ae   : > { %v6249_v42 = vpack.c.bf16 %v803_v34, %v803_v34  ;;  %v807_v43 = vadd.f32 %v806_v37, %v5944_v39 }
 0x1af   : > { %1499 = vrot.lane.b32.xlu0 %v6026_v5, %s5732_s7 }
 0x1b0   : > { %2264 = vst.msk [vmem:[%s5962_s14 + $0x40] sm:$0xf] %vm1200_vm0, %v6249_v42  ;;  %v6262_v45 = vpack.c.bf16 %v807_v43, %v807_v43 }
 0x1b1   : > { %1501 = vrot.lane.b32.xlu1 %v6038_v11, %s5732_s7 }
 0x1b2   : > { %2265 = vst.msk [vmem:[%s5962_s14 + $0x44] sm:$0xf] %vm1200_vm0, %v6262_v45  ;;  %v810_v46 = vpop.f32.mrb[36].mxu0 }
 0x1b3   : > { %1628 = vrot.lane.b32.xlu0 %v6026_v5, %s5733_s11  ;;  %v811_v49 = vadd.f32 %v810_v46, %v5941_v38  ;;  %v812_v50 = vpop.f32.mrb[37].mxu0 }
 0x1b4   : > { %v813_v53 = vadd.f32 %v812_v50, %v5944_v39  ;;  %v814_v55 = vpop.f32.mrb[38].mxu0 }
 0x1b5   : > { %1630 = vrot.lane.b32.xlu1 %v6038_v11, %s5733_s11  ;;  %v6292_v58 = vpack.c.bf16 %v811_v49, %v811_v49  ;;  %v815_v59 = vadd.f32 %v814_v55, %v5941_v38 }
 0x1b6   : > { %v6297_v61 = vpack.c.bf16 %v813_v53, %v813_v53 }
 0x1b7   : > { %1757 = vrot.lane.b32.xlu0 %v6026_v5, %s5734_s12  ;;  %1219 = vst.msk [vmem:[%s5953_s29 + $0x48] sm:$0xf] %vm1200_vm0, %v6292_v58 }
 0x1b8   : > { %2266 = vst.msk [vmem:[%s5962_s14 + $0x48] sm:$0xf] %vm1200_vm0, %v6297_v61 }
 0x1b9   : > { %1759 = vrot.lane.b32.xlu1 %v6038_v11, %s5734_s12 }
 0x1bb   : > { %1886 = vrot.lane.b32.xlu0 %v6026_v5, %s5735_s24 }
 0x1bd   : > { %1888 = vrot.lane.b32.xlu1 %v6038_v11, %s5735_s24 }
 0x1bf   : > { %2015 = vrot.lane.b32.xlu0 %v6026_v5, %s5736_s18  ;;  %v6244_v5 = vpack.c.bf16 %v801_v28, %v801_v28 }
 0x1c1   : > { %2017 = vrot.lane.b32.xlu1 %v6038_v11, %s5736_s18  ;;  %v805_v11 = vadd.f32 %v804_v35, %v5941_v38  ;;  %1217 = vst.msk [vmem:[%s5953_s29 + $0x40] sm:$0xf] %vm1200_vm0, %v6244_v5 }
 0x1c3   : > { %1245 = vrot.lane.b32.xlu0 %v6059_v18, %s5730_s17  ;;  %v6255_v44 = vpack.c.bf16 %v805_v11, %v805_v11 }
 0x1c5   : > { %1247 = vrot.lane.b32.xlu1 %v6070_v23, %s5730_s17  ;;  %1218 = vst.msk [vmem:[%s5953_s29 + $0x44] sm:$0xf] %vm1200_vm0, %v6255_v44 }
 0x1c7   : > { %1374 = vrot.lane.b32.xlu0 %v6059_v18, %s5731_s10 }
 0x1c9   : > { %1376 = vrot.lane.b32.xlu1 %v6070_v23, %s5731_s10 }
 0x1cb   : > { %1503 = vrot.lane.b32.xlu0 %v6059_v18, %s5732_s7 }
 0x1cd   : > { %1505 = vrot.lane.b32.xlu1 %v6070_v23, %s5732_s7 }
 0x1cf   : > { %1632 = vrot.lane.b32.xlu0 %v6059_v18, %s5733_s11 }
 0x1d1   : > { %1634 = vrot.lane.b32.xlu1 %v6070_v23, %s5733_s11 }
 0x1d3   : > { %1761 = vrot.lane.b32.xlu0 %v6059_v18, %s5734_s12 }
 0x1d5   : > { %1763 = vrot.lane.b32.xlu1 %v6070_v23, %s5734_s12 }
 0x1d7   : > { %1890 = vrot.lane.b32.xlu0 %v6059_v18, %s5735_s24 }
 0x1d9   : > { %1892 = vrot.lane.b32.xlu1 %v6070_v23, %s5735_s24 }
 0x1db   : > { %2019 = vrot.lane.b32.xlu0 %v6059_v18, %s5736_s18  ;;  %v816_v18 = vpop.f32.mrb[39].mxu0 }
 0x1dc   : > { %v817_v0 = vadd.f32 %v816_v18, %v5944_v39  ;;  %v820_v22 = vpop.f32.mrb[40].mxu0 }
 0x1dd   : > { %2021 = vrot.lane.b32.xlu1 %v6070_v23, %s5736_s18  ;;  %v6303_v23 = vpack.c.bf16 %v815_v59, %v815_v59  ;;  %v821_v27 = vadd.f32 %v820_v22, %v5941_v38  ;;  %v822_v28 = vpop.f32.mrb[41].mxu0 }
 0x1de   : > { %v6310_v3 = vpack.c.bf16 %v817_v0, %v817_v0  ;;  %v823_v34 = vadd.f32 %v822_v28, %v5944_v39  ;;  %v824_v35 = vpop.f32.mrb[42].mxu0 }
 0x1df   : > { %1249 = vrot.lane.b32.xlu0 %v6091_v31, %s5730_s17  ;;  %1220 = vst.msk [vmem:[%s5953_s29 + $0x4c] sm:$0xf] %vm1200_vm0, %v6303_v23  ;;  %v6362_v11 = vpack.c.bf16 %v821_v27, %v821_v27  ;;  %v825_v37 = vadd.f32 %v824_v35, %v5941_v38  ;;  %v826_v43 = vpop.f32.mrb[43].mxu0 }
 0x1e0   : > { %2267 = vst.msk [vmem:[%s5962_s14 + $0x4c] sm:$0xf] %vm1200_vm0, %v6310_v3  ;;  %v6367_v49 = vpack.c.bf16 %v823_v34, %v823_v34  ;;  %v827_v50 = vadd.f32 %v826_v43, %v5944_v39 }
 0x1e1   : > { %1251 = vrot.lane.b32.xlu1 %v6102_v40, %s5730_s17  ;;  %v1234_v1 = vpop.permute.xlu0 %1233  ;;  %1221 = vst.msk [vmem:[%s5953_s29 + $0x50] sm:$0xf] %vm1200_vm0, %v6362_v11  ;;  %v6375_v53 = vpack.c.bf16 %v825_v37, %v825_v37 }
 0x1e2   : > { %4524 = vst.msk [vmem:[%s5953_s29 + $0x80] sm:$0xf] %vm1200_vm0, %v1234_v1  ;;  %2268 = vst.msk [vmem:[%s5962_s14 + $0x50] sm:$0xf] %vm1200_vm0, %v6367_v49 }
 0x1e3   : > { %v1365_v4 = vpop.permute.xlu1 %1364  ;;  %1378 = vrot.lane.b32.xlu0 %v6091_v31, %s5731_s10  ;;  %1222 = vst.msk [vmem:[%s5953_s29 + $0x54] sm:$0xf] %vm1200_vm0, %v6375_v53 }
 0x1e4   : > { %4557 = vst.msk [vmem:[%s5953_s29 + $0x104] sm:$0xf] %vm1200_vm0, %v1365_v4 }
 0x1e5   : > { %1380 = vrot.lane.b32.xlu1 %v6102_v40, %s5731_s10  ;;  %v1363_v7 = vpop.permute.xlu0 %1362 }
 0x1e6   : > { %4556 = vst.msk [vmem:[%s5953_s29 + $0x100] sm:$0xf] %vm1200_vm0, %v1363_v7 }
 0x1e7   : > { %v1494_v13 = vpop.permute.xlu1 %1493  ;;  %1507 = vrot.lane.b32.xlu0 %v6091_v31, %s5732_s7 }
 0x1e8   : > { %4589 = vst.msk [vmem:[%s5953_s29 + $0x184] sm:$0xf] %vm1200_vm0, %v1494_v13 }
 0x1e9   : > { %1509 = vrot.lane.b32.xlu1 %v6102_v40, %s5732_s7  ;;  %v1492_v14 = vpop.permute.xlu0 %1491 }
 0x1ea   : > { %4588 = vst.msk [vmem:[%s5953_s29 + $0x180] sm:$0xf] %vm1200_vm0, %v1492_v14 }
 0x1eb   : > { %v1623_v15 = vpop.permute.xlu1 %1622  ;;  %1636 = vrot.lane.b32.xlu0 %v6091_v31, %s5733_s11 }
 0x1ec   : > { %4621 = vst.msk [vmem:[%s5953_s29 + $0x204] sm:$0xf] %vm1200_vm0, %v1623_v15  ;;  %v830_v15 = vpop.f32.mrb[44].mxu0 }
 0x1ed   : > { %1638 = vrot.lane.b32.xlu1 %v6102_v40, %s5733_s11  ;;  %v1621_v62 = vpop.permute.xlu0 %1620 }
 0x1ee   : > { %4620 = vst.msk [vmem:[%s5953_s29 + $0x200] sm:$0xf] %vm1200_vm0, %v1621_v62  ;;  %v831_v62 = vadd.f32 %v830_v15, %v5941_v38 }
 0x1ef   : > { %v1752_v16 = vpop.permute.xlu1 %1751  ;;  %1765 = vrot.lane.b32.xlu0 %v6091_v31, %s5734_s12 }
 0x1f0   : > { %4653 = vst.msk [vmem:[%s5953_s29 + $0x284] sm:$0xf] %vm1200_vm0, %v1752_v16  ;;  %v832_v16 = vpop.f32.mrb[45].mxu0  ;;  %v6434_v27 = vpack.c.bf16 %v831_v62, %v831_v62 }
 0x1f1   : > { %1767 = vrot.lane.b32.xlu1 %v6102_v40, %s5734_s12  ;;  %v1750_v17 = vpop.permute.xlu0 %1749  ;;  %v834_v22 = vpop.f32.mrb[46].mxu0 }
 0x1f2   : > { %4652 = vst.msk [vmem:[%s5953_s29 + $0x280] sm:$0xf] %vm1200_vm0, %v1750_v17  ;;  %v835_v28 = vadd.f32 %v834_v22, %v5941_v38  ;;  %1223 = vst.msk [vmem:[%s5953_s29 + $0x58] sm:$0xf] %vm1200_vm0, %v6434_v27 }
 0x1f3   : > { %v1881_v19 = vpop.permute.xlu1 %1880  ;;  %1894 = vrot.lane.b32.xlu0 %v6091_v31, %s5735_s24 }
 0x1f4   : > { %4685 = vst.msk [vmem:[%s5953_s29 + $0x304] sm:$0xf] %vm1200_vm0, %v1881_v19  ;;  %v833_v19 = vadd.f32 %v832_v16, %v5944_v39  ;;  %v6447_v43 = vpack.c.bf16 %v835_v28, %v835_v28 }
 0x1f5   : > { %1896 = vrot.lane.b32.xlu1 %v6102_v40, %s5735_s24  ;;  %v1879_v29 = vpop.permute.xlu0 %1878 }
 0x1f6   : > { %4684 = vst.msk [vmem:[%s5953_s29 + $0x300] sm:$0xf] %vm1200_vm0, %v1879_v29  ;;  %v836_v29 = vpop.f32.mrb[47].mxu0  ;;  %v6439_v35 = vpack.c.bf16 %v833_v19, %v833_v19  ;;  %1224 = vst.msk [vmem:[%s5953_s29 + $0x5c] sm:$0xf] %vm1200_vm0, %v6447_v43 }
 0x1f7   : > { %v2010_v46 = vpop.permute.xlu1 %2009  ;;  %2023 = vrot.lane.b32.xlu0 %v6091_v31, %s5736_s18  ;;  %v6382_v31 = vpack.c.bf16 %v827_v50, %v827_v50  ;;  %v837_v37 = vadd.f32 %v836_v29, %v5944_v39 }
 0x1f8   : > { %4717 = vst.msk [vmem:[%s5953_s29 + $0x384] sm:$0xf] %vm1200_vm0, %v2010_v46  ;;  %2270 = vst.msk [vmem:[%s5962_s14 + $0x58] sm:$0xf] %vm1200_vm0, %v6439_v35 }
 0x1f9   : > { %2025 = vrot.lane.b32.xlu1 %v6102_v40, %s5736_s18  ;;  %v2008_v55 = vpop.permute.xlu0 %2007  ;;  %2269 = vst.msk [vmem:[%s5962_s14 + $0x54] sm:$0xf] %vm1200_vm0, %v6382_v31  ;;  %v6454_v50 = vpack.c.bf16 %v837_v37, %v837_v37 }
 0x1fa   : > { %4716 = vst.msk [vmem:[%s5953_s29 + $0x380] sm:$0xf] %vm1200_vm0, %v2008_v55 }
 0x1fb   : > { %v1238_v59 = vpop.permute.xlu1 %1237  ;;  %1253 = vrot.lane.b32.xlu0 %v6123_v47, %s5730_s17  ;;  %2271 = vst.msk [vmem:[%s5962_s14 + $0x5c] sm:$0xf] %vm1200_vm0, %v6454_v50 }
 0x1fc   : > { %4526 = vst.msk [vmem:[%s5953_s29 + $0x88] sm:$0xf] %vm1200_vm0, %v1238_v59 }
 0x1fd   : > { %1255 = vrot.lane.b32.xlu1 %v6134_v54, %s5730_s17  ;;  %v1236_v40 = vpop.permute.xlu0 %1235 }
 0x1fe   : > { %4525 = vst.msk [vmem:[%s5953_s29 + $0x84] sm:$0xf] %vm1200_vm0, %v1236_v40 }
 0x1ff   : > { %v1240_v18 = vpop.permute.xlu1 %1239  ;;  %1382 = vrot.lane.b32.xlu0 %v6123_v47, %s5731_s10 }
 0x200   : > { %4527 = vst.msk [vmem:[%s5953_s29 + $0x8c] sm:$0xf] %vm1200_vm0, %v1240_v18 }
 0x201   : > { %1384 = vrot.lane.b32.xlu1 %v6134_v54, %s5731_s10  ;;  %v1367_v0 = vpop.permute.xlu0 %1366 }
 0x202   : > { %4558 = vst.msk [vmem:[%s5953_s29 + $0x108] sm:$0xf] %vm1200_vm0, %v1367_v0 }
 0x203   : > { %v1369_v1 = vpop.permute.xlu1 %1368  ;;  %1511 = vrot.lane.b32.xlu0 %v6123_v47, %s5732_s7 }
 0x204   : > { %4559 = vst.msk [vmem:[%s5953_s29 + $0x10c] sm:$0xf] %vm1200_vm0, %v1369_v1 }
 0x205   : > { %1513 = vrot.lane.b32.xlu1 %v6134_v54, %s5732_s7  ;;  %v1496_v4 = vpop.permute.xlu0 %1495 }
 0x206   : > { %4590 = vst.msk [vmem:[%s5953_s29 + $0x188] sm:$0xf] %vm1200_vm0, %v1496_v4 }
 0x207   : > { %v1498_v7 = vpop.permute.xlu1 %1497  ;;  %1640 = vrot.lane.b32.xlu0 %v6123_v47, %s5733_s11 }
 0x208   : > { %4591 = vst.msk [vmem:[%s5953_s29 + $0x18c] sm:$0xf] %vm1200_vm0, %v1498_v7  ;;  %v840_v7 = vpop.f32.mrb[48].mxu0 }
 0x209   : > { %1642 = vrot.lane.b32.xlu1 %v6134_v54, %s5733_s11  ;;  %v1625_v13 = vpop.permute.xlu0 %1624 }
 0x20a   : > { %4622 = vst.msk [vmem:[%s5953_s29 + $0x208] sm:$0xf] %vm1200_vm0, %v1625_v13  ;;  %v841_v13 = vadd.f32 %v840_v7, %v5941_v38 }
 0x20b   : > { %v1627_v14 = vpop.permute.xlu1 %1626  ;;  %1769 = vrot.lane.b32.xlu0 %v6123_v47, %s5734_s12 }
 0x20c   : > { %4623 = vst.msk [vmem:[%s5953_s29 + $0x20c] sm:$0xf] %vm1200_vm0, %v1627_v14  ;;  %v842_v14 = vpop.f32.mrb[49].mxu0 }
 0x20d   : > { %1771 = vrot.lane.b32.xlu1 %v6134_v54, %s5734_s12  ;;  %v1754_v17 = vpop.permute.xlu0 %1753  ;;  %v843_v62 = vadd.f32 %v842_v14, %v5944_v39  ;;  %v844_v16 = vpop.f32.mrb[50].mxu0 }
 0x20e   : > { %4654 = vst.msk [vmem:[%s5953_s29 + $0x288] sm:$0xf] %vm1200_vm0, %v1754_v17  ;;  %v6506_v17 = vpack.c.bf16 %v841_v13, %v841_v13  ;;  %v845_v19 = vadd.f32 %v844_v16, %v5941_v38  ;;  %v846_v22 = vpop.f32.mrb[51].mxu0 }
 0x20f   : > { %v1756_v34 = vpop.permute.xlu1 %1755  ;;  %1898 = vrot.lane.b32.xlu0 %v6123_v47, %s5735_s24  ;;  %v6511_v29 = vpack.c.bf16 %v843_v62, %v843_v62 }
 0x210   : > { %4655 = vst.msk [vmem:[%s5953_s29 + $0x28c] sm:$0xf] %vm1200_vm0, %v1756_v34  ;;  %v847_v34 = vadd.f32 %v846_v22, %v5944_v39  ;;  %1225 = vst.msk [vmem:[%s5953_s29 + $0x60] sm:$0xf] %vm1200_vm0, %v6506_v17  ;;  %v6519_v37 = vpack.c.bf16 %v845_v19, %v845_v19 }
 0x211   : > { %1900 = vrot.lane.b32.xlu1 %v6134_v54, %s5735_s24  ;;  %v1883_v46 = vpop.permute.xlu0 %1882  ;;  %2272 = vst.msk [vmem:[%s5962_s14 + $0x60] sm:$0xf] %vm1200_vm0, %v6511_v29 }
 0x212   : > { %4686 = vst.msk [vmem:[%s5953_s29 + $0x308] sm:$0xf] %vm1200_vm0, %v1883_v46  ;;  %1226 = vst.msk [vmem:[%s5953_s29 + $0x64] sm:$0xf] %vm1200_vm0, %v6519_v37 }
 0x213   : > { %v1885_v55 = vpop.permute.xlu1 %1884  ;;  %2027 = vrot.lane.b32.xlu0 %v6123_v47, %s5736_s18 }
 0x214   : > { %4687 = vst.msk [vmem:[%s5953_s29 + $0x30c] sm:$0xf] %vm1200_vm0, %v1885_v55  ;;  %v6526_v55 = vpack.c.bf16 %v847_v34, %v847_v34 }
 0x215   : > { %2029 = vrot.lane.b32.xlu1 %v6134_v54, %s5736_s18  ;;  %v2012_v59 = vpop.permute.xlu0 %2011 }
 0x216   : > { %4718 = vst.msk [vmem:[%s5953_s29 + $0x388] sm:$0xf] %vm1200_vm0, %v2012_v59  ;;  %2273 = vst.msk [vmem:[%s5962_s14 + $0x64] sm:$0xf] %vm1200_vm0, %v6526_v55 }
 0x217   : > { %v2014_v40 = vpop.permute.xlu1 %2013  ;;  %1257 = vrot.lane.b32.xlu0 %v6156_v2, %s5730_s17 }
 0x218   : > { %4719 = vst.msk [vmem:[%s5953_s29 + $0x38c] sm:$0xf] %vm1200_vm0, %v2014_v40 }
 0x219   : > { %1259 = vrot.lane.b32.xlu1 %v6167_v8, %s5730_s17  ;;  %v1242_v47 = vpop.permute.xlu0 %1241 }
 0x21a   : > { %4528 = vst.msk [vmem:[%s5953_s29 + $0x90] sm:$0xf] %vm1200_vm0, %v1242_v47 }
 0x21b   : > { %v1244_v18 = vpop.permute.xlu1 %1243  ;;  %1386 = vrot.lane.b32.xlu0 %v6156_v2, %s5731_s10 }
 0x21c   : > { %4529 = vst.msk [vmem:[%s5953_s29 + $0x94] sm:$0xf] %vm1200_vm0, %v1244_v18 }
 0x21d   : > { %1388 = vrot.lane.b32.xlu1 %v6167_v8, %s5731_s10  ;;  %v1371_v54 = vpop.permute.xlu0 %1370 }
 0x21e   : > { %4560 = vst.msk [vmem:[%s5953_s29 + $0x110] sm:$0xf] %vm1200_vm0, %v1371_v54 }
 0x21f   : > { %v1373_v0 = vpop.permute.xlu1 %1372  ;;  %1515 = vrot.lane.b32.xlu0 %v6156_v2, %s5732_s7 }
 0x220   : > { %4561 = vst.msk [vmem:[%s5953_s29 + $0x114] sm:$0xf] %vm1200_vm0, %v1373_v0 }
 0x221   : > { %1517 = vrot.lane.b32.xlu1 %v6167_v8, %s5732_s7  ;;  %v1500_v1 = vpop.permute.xlu0 %1499 }
 0x222   : > { %4592 = vst.msk [vmem:[%s5953_s29 + $0x190] sm:$0xf] %vm1200_vm0, %v1500_v1 }
 0x223   : > { %v1502_v4 = vpop.permute.xlu1 %1501  ;;  %1644 = vrot.lane.b32.xlu0 %v6156_v2, %s5733_s11 }
 0x224   : > { %4593 = vst.msk [vmem:[%s5953_s29 + $0x194] sm:$0xf] %vm1200_vm0, %v1502_v4  ;;  %v850_v4 = vpop.f32.mrb[52].mxu0 }
 0x225   : > { %1646 = vrot.lane.b32.xlu1 %v6167_v8, %s5733_s11  ;;  %v1629_v15 = vpop.permute.xlu0 %1628  ;;  %v851_v7 = vadd.f32 %v850_v4, %v5941_v38  ;;  %v852_v13 = vpop.f32.mrb[53].mxu0 }
 0x226   : > { %4624 = vst.msk [vmem:[%s5953_s29 + $0x210] sm:$0xf] %vm1200_vm0, %v1629_v15  ;;  %v853_v15 = vadd.f32 %v852_v13, %v5944_v39  ;;  %v854_v62 = vpop.f32.mrb[54].mxu0 }
 0x227   : > { %v1631_v28 = vpop.permute.xlu1 %1630  ;;  %1773 = vrot.lane.b32.xlu0 %v6156_v2, %s5734_s12  ;;  %v6578_v16 = vpack.c.bf16 %v851_v7, %v851_v7  ;;  %v855_v19 = vadd.f32 %v854_v62, %v5941_v38  ;;  %v856_v22 = vpop.f32.mrb[55].mxu0 }
 0x228   : > { %4625 = vst.msk [vmem:[%s5953_s29 + $0x214] sm:$0xf] %vm1200_vm0, %v1631_v28  ;;  %v6583_v34 = vpack.c.bf16 %v853_v15, %v853_v15 }
 0x229   : > { %1775 = vrot.lane.b32.xlu1 %v6167_v8, %s5734_s12  ;;  %v1758_v46 = vpop.permute.xlu0 %1757  ;;  %1227 = vst.msk [vmem:[%s5953_s29 + $0x68] sm:$0xf] %vm1200_vm0, %v6578_v16 }
 0x22a   : > { %4656 = vst.msk [vmem:[%s5953_s29 + $0x290] sm:$0xf] %vm1200_vm0, %v1758_v46  ;;  %v857_v46 = vadd.f32 %v856_v22, %v5944_v39  ;;  %2274 = vst.msk [vmem:[%s5962_s14 + $0x68] sm:$0xf] %vm1200_vm0, %v6583_v34 }
 0x22b   : > { %v1760_v59 = vpop.permute.xlu1 %1759  ;;  %1902 = vrot.lane.b32.xlu0 %v6156_v2, %s5735_s24 }
 0x22c   : > { %4657 = vst.msk [vmem:[%s5953_s29 + $0x294] sm:$0xf] %vm1200_vm0, %v1760_v59  ;;  %v6591_v59 = vpack.c.bf16 %v855_v19, %v855_v19 }
 0x22d   : > { %1904 = vrot.lane.b32.xlu1 %v6167_v8, %s5735_s24  ;;  %v1887_v40 = vpop.permute.xlu0 %1886 }
 0x22e   : > { %4688 = vst.msk [vmem:[%s5953_s29 + $0x310] sm:$0xf] %vm1200_vm0, %v1887_v40  ;;  %1228 = vst.msk [vmem:[%s5953_s29 + $0x6c] sm:$0xf] %vm1200_vm0, %v6591_v59 }
 0x22f   : > { %v1889_v47 = vpop.permute.xlu1 %1888  ;;  %2031 = vrot.lane.b32.xlu0 %v6156_v2, %s5736_s18 }
 0x230   : > { %4689 = vst.msk [vmem:[%s5953_s29 + $0x314] sm:$0xf] %vm1200_vm0, %v1889_v47  ;;  %v6598_v47 = vpack.c.bf16 %v857_v46, %v857_v46 }
 0x231   : > { %2033 = vrot.lane.b32.xlu1 %v6167_v8, %s5736_s18  ;;  %v2016_v18 = vpop.permute.xlu0 %2015 }
 0x232   : > { %4720 = vst.msk [vmem:[%s5953_s29 + $0x390] sm:$0xf] %vm1200_vm0, %v2016_v18  ;;  %2275 = vst.msk [vmem:[%s5962_s14 + $0x6c] sm:$0xf] %vm1200_vm0, %v6598_v47 }
 0x233   : > { %v2018_v54 = vpop.permute.xlu1 %2017  ;;  %1261 = vrot.lane.b32.xlu0 %v6195_v57, %s5730_s17 }
 0x234   : > { %4721 = vst.msk [vmem:[%s5953_s29 + $0x394] sm:$0xf] %vm1200_vm0, %v2018_v54 }
 0x235   : > { %1263 = vrot.lane.b32.xlu1 %v6207_v25, %s5730_s17  ;;  %v1246_v2 = vpop.permute.xlu0 %1245 }
 0x236   : > { %4530 = vst.msk [vmem:[%s5953_s29 + $0x98] sm:$0xf] %vm1200_vm0, %v1246_v2 }
 0x237   : > { %v1248_v0 = vpop.permute.xlu1 %1247  ;;  %1390 = vrot.lane.b32.xlu0 %v6195_v57, %s5731_s10 }
 0x238   : > { %4531 = vst.msk [vmem:[%s5953_s29 + $0x9c] sm:$0xf] %vm1200_vm0, %v1248_v0 }
 0x239   : > { %1392 = vrot.lane.b32.xlu1 %v6207_v25, %s5731_s10  ;;  %v1375_v8 = vpop.permute.xlu0 %1374 }
 0x23a   : > { %4562 = vst.msk [vmem:[%s5953_s29 + $0x118] sm:$0xf] %vm1200_vm0, %v1375_v8 }
 0x23b   : > { %v1377_v1 = vpop.permute.xlu1 %1376  ;;  %1519 = vrot.lane.b32.xlu0 %v6195_v57, %s5732_s7 }
 0x23c   : > { %4563 = vst.msk [vmem:[%s5953_s29 + $0x11c] sm:$0xf] %vm1200_vm0, %v1377_v1 }
 0x23d   : > { %1521 = vrot.lane.b32.xlu1 %v6207_v25, %s5732_s7  ;;  %v1504_v14 = vpop.permute.xlu0 %1503 }
 0x23e   : > { %4594 = vst.msk [vmem:[%s5953_s29 + $0x198] sm:$0xf] %vm1200_vm0, %v1504_v14  ;;  %v860_v14 = vpop.f32.mrb[56].mxu0 }
 0x23f   : > { %v1506_v28 = vpop.permute.xlu1 %1505  ;;  %1648 = vrot.lane.b32.xlu0 %v6195_v57, %s5733_s11  ;;  %v861_v15 = vadd.f32 %v860_v14, %v5941_v38  ;;  %v862_v62 = vpop.f32.mrb[57].mxu0 }
 0x240   : > { %4595 = vst.msk [vmem:[%s5953_s29 + $0x19c] sm:$0xf] %vm1200_vm0, %v1506_v28  ;;  %v863_v22 = vadd.f32 %v862_v62, %v5944_v39  ;;  %v864_v28 = vpop.f32.mrb[58].mxu0 }
 0x241   : > { %1650 = vrot.lane.b32.xlu1 %v6207_v25, %s5733_s11  ;;  %v1633_v40 = vpop.permute.xlu0 %1632  ;;  %v6650_v46 = vpack.c.bf16 %v861_v15, %v861_v15 }
 0x242   : > { %4626 = vst.msk [vmem:[%s5953_s29 + $0x218] sm:$0xf] %vm1200_vm0, %v1633_v40  ;;  %v865_v40 = vadd.f32 %v864_v28, %v5941_v38 }
 0x243   : > { %v1635_v18 = vpop.permute.xlu1 %1634  ;;  %1777 = vrot.lane.b32.xlu0 %v6195_v57, %s5734_s12  ;;  %1229 = vst.msk [vmem:[%s5953_s29 + $0x70] sm:$0xf] %vm1200_vm0, %v6650_v46 }
 0x244   : > { %4627 = vst.msk [vmem:[%s5953_s29 + $0x21c] sm:$0xf] %vm1200_vm0, %v1635_v18  ;;  %v866_v18 = vpop.f32.mrb[59].mxu0 }
 0x245   : > { %1779 = vrot.lane.b32.xlu1 %v6207_v25, %s5734_s12  ;;  %v1762_v54 = vpop.permute.xlu0 %1761 }
 0x246   : > { %4658 = vst.msk [vmem:[%s5953_s29 + $0x298] sm:$0xf] %vm1200_vm0, %v1762_v54 }
 0x247   : > { %v1764_v2 = vpop.permute.xlu1 %1763  ;;  %1906 = vrot.lane.b32.xlu0 %v6195_v57, %s5735_s24 }
 0x248   : > { %4659 = vst.msk [vmem:[%s5953_s29 + $0x29c] sm:$0xf] %vm1200_vm0, %v1764_v2  ;;  %v6655_v2 = vpack.c.bf16 %v863_v22, %v863_v22 }
 0x249   : > { %1908 = vrot.lane.b32.xlu1 %v6207_v25, %s5735_s24  ;;  %v1891_v0 = vpop.permute.xlu0 %1890 }
 0x24a   : > { %4690 = vst.msk [vmem:[%s5953_s29 + $0x318] sm:$0xf] %vm1200_vm0, %v1891_v0  ;;  %v867_v0 = vadd.f32 %v866_v18, %v5944_v39  ;;  %2276 = vst.msk [vmem:[%s5962_s14 + $0x70] sm:$0xf] %vm1200_vm0, %v6655_v2 }
 0x24b   : > { %v1893_v8 = vpop.permute.xlu1 %1892  ;;  %1265 = vrot.lane.b32.xlu0 %v6244_v5, %s5730_s17 }
 0x24c   : > { %4691 = vst.msk [vmem:[%s5953_s29 + $0x31c] sm:$0xf] %vm1200_vm0, %v1893_v8  ;;  %v6663_v8 = vpack.c.bf16 %v865_v40, %v865_v40 }
 0x24d   : > { %1267 = vrot.lane.b32.xlu1 %v6255_v44, %s5730_s17  ;;  %v2020_v1 = vpop.permute.xlu0 %2019 }
 0x24e   : > { %4722 = vst.msk [vmem:[%s5953_s29 + $0x398] sm:$0xf] %vm1200_vm0, %v2020_v1  ;;  %1230 = vst.msk [vmem:[%s5953_s29 + $0x74] sm:$0xf] %vm1200_vm0, %v6663_v8 }
 0x24f   : > { %v2022_v4 = vpop.permute.xlu1 %2021  ;;  %1394 = vrot.lane.b32.xlu0 %v6244_v5, %s5731_s10 }
 0x250   : > { %4723 = vst.msk [vmem:[%s5953_s29 + $0x39c] sm:$0xf] %vm1200_vm0, %v2022_v4  ;;  %v6670_v4 = vpack.c.bf16 %v867_v0, %v867_v0 }
 0x251   : > { %1396 = vrot.lane.b32.xlu1 %v6255_v44, %s5731_s10  ;;  %v1250_v7 = vpop.permute.xlu0 %1249 }
 0x252   : > { %4532 = vst.msk [vmem:[%s5953_s29 + $0xa0] sm:$0xf] %vm1200_vm0, %v1250_v7  ;;  %2277 = vst.msk [vmem:[%s5962_s14 + $0x74] sm:$0xf] %vm1200_vm0, %v6670_v4 }
 0x253   : > { %v1252_v13 = vpop.permute.xlu1 %1251  ;;  %1523 = vrot.lane.b32.xlu0 %v6244_v5, %s5732_s7 }
 0x254   : > { %4533 = vst.msk [vmem:[%s5953_s29 + $0xa4] sm:$0xf] %vm1200_vm0, %v1252_v13 }
 0x255   : > { %1525 = vrot.lane.b32.xlu1 %v6255_v44, %s5732_s7  ;;  %v1379_v19 = vpop.permute.xlu0 %1378 }
 0x256   : > { %4564 = vst.msk [vmem:[%s5953_s29 + $0x120] sm:$0xf] %vm1200_vm0, %v1379_v19 }
 0x257   : > { %v1381_v54 = vpop.permute.xlu1 %1380  ;;  %1652 = vrot.lane.b32.xlu0 %v6244_v5, %s5733_s11 }
 0x258   : > { %4565 = vst.msk [vmem:[%s5953_s29 + $0x124] sm:$0xf] %vm1200_vm0, %v1381_v54  ;;  %v870_v54 = vpop.f32.mrb[60].mxu0 }
 0x259   : > { %1654 = vrot.lane.b32.xlu1 %v6255_v44, %s5733_s11  ;;  %v1508_v1 = vpop.permute.xlu0 %1507  ;;  %v871_v0 = vadd.f32 %v870_v54, %v5941_v38 }
 0x25a   : > { %4596 = vst.msk [vmem:[%s5953_s29 + $0x1a0] sm:$0xf] %vm1200_vm0, %v1508_v1  ;;  %v872_v1 = vpop.f32.mrb[61].mxu0 }
 0x25b   : > { %v1510_v7 = vpop.permute.xlu1 %1509  ;;  %1781 = vrot.lane.b32.xlu0 %v6244_v5, %s5734_s12 }
 0x25c   : > { %4597 = vst.msk [vmem:[%s5953_s29 + $0x1a4] sm:$0xf] %vm1200_vm0, %v1510_v7 }
 0x25d   : > { %1783 = vrot.lane.b32.xlu1 %v6255_v44, %s5734_s12  ;;  %v1637_v13 = vpop.permute.xlu0 %1636 }
 0x25e   : > { %4628 = vst.msk [vmem:[%s5953_s29 + $0x220] sm:$0xf] %vm1200_vm0, %v1637_v13  ;;  %v873_v13 = vadd.f32 %v872_v1, %v5944_v39 }
 0x25f   : > { %v1639_v14 = vpop.permute.xlu1 %1638  ;;  %1910 = vrot.lane.b32.xlu0 %v6244_v5, %s5735_s24 }
 0x260   : > { %4629 = vst.msk [vmem:[%s5953_s29 + $0x224] sm:$0xf] %vm1200_vm0, %v1639_v14  ;;  %v874_v14 = vpop.f32.mrb[62].mxu0 }
 0x261   : > { %1912 = vrot.lane.b32.xlu1 %v6255_v44, %s5735_s24  ;;  %v1766_v15 = vpop.permute.xlu0 %1765 }
 0x262   : > { %4660 = vst.msk [vmem:[%s5953_s29 + $0x2a0] sm:$0xf] %vm1200_vm0, %v1766_v15  ;;  %v6726_v15 = vpack.c.bf16 %v871_v0, %v871_v0 }
 0x263   : > { %v1768_v62 = vpop.permute.xlu1 %1767  ;;  %1269 = vrot.lane.b32.xlu0 %v6292_v58, %s5730_s17 }
 0x264   : > { %4661 = vst.msk [vmem:[%s5953_s29 + $0x2a4] sm:$0xf] %vm1200_vm0, %v1768_v62  ;;  %v875_v62 = vadd.f32 %v874_v14, %v5941_v38  ;;  %1231 = vst.msk [vmem:[%s5953_s29 + $0x78] sm:$0xf] %vm1200_vm0, %v6726_v15 }
 0x265   : > { %1271 = vrot.lane.b32.xlu1 %v6303_v23, %s5730_s17  ;;  %v1895_v19 = vpop.permute.xlu0 %1894 }
 0x266   : > { %4692 = vst.msk [vmem:[%s5953_s29 + $0x320] sm:$0xf] %vm1200_vm0, %v1895_v19  ;;  %v876_v19 = vpop.f32.mrb[63].mxu0 }
 0x267   : > { %v1897_v22 = vpop.permute.xlu1 %1896  ;;  %1398 = vrot.lane.b32.xlu0 %v6292_v58, %s5731_s10 }
 0x268   : > { %4693 = vst.msk [vmem:[%s5953_s29 + $0x324] sm:$0xf] %vm1200_vm0, %v1897_v22 }
 0x269   : > { %1400 = vrot.lane.b32.xlu1 %v6303_v23, %s5731_s10  ;;  %v2024_v28 = vpop.permute.xlu0 %2023 }
 0x26a   : > { %4724 = vst.msk [vmem:[%s5953_s29 + $0x3a0] sm:$0xf] %vm1200_vm0, %v2024_v28  ;;  %v6731_v28 = vpack.c.bf16 %v873_v13, %v873_v13 }
 0x26b   : > { %v2026_v40 = vpop.permute.xlu1 %2025  ;;  %1527 = vrot.lane.b32.xlu0 %v6292_v58, %s5732_s7 }
 0x26c   : > { %4725 = vst.msk [vmem:[%s5953_s29 + $0x3a4] sm:$0xf] %vm1200_vm0, %v2026_v40  ;;  %v877_v40 = vadd.f32 %v876_v19, %v5944_v39  ;;  %2278 = vst.msk [vmem:[%s5962_s14 + $0x78] sm:$0xf] %vm1200_vm0, %v6731_v28 }
 0x26d   : > { %1529 = vrot.lane.b32.xlu1 %v6303_v23, %s5732_s7  ;;  %v1254_v18 = vpop.permute.xlu0 %1253 }
 0x26e   : > { %4534 = vst.msk [vmem:[%s5953_s29 + $0xa8] sm:$0xf] %vm1200_vm0, %v1254_v18  ;;  %v6739_v18 = vpack.c.bf16 %v875_v62, %v875_v62  ;;  %v6746_v54 = vpack.c.bf16 %v877_v40, %v877_v40 }
 0x26f   : > { %v1256_v7 = vpop.permute.xlu1 %1255  ;;  %1656 = vrot.lane.b32.xlu0 %v6292_v58, %s5733_s11 }
 0x270   : > { %4535 = vst.msk [vmem:[%s5953_s29 + $0xac] sm:$0xf] %vm1200_vm0, %v1256_v7  ;;  %1232 = vst.msk [vmem:[%s5953_s29 + $0x7c] sm:$0xf] %vm1200_vm0, %v6739_v18 }
 0x271   : > { %1658 = vrot.lane.b32.xlu1 %v6303_v23, %s5733_s11  ;;  %v1383_v22 = vpop.permute.xlu0 %1382  ;;  %2279 = vst.msk [vmem:[%s5962_s14 + $0x7c] sm:$0xf] %vm1200_vm0, %v6746_v54 }
 0x272   : > { %4566 = vst.msk [vmem:[%s5953_s29 + $0x128] sm:$0xf] %vm1200_vm0, %v1383_v22 }
 0x273   : > { %v1385_v38 = vpop.permute.xlu1 %1384  ;;  %1785 = vrot.lane.b32.xlu0 %v6292_v58, %s5734_s12 }
 0x274   : > { %4567 = vst.msk [vmem:[%s5953_s29 + $0x12c] sm:$0xf] %vm1200_vm0, %v1385_v38 }
 0x275   : > { %1787 = vrot.lane.b32.xlu1 %v6303_v23, %s5734_s12  ;;  %v1512_v39 = vpop.permute.xlu0 %1511 }
 0x276   : > { %4598 = vst.msk [vmem:[%s5953_s29 + $0x1a8] sm:$0xf] %vm1200_vm0, %v1512_v39 }
 0x277   : > { %v1514_v0 = vpop.permute.xlu1 %1513  ;;  %1914 = vrot.lane.b32.xlu0 %v6292_v58, %s5735_s24 }
 0x278   : > { %4599 = vst.msk [vmem:[%s5953_s29 + $0x1ac] sm:$0xf] %vm1200_vm0, %v1514_v0 }
 0x279   : > { %1916 = vrot.lane.b32.xlu1 %v6303_v23, %s5735_s24  ;;  %v1641_v1 = vpop.permute.xlu0 %1640 }
 0x27a   : > { %4630 = vst.msk [vmem:[%s5953_s29 + $0x228] sm:$0xf] %vm1200_vm0, %v1641_v1 }
 0x27b   : > { %v1643_v7 = vpop.permute.xlu1 %1642  ;;  %1273 = vrot.lane.b32.xlu0 %v6362_v11, %s5730_s17 }
 0x27c   : > { %4631 = vst.msk [vmem:[%s5953_s29 + $0x22c] sm:$0xf] %vm1200_vm0, %v1643_v7 }
 0x27d   : > { %1275 = vrot.lane.b32.xlu1 %v6375_v53, %s5730_s17  ;;  %v1770_v13 = vpop.permute.xlu0 %1769 }
 0x27e   : > { %4662 = vst.msk [vmem:[%s5953_s29 + $0x2a8] sm:$0xf] %vm1200_vm0, %v1770_v13 }
 0x27f   : > { %v1772_v14 = vpop.permute.xlu1 %1771  ;;  %1402 = vrot.lane.b32.xlu0 %v6362_v11, %s5731_s10 }
 0x280   : > { %4663 = vst.msk [vmem:[%s5953_s29 + $0x2ac] sm:$0xf] %vm1200_vm0, %v1772_v14 }
 0x281   : > { %1404 = vrot.lane.b32.xlu1 %v6375_v53, %s5731_s10  ;;  %v1899_v62 = vpop.permute.xlu0 %1898 }
 0x282   : > { %4694 = vst.msk [vmem:[%s5953_s29 + $0x328] sm:$0xf] %vm1200_vm0, %v1899_v62 }
 0x283   : > { %v1901_v19 = vpop.permute.xlu1 %1900  ;;  %1531 = vrot.lane.b32.xlu0 %v6362_v11, %s5732_s7 }
 0x284   : > { %4695 = vst.msk [vmem:[%s5953_s29 + $0x32c] sm:$0xf] %vm1200_vm0, %v1901_v19 }
 0x285   : > { %1533 = vrot.lane.b32.xlu1 %v6375_v53, %s5732_s7  ;;  %v2028_v22 = vpop.permute.xlu0 %2027 }
 0x286   : > { %4726 = vst.msk [vmem:[%s5953_s29 + $0x3a8] sm:$0xf] %vm1200_vm0, %v2028_v22 }
 0x287   : > { %v2030_v40 = vpop.permute.xlu1 %2029  ;;  %1660 = vrot.lane.b32.xlu0 %v6362_v11, %s5733_s11 }
 0x288   : > { %4727 = vst.msk [vmem:[%s5953_s29 + $0x3ac] sm:$0xf] %vm1200_vm0, %v2030_v40 }
 0x289   : > { %1662 = vrot.lane.b32.xlu1 %v6375_v53, %s5733_s11  ;;  %v1258_v38 = vpop.permute.xlu0 %1257 }
 0x28a   : > { %4536 = vst.msk [vmem:[%s5953_s29 + $0xb0] sm:$0xf] %vm1200_vm0, %v1258_v38 }
 0x28b   : > { %v1260_v39 = vpop.permute.xlu1 %1259  ;;  %1789 = vrot.lane.b32.xlu0 %v6362_v11, %s5734_s12 }
 0x28c   : > { %4537 = vst.msk [vmem:[%s5953_s29 + $0xb4] sm:$0xf] %vm1200_vm0, %v1260_v39 }
 0x28d   : > { %1791 = vrot.lane.b32.xlu1 %v6375_v53, %s5734_s12  ;;  %v1387_v0 = vpop.permute.xlu0 %1386 }
 0x28e   : > { %4568 = vst.msk [vmem:[%s5953_s29 + $0x130] sm:$0xf] %vm1200_vm0, %v1387_v0 }
 0x28f   : > { %v1389_v1 = vpop.permute.xlu1 %1388  ;;  %1918 = vrot.lane.b32.xlu0 %v6362_v11, %s5735_s24 }
 0x290   : > { %4569 = vst.msk [vmem:[%s5953_s29 + $0x134] sm:$0xf] %vm1200_vm0, %v1389_v1 }
 0x291   : > { %1920 = vrot.lane.b32.xlu1 %v6375_v53, %s5735_s24  ;;  %v1516_v7 = vpop.permute.xlu0 %1515 }
 0x292   : > { %4600 = vst.msk [vmem:[%s5953_s29 + $0x1b0] sm:$0xf] %vm1200_vm0, %v1516_v7 }
 0x293   : > { %v1518_v13 = vpop.permute.xlu1 %1517  ;;  %1277 = vrot.lane.b32.xlu0 %v6434_v27, %s5730_s17 }
 0x294   : > { %4601 = vst.msk [vmem:[%s5953_s29 + $0x1b4] sm:$0xf] %vm1200_vm0, %v1518_v13 }
 0x295   : > { %1279 = vrot.lane.b32.xlu1 %v6447_v43, %s5730_s17  ;;  %v1645_v14 = vpop.permute.xlu0 %1644 }
 0x296   : > { %4632 = vst.msk [vmem:[%s5953_s29 + $0x230] sm:$0xf] %vm1200_vm0, %v1645_v14 }
 0x297   : > { %v1647_v62 = vpop.permute.xlu1 %1646  ;;  %1406 = vrot.lane.b32.xlu0 %v6434_v27, %s5731_s10 }
 0x298   : > { %4633 = vst.msk [vmem:[%s5953_s29 + $0x234] sm:$0xf] %vm1200_vm0, %v1647_v62 }
 0x299   : > { %1408 = vrot.lane.b32.xlu1 %v6447_v43, %s5731_s10  ;;  %v1774_v19 = vpop.permute.xlu0 %1773 }
 0x29a   : > { %4664 = vst.msk [vmem:[%s5953_s29 + $0x2b0] sm:$0xf] %vm1200_vm0, %v1774_v19 }
 0x29b   : > { %v1776_v22 = vpop.permute.xlu1 %1775  ;;  %1535 = vrot.lane.b32.xlu0 %v6434_v27, %s5732_s7 }
 0x29c   : > { %4665 = vst.msk [vmem:[%s5953_s29 + $0x2b4] sm:$0xf] %vm1200_vm0, %v1776_v22 }
 0x29d   : > { %1537 = vrot.lane.b32.xlu1 %v6447_v43, %s5732_s7  ;;  %v1903_v40 = vpop.permute.xlu0 %1902 }
 0x29e   : > { %4696 = vst.msk [vmem:[%s5953_s29 + $0x330] sm:$0xf] %vm1200_vm0, %v1903_v40 }
 0x29f   : > { %v1905_v38 = vpop.permute.xlu1 %1904  ;;  %1664 = vrot.lane.b32.xlu0 %v6434_v27, %s5733_s11 }
 0x2a0   : > { %4697 = vst.msk [vmem:[%s5953_s29 + $0x334] sm:$0xf] %vm1200_vm0, %v1905_v38 }
 0x2a1   : > { %1666 = vrot.lane.b32.xlu1 %v6447_v43, %s5733_s11  ;;  %v2032_v39 = vpop.permute.xlu0 %2031 }
 0x2a2   : > { %4728 = vst.msk [vmem:[%s5953_s29 + $0x3b0] sm:$0xf] %vm1200_vm0, %v2032_v39 }
 0x2a3   : > { %v2034_v0 = vpop.permute.xlu1 %2033  ;;  %1793 = vrot.lane.b32.xlu0 %v6434_v27, %s5734_s12 }
 0x2a4   : > { %4729 = vst.msk [vmem:[%s5953_s29 + $0x3b4] sm:$0xf] %vm1200_vm0, %v2034_v0 }
 0x2a5   : > { %1795 = vrot.lane.b32.xlu1 %v6447_v43, %s5734_s12  ;;  %v1262_v1 = vpop.permute.xlu0 %1261 }
 0x2a6   : > { %4538 = vst.msk [vmem:[%s5953_s29 + $0xb8] sm:$0xf] %vm1200_vm0, %v1262_v1 }
 0x2a7   : > { %v1264_v7 = vpop.permute.xlu1 %1263  ;;  %1922 = vrot.lane.b32.xlu0 %v6434_v27, %s5735_s24 }
 0x2a8   : > { %4539 = vst.msk [vmem:[%s5953_s29 + $0xbc] sm:$0xf] %vm1200_vm0, %v1264_v7 }
 0x2a9   : > { %1924 = vrot.lane.b32.xlu1 %v6447_v43, %s5735_s24  ;;  %v1391_v13 = vpop.permute.xlu0 %1390 }
 0x2aa   : > { %4570 = vst.msk [vmem:[%s5953_s29 + $0x138] sm:$0xf] %vm1200_vm0, %v1391_v13 }
 0x2ab   : > { %v1393_v14 = vpop.permute.xlu1 %1392  ;;  %1281 = vrot.lane.b32.xlu0 %v6506_v17, %s5730_s17 }
 0x2ac   : > { %4571 = vst.msk [vmem:[%s5953_s29 + $0x13c] sm:$0xf] %vm1200_vm0, %v1393_v14 }
 0x2ad   : > { %1283 = vrot.lane.b32.xlu1 %v6519_v37, %s5730_s17  ;;  %v1520_v62 = vpop.permute.xlu0 %1519 }
 0x2ae   : > { %4602 = vst.msk [vmem:[%s5953_s29 + $0x1b8] sm:$0xf] %vm1200_vm0, %v1520_v62 }
 0x2af   : > { %v1522_v19 = vpop.permute.xlu1 %1521  ;;  %1410 = vrot.lane.b32.xlu0 %v6506_v17, %s5731_s10 }
 0x2b0   : > { %4603 = vst.msk [vmem:[%s5953_s29 + $0x1bc] sm:$0xf] %vm1200_vm0, %v1522_v19 }
 0x2b1   : > { %1412 = vrot.lane.b32.xlu1 %v6519_v37, %s5731_s10  ;;  %v1649_v22 = vpop.permute.xlu0 %1648 }
 0x2b2   : > { %4634 = vst.msk [vmem:[%s5953_s29 + $0x238] sm:$0xf] %vm1200_vm0, %v1649_v22 }
 0x2b3   : > { %v1651_v40 = vpop.permute.xlu1 %1650  ;;  %1539 = vrot.lane.b32.xlu0 %v6506_v17, %s5732_s7 }
 0x2b4   : > { %4635 = vst.msk [vmem:[%s5953_s29 + $0x23c] sm:$0xf] %vm1200_vm0, %v1651_v40 }
 0x2b5   : > { %1541 = vrot.lane.b32.xlu1 %v6519_v37, %s5732_s7  ;;  %v1778_v38 = vpop.permute.xlu0 %1777 }
 0x2b6   : > { %4666 = vst.msk [vmem:[%s5953_s29 + $0x2b8] sm:$0xf] %vm1200_vm0, %v1778_v38 }
 0x2b7   : > { %v1780_v39 = vpop.permute.xlu1 %1779  ;;  %1668 = vrot.lane.b32.xlu0 %v6506_v17, %s5733_s11 }
 0x2b8   : > { %4667 = vst.msk [vmem:[%s5953_s29 + $0x2bc] sm:$0xf] %vm1200_vm0, %v1780_v39 }
 0x2b9   : > { %1670 = vrot.lane.b32.xlu1 %v6519_v37, %s5733_s11  ;;  %v1907_v0 = vpop.permute.xlu0 %1906 }
 0x2ba   : > { %4698 = vst.msk [vmem:[%s5953_s29 + $0x338] sm:$0xf] %vm1200_vm0, %v1907_v0 }
 0x2bb   : > { %v1909_v1 = vpop.permute.xlu1 %1908  ;;  %1797 = vrot.lane.b32.xlu0 %v6506_v17, %s5734_s12 }
 0x2bc   : > { %4699 = vst.msk [vmem:[%s5953_s29 + $0x33c] sm:$0xf] %vm1200_vm0, %v1909_v1 }
 0x2bd   : > { %1799 = vrot.lane.b32.xlu1 %v6519_v37, %s5734_s12  ;;  %v1266_v7 = vpop.permute.xlu0 %1265 }
 0x2be   : > { %4540 = vst.msk [vmem:[%s5953_s29 + $0xc0] sm:$0xf] %vm1200_vm0, %v1266_v7 }
 0x2bf   : > { %v1268_v13 = vpop.permute.xlu1 %1267  ;;  %1926 = vrot.lane.b32.xlu0 %v6506_v17, %s5735_s24 }
 0x2c0   : > { %4541 = vst.msk [vmem:[%s5953_s29 + $0xc4] sm:$0xf] %vm1200_vm0, %v1268_v13 }
 0x2c1   : > { %1928 = vrot.lane.b32.xlu1 %v6519_v37, %s5735_s24  ;;  %v1395_v14 = vpop.permute.xlu0 %1394 }
 0x2c2   : > { %4572 = vst.msk [vmem:[%s5953_s29 + $0x140] sm:$0xf] %vm1200_vm0, %v1395_v14 }
 0x2c3   : > { %v1397_v62 = vpop.permute.xlu1 %1396  ;;  %1285 = vrot.lane.b32.xlu0 %v6578_v16, %s5730_s17 }
 0x2c4   : > { %4573 = vst.msk [vmem:[%s5953_s29 + $0x144] sm:$0xf] %vm1200_vm0, %v1397_v62 }
 0x2c5   : > { %1287 = vrot.lane.b32.xlu1 %v6591_v59, %s5730_s17  ;;  %v1524_v19 = vpop.permute.xlu0 %1523 }
 0x2c6   : > { %4604 = vst.msk [vmem:[%s5953_s29 + $0x1c0] sm:$0xf] %vm1200_vm0, %v1524_v19 }
 0x2c7   : > { %v1526_v22 = vpop.permute.xlu1 %1525  ;;  %1414 = vrot.lane.b32.xlu0 %v6578_v16, %s5731_s10 }
 0x2c8   : > { %4605 = vst.msk [vmem:[%s5953_s29 + $0x1c4] sm:$0xf] %vm1200_vm0, %v1526_v22 }
 0x2c9   : > { %1416 = vrot.lane.b32.xlu1 %v6591_v59, %s5731_s10  ;;  %v1653_v40 = vpop.permute.xlu0 %1652 }
 0x2ca   : > { %4636 = vst.msk [vmem:[%s5953_s29 + $0x240] sm:$0xf] %vm1200_vm0, %v1653_v40 }
 0x2cb   : > { %v1655_v38 = vpop.permute.xlu1 %1654  ;;  %1543 = vrot.lane.b32.xlu0 %v6578_v16, %s5732_s7 }
 0x2cc   : > { %4637 = vst.msk [vmem:[%s5953_s29 + $0x244] sm:$0xf] %vm1200_vm0, %v1655_v38 }
 0x2cd   : > { %1545 = vrot.lane.b32.xlu1 %v6591_v59, %s5732_s7  ;;  %v1782_v39 = vpop.permute.xlu0 %1781 }
 0x2ce   : > { %4668 = vst.msk [vmem:[%s5953_s29 + $0x2c0] sm:$0xf] %vm1200_vm0, %v1782_v39 }
 0x2cf   : > { %v1784_v0 = vpop.permute.xlu1 %1783  ;;  %1672 = vrot.lane.b32.xlu0 %v6578_v16, %s5733_s11 }
 0x2d0   : > { %4669 = vst.msk [vmem:[%s5953_s29 + $0x2c4] sm:$0xf] %vm1200_vm0, %v1784_v0 }
 0x2d1   : > { %1674 = vrot.lane.b32.xlu1 %v6591_v59, %s5733_s11  ;;  %v1911_v1 = vpop.permute.xlu0 %1910 }
 0x2d2   : > { %4700 = vst.msk [vmem:[%s5953_s29 + $0x340] sm:$0xf] %vm1200_vm0, %v1911_v1 }
 0x2d3   : > { %v1913_v7 = vpop.permute.xlu1 %1912  ;;  %1801 = vrot.lane.b32.xlu0 %v6578_v16, %s5734_s12 }
 0x2d4   : > { %4701 = vst.msk [vmem:[%s5953_s29 + $0x344] sm:$0xf] %vm1200_vm0, %v1913_v7 }
 0x2d5   : > { %1803 = vrot.lane.b32.xlu1 %v6591_v59, %s5734_s12  ;;  %v1270_v13 = vpop.permute.xlu0 %1269 }
 0x2d6   : > { %4542 = vst.msk [vmem:[%s5953_s29 + $0xc8] sm:$0xf] %vm1200_vm0, %v1270_v13 }
 0x2d7   : > { %v1272_v14 = vpop.permute.xlu1 %1271  ;;  %1930 = vrot.lane.b32.xlu0 %v6578_v16, %s5735_s24 }
 0x2d8   : > { %4543 = vst.msk [vmem:[%s5953_s29 + $0xcc] sm:$0xf] %vm1200_vm0, %v1272_v14 }
 0x2d9   : > { %1932 = vrot.lane.b32.xlu1 %v6591_v59, %s5735_s24  ;;  %v1399_v62 = vpop.permute.xlu0 %1398 }
 0x2da   : > { %4574 = vst.msk [vmem:[%s5953_s29 + $0x148] sm:$0xf] %vm1200_vm0, %v1399_v62 }
 0x2db   : > { %v1401_v19 = vpop.permute.xlu1 %1400  ;;  %1289 = vrot.lane.b32.xlu0 %v6650_v46, %s5730_s17 }
 0x2dc   : > { %4575 = vst.msk [vmem:[%s5953_s29 + $0x14c] sm:$0xf] %vm1200_vm0, %v1401_v19 }
 0x2dd   : > { %1291 = vrot.lane.b32.xlu1 %v6663_v8, %s5730_s17  ;;  %v1528_v22 = vpop.permute.xlu0 %1527 }
 0x2de   : > { %4606 = vst.msk [vmem:[%s5953_s29 + $0x1c8] sm:$0xf] %vm1200_vm0, %v1528_v22 }
 0x2df   : > { %v1530_v40 = vpop.permute.xlu1 %1529  ;;  %1418 = vrot.lane.b32.xlu0 %v6650_v46, %s5731_s10 }
 0x2e0   : > { %4607 = vst.msk [vmem:[%s5953_s29 + $0x1cc] sm:$0xf] %vm1200_vm0, %v1530_v40 }
 0x2e1   : > { %1420 = vrot.lane.b32.xlu1 %v6663_v8, %s5731_s10  ;;  %v1657_v38 = vpop.permute.xlu0 %1656 }
 0x2e2   : > { %4638 = vst.msk [vmem:[%s5953_s29 + $0x248] sm:$0xf] %vm1200_vm0, %v1657_v38 }
 0x2e3   : > { %v1659_v39 = vpop.permute.xlu1 %1658  ;;  %1547 = vrot.lane.b32.xlu0 %v6650_v46, %s5732_s7 }
 0x2e4   : > { %4639 = vst.msk [vmem:[%s5953_s29 + $0x24c] sm:$0xf] %vm1200_vm0, %v1659_v39 }
 0x2e5   : > { %1549 = vrot.lane.b32.xlu1 %v6663_v8, %s5732_s7  ;;  %v1786_v0 = vpop.permute.xlu0 %1785 }
 0x2e6   : > { %4670 = vst.msk [vmem:[%s5953_s29 + $0x2c8] sm:$0xf] %vm1200_vm0, %v1786_v0 }
 0x2e7   : > { %v1788_v1 = vpop.permute.xlu1 %1787  ;;  %1676 = vrot.lane.b32.xlu0 %v6650_v46, %s5733_s11 }
 0x2e8   : > { %4671 = vst.msk [vmem:[%s5953_s29 + $0x2cc] sm:$0xf] %vm1200_vm0, %v1788_v1 }
 0x2e9   : > { %1678 = vrot.lane.b32.xlu1 %v6663_v8, %s5733_s11  ;;  %v1915_v7 = vpop.permute.xlu0 %1914 }
 0x2ea   : > { %4702 = vst.msk [vmem:[%s5953_s29 + $0x348] sm:$0xf] %vm1200_vm0, %v1915_v7 }
 0x2eb   : > { %v1917_v13 = vpop.permute.xlu1 %1916  ;;  %1805 = vrot.lane.b32.xlu0 %v6650_v46, %s5734_s12 }
 0x2ec   : > { %4703 = vst.msk [vmem:[%s5953_s29 + $0x34c] sm:$0xf] %vm1200_vm0, %v1917_v13 }
 0x2ed   : > { %1807 = vrot.lane.b32.xlu1 %v6663_v8, %s5734_s12  ;;  %v1274_v14 = vpop.permute.xlu0 %1273 }
 0x2ee   : > { %4544 = vst.msk [vmem:[%s5953_s29 + $0xd0] sm:$0xf] %vm1200_vm0, %v1274_v14 }
 0x2ef   : > { %v1276_v62 = vpop.permute.xlu1 %1275  ;;  %1934 = vrot.lane.b32.xlu0 %v6650_v46, %s5735_s24 }
 0x2f0   : > { %4545 = vst.msk [vmem:[%s5953_s29 + $0xd4] sm:$0xf] %vm1200_vm0, %v1276_v62 }
 0x2f1   : > { %1936 = vrot.lane.b32.xlu1 %v6663_v8, %s5735_s24  ;;  %v1403_v19 = vpop.permute.xlu0 %1402 }
 0x2f2   : > { %4576 = vst.msk [vmem:[%s5953_s29 + $0x150] sm:$0xf] %vm1200_vm0, %v1403_v19 }
 0x2f3   : > { %v1405_v22 = vpop.permute.xlu1 %1404  ;;  %1293 = vrot.lane.b32.xlu0 %v6726_v15, %s5730_s17 }
 0x2f4   : > { %4577 = vst.msk [vmem:[%s5953_s29 + $0x154] sm:$0xf] %vm1200_vm0, %v1405_v22 }
 0x2f5   : > { %2037 = vrot.lane.b32.xlu1 %v6207_v25, %s5736_s18  ;;  %v1532_v40 = vpop.permute.xlu0 %1531 }
 0x2f6   : > { %4608 = vst.msk [vmem:[%s5953_s29 + $0x1d0] sm:$0xf] %vm1200_vm0, %v1532_v40 }
 0x2f7   : > { %v1534_v38 = vpop.permute.xlu1 %1533  ;;  %1422 = vrot.lane.b32.xlu0 %v6726_v15, %s5731_s10 }
 0x2f8   : > { %4609 = vst.msk [vmem:[%s5953_s29 + $0x1d4] sm:$0xf] %vm1200_vm0, %v1534_v38 }
 0x2f9   : > { %1295 = vrot.lane.b32.xlu1 %v6739_v18, %s5730_s17  ;;  %v1661_v39 = vpop.permute.xlu0 %1660 }
 0x2fa   : > { %4640 = vst.msk [vmem:[%s5953_s29 + $0x250] sm:$0xf] %vm1200_vm0, %v1661_v39 }
 0x2fb   : > { %v1663_v0 = vpop.permute.xlu1 %1662  ;;  %1551 = vrot.lane.b32.xlu0 %v6726_v15, %s5732_s7 }
 0x2fc   : > { %4641 = vst.msk [vmem:[%s5953_s29 + $0x254] sm:$0xf] %vm1200_vm0, %v1663_v0 }
 0x2fd   : > { %1424 = vrot.lane.b32.xlu1 %v6739_v18, %s5731_s10  ;;  %v1790_v25 = vpop.permute.xlu0 %1789 }
 0x2fe   : > { %4672 = vst.msk [vmem:[%s5953_s29 + $0x2d0] sm:$0xf] %vm1200_vm0, %v1790_v25 }
 0x2ff   : > { %v1792_v1 = vpop.permute.xlu1 %1791  ;;  %1680 = vrot.lane.b32.xlu0 %v6726_v15, %s5733_s11 }
 0x300   : > { %4673 = vst.msk [vmem:[%s5953_s29 + $0x2d4] sm:$0xf] %vm1200_vm0, %v1792_v1 }
 0x301   : > { %1553 = vrot.lane.b32.xlu1 %v6739_v18, %s5732_s7  ;;  %v1919_v7 = vpop.permute.xlu0 %1918 }
 0x302   : > { %4704 = vst.msk [vmem:[%s5953_s29 + $0x350] sm:$0xf] %vm1200_vm0, %v1919_v7 }
 0x303   : > { %v1921_v13 = vpop.permute.xlu1 %1920  ;;  %1809 = vrot.lane.b32.xlu0 %v6726_v15, %s5734_s12 }
 0x304   : > { %4705 = vst.msk [vmem:[%s5953_s29 + $0x354] sm:$0xf] %vm1200_vm0, %v1921_v13 }
 0x305   : > { %1682 = vrot.lane.b32.xlu1 %v6739_v18, %s5733_s11  ;;  %v1278_v14 = vpop.permute.xlu0 %1277 }
 0x306   : > { %4546 = vst.msk [vmem:[%s5953_s29 + $0xd8] sm:$0xf] %vm1200_vm0, %v1278_v14 }
 0x307   : > { %v1280_v62 = vpop.permute.xlu1 %1279  ;;  %1938 = vrot.lane.b32.xlu0 %v6726_v15, %s5735_s24 }
 0x308   : > { %4547 = vst.msk [vmem:[%s5953_s29 + $0xdc] sm:$0xf] %vm1200_vm0, %v1280_v62 }
 0x309   : > { %1811 = vrot.lane.b32.xlu1 %v6739_v18, %s5734_s12  ;;  %v1407_v19 = vpop.permute.xlu0 %1406 }
 0x30a   : > { %4578 = vst.msk [vmem:[%s5953_s29 + $0x158] sm:$0xf] %vm1200_vm0, %v1407_v19 }
 0x30b   : > { %v1409_v22 = vpop.permute.xlu1 %1408  ;;  %2035 = vrot.lane.b32.xlu0 %v6195_v57, %s5736_s18 }
 0x30c   : > { %4579 = vst.msk [vmem:[%s5953_s29 + $0x15c] sm:$0xf] %vm1200_vm0, %v1409_v22 }
 0x30d   : > { %1940 = vrot.lane.b32.xlu1 %v6739_v18, %s5735_s24  ;;  %v1536_v40 = vpop.permute.xlu0 %1535 }
 0x30e   : > { %4610 = vst.msk [vmem:[%s5953_s29 + $0x1d8] sm:$0xf] %vm1200_vm0, %v1536_v40 }
 0x30f   : > { %v1538_v38 = vpop.permute.xlu1 %1537  ;;  %2039 = vrot.lane.b32.xlu0 %v6244_v5, %s5736_s18 }
 0x310   : > { %4611 = vst.msk [vmem:[%s5953_s29 + $0x1dc] sm:$0xf] %vm1200_vm0, %v1538_v38 }
 0x311   : > { %2041 = vrot.lane.b32.xlu1 %v6255_v44, %s5736_s18  ;;  %v1665_v57 = vpop.permute.xlu0 %1664 }
 0x312   : > { %4642 = vst.msk [vmem:[%s5953_s29 + $0x258] sm:$0xf] %vm1200_vm0, %v1665_v57 }
 0x313   : > { %v1667_v39 = vpop.permute.xlu1 %1666  ;;  %2043 = vrot.lane.b32.xlu0 %v6292_v58, %s5736_s18 }
 0x314   : > { %4643 = vst.msk [vmem:[%s5953_s29 + $0x25c] sm:$0xf] %vm1200_vm0, %v1667_v39 }
 0x315   : > { %2045 = vrot.lane.b32.xlu1 %v6303_v23, %s5736_s18  ;;  %v1794_v5 = vpop.permute.xlu0 %1793 }
 0x316   : > { %4674 = vst.msk [vmem:[%s5953_s29 + $0x2d8] sm:$0xf] %vm1200_vm0, %v1794_v5 }
 0x317   : > { %v1796_v0 = vpop.permute.xlu1 %1795  ;;  %2047 = vrot.lane.b32.xlu0 %v6362_v11, %s5736_s18 }
 0x318   : > { %4675 = vst.msk [vmem:[%s5953_s29 + $0x2dc] sm:$0xf] %vm1200_vm0, %v1796_v0 }
 0x319   : > { %2049 = vrot.lane.b32.xlu1 %v6375_v53, %s5736_s18  ;;  %v1923_v44 = vpop.permute.xlu0 %1922 }
 0x31a   : > { %4706 = vst.msk [vmem:[%s5953_s29 + $0x358] sm:$0xf] %vm1200_vm0, %v1923_v44  ;;  %v5589_v44 = vld [vmem:[#allocation4 + $0x80] sm:$0xff]  }
 0x31b   : > { %v1925_v58 = vpop.permute.xlu1 %1924  ;;  %2051 = vrot.lane.b32.xlu0 %v6434_v27, %s5736_s18  ;;  %5434 = vmatprep.subr.bf16.mxu1 %v5589_v44 }
 0x31c   : > { %4707 = vst.msk [vmem:[%s5953_s29 + $0x35c] sm:$0xf] %vm1200_vm0, %v1925_v58  ;;  %5435 = vmatpush3.bf16.xpose.msra.mxu1 %v5589_v44 }
 0x31d   : > { %2053 = vrot.lane.b32.xlu1 %v6447_v43, %s5736_s18  ;;  %v1282_v23 = vpop.permute.xlu0 %1281 }
 0x31e   : > { %4548 = vst.msk [vmem:[%s5953_s29 + $0xe0] sm:$0xf] %vm1200_vm0, %v1282_v23 }
 0x31f   : > { %v1284_v11 = vpop.permute.xlu1 %1283  ;;  %2055 = vrot.lane.b32.xlu0 %v6506_v17, %s5736_s18 }
 0x320   : > { %4549 = vst.msk [vmem:[%s5953_s29 + $0xe4] sm:$0xf] %vm1200_vm0, %v1284_v11 }
 0x321   : > { %2057 = vrot.lane.b32.xlu1 %v6519_v37, %s5736_s18  ;;  %v1411_v53 = vpop.permute.xlu0 %1410 }
 0x322   : > { %4580 = vst.msk [vmem:[%s5953_s29 + $0x160] sm:$0xf] %vm1200_vm0, %v1411_v53 }
 0x323   : > { %v1413_v27 = vpop.permute.xlu1 %1412  ;;  %2059 = vrot.lane.b32.xlu0 %v6578_v16, %s5736_s18 }
 0x324   : > { %4581 = vst.msk [vmem:[%s5953_s29 + $0x164] sm:$0xf] %vm1200_vm0, %v1413_v27  ;;  %v5590_v27 = vld [vmem:[#allocation4 + $0x88] sm:$0xff]  }
 0x325   : > { %2061 = vrot.lane.b32.xlu1 %v6591_v59, %s5736_s18  ;;  %v1540_v43 = vpop.permute.xlu0 %1539  ;;  %5436 = vmatprep.subr.bf16.mxu1 %v5590_v27 }
 0x326   : > { %4612 = vst.msk [vmem:[%s5953_s29 + $0x1e0] sm:$0xf] %vm1200_vm0, %v1540_v43  ;;  %5437 = vmatpush3.bf16.xpose.msra.mxu1 %v5590_v27 }
 0x327   : > { %v1542_v17 = vpop.permute.xlu1 %1541  ;;  %2063 = vrot.lane.b32.xlu0 %v6650_v46, %s5736_s18 }
 0x328   : > { %4613 = vst.msk [vmem:[%s5953_s29 + $0x1e4] sm:$0xf] %vm1200_vm0, %v1542_v17 }
 0x329   : > { %2065 = vrot.lane.b32.xlu1 %v6663_v8, %s5736_s18  ;;  %v1669_v37 = vpop.permute.xlu0 %1668 }
 0x32a   : > { %4644 = vst.msk [vmem:[%s5953_s29 + $0x260] sm:$0xf] %vm1200_vm0, %v1669_v37 }
 0x32b   : > { %v1671_v16 = vpop.permute.xlu1 %1670  ;;  %2067 = vrot.lane.b32.xlu0 %v6726_v15, %s5736_s18 }
 0x32c   : > { %4645 = vst.msk [vmem:[%s5953_s29 + $0x264] sm:$0xf] %vm1200_vm0, %v1671_v16 }
 0x32d   : > { %2069 = vrot.lane.b32.xlu1 %v6739_v18, %s5736_s18  ;;  %v1798_v59 = vpop.permute.xlu0 %1797 }
 0x32e   : > { %4676 = vst.msk [vmem:[%s5953_s29 + $0x2e0] sm:$0xf] %vm1200_vm0, %v1798_v59  ;;  %v5591_v59 = vld [vmem:[#allocation4 + $0x90] sm:$0xff]  }
 0x32f   : > { %v1800_v46 = vpop.permute.xlu1 %1799  ;;  %2280 = vrot.lane.b32.xlu0 %v5965_v48, %s5730_s17  ;;  %5438 = vmatprep.subr.bf16.mxu1 %v5591_v59 }
 0x330   : > { %4677 = vst.msk [vmem:[%s5953_s29 + $0x2e4] sm:$0xf] %vm1200_vm0, %v1800_v46  ;;  %5439 = vmatpush3.bf16.xpose.msra.mxu1 %v5591_v59 }
 0x331   : > { %2282 = vrot.lane.b32.xlu1 %v5978_v51, %s5730_s17  ;;  %v1927_v8 = vpop.permute.xlu0 %1926 }
 0x332   : > { %4708 = vst.msk [vmem:[%s5953_s29 + $0x360] sm:$0xf] %vm1200_vm0, %v1927_v8 }
 0x333   : > { %v1929_v15 = vpop.permute.xlu1 %1928  ;;  %2284 = vrot.lane.b32.xlu0 %v5997_v60, %s5730_s17 }
 0x334   : > { %4709 = vst.msk [vmem:[%s5953_s29 + $0x364] sm:$0xf] %vm1200_vm0, %v1929_v15 }
 0x335   : > { %2286 = vrot.lane.b32.xlu1 %v6010_v63, %s5730_s17  ;;  %v1286_v18 = vpop.permute.xlu0 %1285 }
 0x336   : > { %4550 = vst.msk [vmem:[%s5953_s29 + $0xe8] sm:$0xf] %vm1200_vm0, %v1286_v18 }
 0x337   : > { %v1288_v25 = vpop.permute.xlu1 %1287  ;;  %2288 = vrot.lane.b32.xlu0 %v6030_v9, %s5730_s17 }
 0x338   : > { %4551 = vst.msk [vmem:[%s5953_s29 + $0xec] sm:$0xf] %vm1200_vm0, %v1288_v25  ;;  %v5592_v25 = vld [vmem:[#allocation4 + $0x98] sm:$0xff]  }
 0x339   : > { %2290 = vrot.lane.b32.xlu1 %v6043_v12, %s5730_s17  ;;  %v1415_v1 = vpop.permute.xlu0 %1414  ;;  %5440 = vmatprep.subr.bf16.mxu1 %v5592_v25 }
 0x33a   : > { %4582 = vst.msk [vmem:[%s5953_s29 + $0x168] sm:$0xf] %vm1200_vm0, %v1415_v1  ;;  %5441 = vmatpush3.bf16.xpose.msra.mxu1 %v5592_v25 }
 0x33b   : > { %v1417_v7 = vpop.permute.xlu1 %1416  ;;  %2292 = vrot.lane.b32.xlu0 %v6062_v21, %s5730_s17 }
 0x33c   : > { %4583 = vst.msk [vmem:[%s5953_s29 + $0x16c] sm:$0xf] %vm1200_vm0, %v1417_v7 }
 0x33d   : > { %2294 = vrot.lane.b32.xlu1 %v6075_v24, %s5730_s17  ;;  %v1544_v13 = vpop.permute.xlu0 %1543 }
 0x33e   : > { %4614 = vst.msk [vmem:[%s5953_s29 + $0x1e8] sm:$0xf] %vm1200_vm0, %v1544_v13 }
 0x33f   : > { %v1546_v14 = vpop.permute.xlu1 %1545  ;;  %2296 = vrot.lane.b32.xlu0 %v6094_v36, %s5730_s17 }
 0x340   : > { %4615 = vst.msk [vmem:[%s5953_s29 + $0x1ec] sm:$0xf] %vm1200_vm0, %v1546_v14 }
 0x341   : > { %2298 = vrot.lane.b32.xlu1 %v6107_v41, %s5730_s17  ;;  %v1673_v62 = vpop.permute.xlu0 %1672 }
 0x342   : > { %4646 = vst.msk [vmem:[%s5953_s29 + $0x268] sm:$0xf] %vm1200_vm0, %v1673_v62  ;;  %v5593_v62 = vld [vmem:[#allocation4 + $0xa0] sm:$0xff]  }
 0x343   : > { %v1675_v19 = vpop.permute.xlu1 %1674  ;;  %2300 = vrot.lane.b32.xlu0 %v6126_v52, %s5730_s17  ;;  %5442 = vmatprep.subr.bf16.mxu1 %v5593_v62 }
 0x344   : > { %4647 = vst.msk [vmem:[%s5953_s29 + $0x26c] sm:$0xf] %vm1200_vm0, %v1675_v19  ;;  %5443 = vmatpush3.bf16.xpose.msra.mxu1 %v5593_v62 }
 0x345   : > { %2302 = vrot.lane.b32.xlu1 %v6140_v56, %s5730_s17  ;;  %v1802_v22 = vpop.permute.xlu0 %1801 }
 0x346   : > { %4678 = vst.msk [vmem:[%s5953_s29 + $0x2e8] sm:$0xf] %vm1200_vm0, %v1802_v22 }
 0x347   : > { %v1804_v40 = vpop.permute.xlu1 %1803  ;;  %2304 = vrot.lane.b32.xlu0 %v6159_v6, %s5730_s17 }
 0x348   : > { %4679 = vst.msk [vmem:[%s5953_s29 + $0x2ec] sm:$0xf] %vm1200_vm0, %v1804_v40 }
 0x349   : > { %2306 = vrot.lane.b32.xlu1 %v6172_v10, %s5730_s17  ;;  %v1931_v38 = vpop.permute.xlu0 %1930 }
 0x34a   : > { %4710 = vst.msk [vmem:[%s5953_s29 + $0x368] sm:$0xf] %vm1200_vm0, %v1931_v38 }
 0x34b   : > { %v1933_v57 = vpop.permute.xlu1 %1932  ;;  %2308 = vrot.lane.b32.xlu0 %v6204_v20, %s5730_s17 }
 0x34c   : > { %4711 = vst.msk [vmem:[%s5953_s29 + $0x36c] sm:$0xf] %vm1200_vm0, %v1933_v57  ;;  %v5594_v57 = vld [vmem:[#allocation4 + $0xa8] sm:$0xff]  }
 0x34d   : > { %2310 = vrot.lane.b32.xlu1 %v6214_v26, %s5730_s17  ;;  %v1290_v39 = vpop.permute.xlu0 %1289  ;;  %5444 = vmatprep.subr.bf16.mxu1 %v5594_v57 }
 0x34e   : > { %4552 = vst.msk [vmem:[%s5953_s29 + $0xf0] sm:$0xf] %vm1200_vm0, %v1290_v39  ;;  %5445 = vmatpush3.bf16.xpose.msra.mxu1 %v5594_v57  ;;  %v5602_v57 = vld [vmem:[%s5900_s8 + $0x30] sm:$0xff]  }
 0x34f   : > { %v1292_v5 = vpop.permute.xlu1 %1291  ;;  %2312 = vrot.lane.b32.xlu0 %v6249_v42, %s5730_s17 }
 0x350   : > { %4553 = vst.msk [vmem:[%s5953_s29 + $0xf4] sm:$0xf] %vm1200_vm0, %v1292_v5 }
 0x351   : > { %2314 = vrot.lane.b32.xlu1 %v6262_v45, %s5730_s17  ;;  %v1419_v0 = vpop.permute.xlu0 %1418 }
 0x352   : > { %4584 = vst.msk [vmem:[%s5953_s29 + $0x170] sm:$0xf] %vm1200_vm0, %v1419_v0 }
 0x353   : > { %v1421_v58 = vpop.permute.xlu1 %1420  ;;  %2316 = vrot.lane.b32.xlu0 %v6297_v61, %s5730_s17 }
 0x354   : > { %4585 = vst.msk [vmem:[%s5953_s29 + $0x174] sm:$0xf] %vm1200_vm0, %v1421_v58  ;;  %v5595_v58 = vld [vmem:[#allocation4 + $0xb0] sm:$0xff]  }
 0x355   : > { %2318 = vrot.lane.b32.xlu1 %v6310_v3, %s5730_s17  ;;  %v1548_v23 = vpop.permute.xlu0 %1547  ;;  %5446 = vmatprep.subr.bf16.mxu1 %v5595_v58 }
 0x356   : > { %4616 = vst.msk [vmem:[%s5953_s29 + $0x1f0] sm:$0xf] %vm1200_vm0, %v1548_v23  ;;  %5447 = vmatpush3.bf16.xpose.msra.mxu1 %v5595_v58  ;;  %v5603_v58 = vld [vmem:[%s5900_s8 + $0x38] sm:$0xff]  }
 0x357   : > { %v1550_v11 = vpop.permute.xlu1 %1549  ;;  %2320 = vrot.lane.b32.xlu0 %v6367_v49, %s5730_s17 }
 0x358   : > { %4617 = vst.msk [vmem:[%s5953_s29 + $0x1f4] sm:$0xf] %vm1200_vm0, %v1550_v11 }
 0x359   : > { %2322 = vrot.lane.b32.xlu1 %v6382_v31, %s5730_s17  ;;  %v1677_v53 = vpop.permute.xlu0 %1676 }
 0x35a   : > { %4648 = vst.msk [vmem:[%s5953_s29 + $0x270] sm:$0xf] %vm1200_vm0, %v1677_v53 }
 0x35b   : > { %v1679_v43 = vpop.permute.xlu1 %1678  ;;  %2324 = vrot.lane.b32.xlu0 %v6439_v35, %s5730_s17 }
 0x35c   : > { %4649 = vst.msk [vmem:[%s5953_s29 + $0x274] sm:$0xf] %vm1200_vm0, %v1679_v43  ;;  %v5596_v43 = vld [vmem:[#allocation4 + $0xb8] sm:$0xff]  }
 0x35d   : > { %2326 = vrot.lane.b32.xlu1 %v6454_v50, %s5730_s17  ;;  %v1806_v17 = vpop.permute.xlu0 %1805  ;;  %5448 = vmatprep.subr.bf16.mxu1 %v5596_v43 }
 0x35e   : > { %4680 = vst.msk [vmem:[%s5953_s29 + $0x2f0] sm:$0xf] %vm1200_vm0, %v1806_v17  ;;  %5449 = vmatpush3.bf16.xpose.msra.mxu1 %v5596_v43 }
 0x35f   : > { %v1808_v37 = vpop.permute.xlu1 %1807  ;;  %2328 = vrot.lane.b32.xlu0 %v6511_v29, %s5730_s17 }
 0x360   : > { %4681 = vst.msk [vmem:[%s5953_s29 + $0x2f4] sm:$0xf] %vm1200_vm0, %v1808_v37 }
 0x361   : > { %2330 = vrot.lane.b32.xlu1 %v6526_v55, %s5730_s17  ;;  %v1935_v16 = vpop.permute.xlu0 %1934 }
 0x362   : > { %4712 = vst.msk [vmem:[%s5953_s29 + $0x370] sm:$0xf] %vm1200_vm0, %v1935_v16 }
 0x363   : > { %v1937_v46 = vpop.permute.xlu1 %1936  ;;  %2332 = vrot.lane.b32.xlu0 %v6583_v34, %s5730_s17 }
 0x364   : > { %4713 = vst.msk [vmem:[%s5953_s29 + $0x374] sm:$0xf] %vm1200_vm0, %v1937_v46 }
 0x365   : > { %2334 = vrot.lane.b32.xlu1 %v6598_v47, %s5730_s17  ;;  %v1294_v8 = vpop.permute.xlu0 %1293 }
 0x366   : > { %4554 = vst.msk [vmem:[%s5953_s29 + $0xf8] sm:$0xf] %vm1200_vm0, %v1294_v8  ;;  %v5597_v8 = vld [vmem:[%s5900_s8 + $0x8] sm:$0xff]  }
 0x367   : > { %v2038_v15 = vpop.permute.xlu1 %2037  ;;  %2336 = vrot.lane.b32.xlu0 %v6655_v2, %s5730_s17  ;;  %5451 = vmatmul.mubr.bf16.vlgmr.msra.gmra.mrb[0].mxu1 %v5597_v8 }
 0x368   : > { %4731 = vst.msk [vmem:[%s5953_s29 + $0x3bc] sm:$0xf] %vm1200_vm0, %v2038_v15  ;;  %v5598_v15 = vld [vmem:[%s5900_s8 + $0x10] sm:$0xff]  }
 0x369   : > { %2338 = vrot.lane.b32.xlu1 %v6670_v4, %s5730_s17  ;;  %v1423_v18 = vpop.permute.xlu0 %1422  ;;  %5454 = vmatprep.mubr.bf16.mxu1 %v5598_v15  ;;  %v5607_v15 = vld [vmem:[%s5900_s8 + $0x58] sm:$0xff]  }
 0x36a   : > { %4586 = vst.msk [vmem:[%s5953_s29 + $0x178] sm:$0xf] %vm1200_vm0, %v1423_v18 }
 0x36b   : > { %v1296_v1 = vpop.permute.xlu1 %1295  ;;  %2340 = vrot.lane.b32.xlu0 %v6731_v28, %s5730_s17 }
 0x36c   : > { %4555 = vst.msk [vmem:[%s5953_s29 + $0xfc] sm:$0xf] %vm1200_vm0, %v1296_v1 }
 0x36d   : > { %2342 = vrot.lane.b32.xlu1 %v6746_v54, %s5730_s17  ;;  %v1552_v7 = vpop.permute.xlu0 %1551 }
 0x36e   : > { %4618 = vst.msk [vmem:[%s5953_s29 + $0x1f8] sm:$0xf] %vm1200_vm0, %v1552_v7 }
 0x36f   : > { %v1425_v13 = vpop.permute.xlu1 %1424  ;;  %2409 = vrot.lane.b32.xlu0 %v5965_v48, %s5731_s10 }
 0x370   : > { %4587 = vst.msk [vmem:[%s5953_s29 + $0x17c] sm:$0xf] %vm1200_vm0, %v1425_v13  ;;  %v5599_v13 = vld [vmem:[%s5900_s8 + $0x18] sm:$0xff]  }
 0x371   : > { %2411 = vrot.lane.b32.xlu1 %v5978_v51, %s5731_s10  ;;  %v1681_v14 = vpop.permute.xlu0 %1680  ;;  %5455 = vmatmul.mubr.bf16.gmra.mrb[4].mxu1 %v5599_v13 }
 0x372   : > { %4650 = vst.msk [vmem:[%s5953_s29 + $0x278] sm:$0xf] %vm1200_vm0, %v1681_v14  ;;  %v5600_v14 = vld [vmem:[%s5900_s8 + $0x20] sm:$0xff]  }
 0x373   : > { %v1554_v19 = vpop.permute.xlu1 %1553  ;;  %2413 = vrot.lane.b32.xlu0 %v5997_v60, %s5731_s10  ;;  %5458 = vmatprep.mubr.bf16.mxu1 %v5600_v14  ;;  %v5609_v14 = vld [vmem:[%s5900_s8 + $0x68] sm:$0xff]  }
 0x374   : > { %4619 = vst.msk [vmem:[%s5953_s29 + $0x1fc] sm:$0xf] %vm1200_vm0, %v1554_v19 }
 0x375   : > { %2415 = vrot.lane.b32.xlu1 %v6010_v63, %s5731_s10  ;;  %v1810_v22 = vpop.permute.xlu0 %1809 }
 0x376   : > { %4682 = vst.msk [vmem:[%s5953_s29 + $0x2f8] sm:$0xf] %vm1200_vm0, %v1810_v22 }
 0x377   : > { %v1683_v40 = vpop.permute.xlu1 %1682  ;;  %2417 = vrot.lane.b32.xlu0 %v6030_v9, %s5731_s10 }
 0x378   : > { %4651 = vst.msk [vmem:[%s5953_s29 + $0x27c] sm:$0xf] %vm1200_vm0, %v1683_v40 }
 0x379   : > { %2419 = vrot.lane.b32.xlu1 %v6043_v12, %s5731_s10  ;;  %v1939_v38 = vpop.permute.xlu0 %1938 }
 0x37a   : > { %4714 = vst.msk [vmem:[%s5953_s29 + $0x378] sm:$0xf] %vm1200_vm0, %v1939_v38  ;;  %v5601_v38 = vld [vmem:[%s5900_s8 + $0x28] sm:$0xff]  }
 0x37b   : > { %v1812_v39 = vpop.permute.xlu1 %1811  ;;  %2421 = vrot.lane.b32.xlu0 %v6062_v21, %s5731_s10  ;;  %5459 = vmatmul.mubr.bf16.gmra.mrb[8].mxu1 %v5601_v38 }
 0x37c   : > { %4683 = vst.msk [vmem:[%s5953_s29 + $0x2fc] sm:$0xf] %vm1200_vm0, %v1812_v39  ;;  %5462 = vmatprep.mubr.bf16.mxu1 %v5602_v57  ;;  %v5611_v57 = vld [vmem:[%s5900_s8 + $0x78] sm:$0xff]  }
 0x37d   : > { %2423 = vrot.lane.b32.xlu1 %v6075_v24, %s5731_s10  ;;  %v2036_v5 = vpop.permute.xlu0 %2035 }
 0x37e   : > { %4730 = vst.msk [vmem:[%s5953_s29 + $0x3b8] sm:$0xf] %vm1200_vm0, %v2036_v5 }
 0x37f   : > { %v1941_v0 = vpop.permute.xlu1 %1940  ;;  %2425 = vrot.lane.b32.xlu0 %v6094_v36, %s5731_s10 }
 0x380   : > { %4715 = vst.msk [vmem:[%s5953_s29 + $0x37c] sm:$0xf] %vm1200_vm0, %v1941_v0 }
 0x381   : > { %2427 = vrot.lane.b32.xlu1 %v6107_v41, %s5731_s10  ;;  %v2040_v44 = vpop.permute.xlu0 %2039 }
 0x382   : > { %4732 = vst.msk [vmem:[%s5953_s29 + $0x3c0] sm:$0xf] %vm1200_vm0, %v2040_v44 }
 0x383   : > { %v2042_v23 = vpop.permute.xlu1 %2041  ;;  %2429 = vrot.lane.b32.xlu0 %v6126_v52, %s5731_s10  ;;  %5463 = vmatmul.mubr.bf16.gmra.mrb[12].mxu1 %v5603_v58 }
 0x384   : > { %4733 = vst.msk [vmem:[%s5953_s29 + $0x3c4] sm:$0xf] %vm1200_vm0, %v2042_v23  ;;  %v5604_v23 = vld [vmem:[%s5900_s8 + $0x40] sm:$0xff]  }
 0x385   : > { %2431 = vrot.lane.b32.xlu1 %v6140_v56, %s5731_s10  ;;  %v2044_v11 = vpop.permute.xlu0 %2043  ;;  %5466 = vmatprep.mubr.bf16.mxu1 %v5604_v23 }
 0x386   : > { %4734 = vst.msk [vmem:[%s5953_s29 + $0x3c8] sm:$0xf] %vm1200_vm0, %v2044_v11 }
 0x387   : > { %v2046_v53 = vpop.permute.xlu1 %2045  ;;  %2433 = vrot.lane.b32.xlu0 %v6159_v6, %s5731_s10 }
 0x388   : > { %4735 = vst.msk [vmem:[%s5953_s29 + $0x3cc] sm:$0xf] %vm1200_vm0, %v2046_v53 }
 0x389   : > { %2435 = vrot.lane.b32.xlu1 %v6172_v10, %s5731_s10  ;;  %v2048_v27 = vpop.permute.xlu0 %2047 }
 0x38a   : > { %4736 = vst.msk [vmem:[%s5953_s29 + $0x3d0] sm:$0xf] %vm1200_vm0, %v2048_v27 }
 0x38b   : > { %v2050_v17 = vpop.permute.xlu1 %2049  ;;  %2437 = vrot.lane.b32.xlu0 %v6204_v20, %s5731_s10 }
 0x38c   : > { %4737 = vst.msk [vmem:[%s5953_s29 + $0x3d4] sm:$0xf] %vm1200_vm0, %v2050_v17  ;;  %v5605_v17 = vld [vmem:[%s5900_s8 + $0x48] sm:$0xff]  }
 0x38d   : > { %2439 = vrot.lane.b32.xlu1 %v6214_v26, %s5731_s10  ;;  %v2052_v37 = vpop.permute.xlu0 %2051  ;;  %5467 = vmatmul.mubr.bf16.gmra.mrb[16].mxu1 %v5605_v17 }
 0x38e   : > { %4738 = vst.msk [vmem:[%s5953_s29 + $0x3d8] sm:$0xf] %vm1200_vm0, %v2052_v37  ;;  %v5606_v37 = vld [vmem:[%s5900_s8 + $0x50] sm:$0xff]  }
 0x38f   : > { %v2054_v16 = vpop.permute.xlu1 %2053  ;;  %2441 = vrot.lane.b32.xlu0 %v6249_v42, %s5731_s10  ;;  %5470 = vmatprep.mubr.bf16.mxu1 %v5606_v37 }
 0x390   : > { %4739 = vst.msk [vmem:[%s5953_s29 + $0x3dc] sm:$0xf] %vm1200_vm0, %v2054_v16 }
 0x391   : > { %2443 = vrot.lane.b32.xlu1 %v6262_v45, %s5731_s10  ;;  %v2056_v59 = vpop.permute.xlu0 %2055 }
 0x392   : > { %4740 = vst.msk [vmem:[%s5953_s29 + $0x3e0] sm:$0xf] %vm1200_vm0, %v2056_v59 }
 0x393   : > { %v2058_v46 = vpop.permute.xlu1 %2057  ;;  %2445 = vrot.lane.b32.xlu0 %v6297_v61, %s5731_s10 }
 0x394   : > { %4741 = vst.msk [vmem:[%s5953_s29 + $0x3e4] sm:$0xf] %vm1200_vm0, %v2058_v46 }
 0x395   : > { %2447 = vrot.lane.b32.xlu1 %v6310_v3, %s5731_s10  ;;  %v2060_v18 = vpop.permute.xlu0 %2059  ;;  %5471 = vmatmul.mubr.bf16.gmra.mrb[20].mxu1 %v5607_v15 }
 0x396   : > { %4742 = vst.msk [vmem:[%s5953_s29 + $0x3e8] sm:$0xf] %vm1200_vm0, %v2060_v18  ;;  %v5608_v18 = vld [vmem:[%s5900_s8 + $0x60] sm:$0xff]  }
 0x397   : > { %v2062_v25 = vpop.permute.xlu1 %2061  ;;  %2449 = vrot.lane.b32.xlu0 %v6367_v49, %s5731_s10  ;;  %5474 = vmatprep.mubr.bf16.mxu1 %v5608_v18 }
 0x398   : > { %4743 = vst.msk [vmem:[%s5953_s29 + $0x3ec] sm:$0xf] %vm1200_vm0, %v2062_v25 }
 0x399   : > { %2451 = vrot.lane.b32.xlu1 %v6382_v31, %s5731_s10  ;;  %v2064_v1 = vpop.permute.xlu0 %2063 }
 0x39a   : > { %4744 = vst.msk [vmem:[%s5953_s29 + $0x3f0] sm:$0xf] %vm1200_vm0, %v2064_v1 }
 0x39b   : > { %v2066_v7 = vpop.permute.xlu1 %2065  ;;  %2453 = vrot.lane.b32.xlu0 %v6439_v35, %s5731_s10 }
 0x39c   : > { %4745 = vst.msk [vmem:[%s5953_s29 + $0x3f4] sm:$0xf] %vm1200_vm0, %v2066_v7 }
 0x39d   : > { %2455 = vrot.lane.b32.xlu1 %v6454_v50, %s5731_s10  ;;  %v2068_v62 = vpop.permute.xlu0 %2067  ;;  %5475 = vmatmul.mubr.bf16.gmra.mrb[24].mxu1 %v5609_v14 }
 0x39e   : > { %4746 = vst.msk [vmem:[%s5953_s29 + $0x3f8] sm:$0xf] %vm1200_vm0, %v2068_v62  ;;  %v5610_v62 = vld [vmem:[%s5900_s8 + $0x70] sm:$0xff]   ;;  %s7790_s8 = scalar_lea.vmem %s9275_s5, %s5946_s27 }
 0x39f   : > { %v2070_v19 = vpop.permute.xlu1 %2069  ;;  %2457 = vrot.lane.b32.xlu0 %v6511_v29, %s5731_s10  ;;  %5478 = vmatprep.mubr.bf16.mxu1 %v5610_v62 }
 0x3a0   : > { %4747 = vst.msk [vmem:[%s5953_s29 + $0x3fc] sm:$0xf] %vm1200_vm0, %v2070_v19 }
 0x3a1   : > { %2459 = vrot.lane.b32.xlu1 %v6526_v55, %s5731_s10  ;;  %v2281_v22 = vpop.permute.xlu0 %2280 }
 0x3a2   : > { %4780 = vst.msk [vmem:[%s5962_s14 + $0x80] sm:$0xf] %vm1200_vm0, %v2281_v22 }
 0x3a3   : > { %v2283_v40 = vpop.permute.xlu1 %2282  ;;  %2461 = vrot.lane.b32.xlu0 %v6583_v34, %s5731_s10 }
 0x3a4   : > { %4781 = vst.msk [vmem:[%s5962_s14 + $0x84] sm:$0xf] %vm1200_vm0, %v2283_v40 }
 0x3a5   : > { %2463 = vrot.lane.b32.xlu1 %v6598_v47, %s5731_s10  ;;  %v2285_v39 = vpop.permute.xlu0 %2284  ;;  %5479 = vmatmul.mubr.bf16.gmra.mrb[28].mxu1 %v5611_v57 }
 0x3a6   : > { %4782 = vst.msk [vmem:[%s5962_s14 + $0x88] sm:$0xf] %vm1200_vm0, %v2285_v39 }
 0x3a7   : > { %v2287_v5 = vpop.permute.xlu1 %2286  ;;  %2465 = vrot.lane.b32.xlu0 %v6655_v2, %s5731_s10 }
 0x3a8   : > { %4783 = vst.msk [vmem:[%s5962_s14 + $0x8c] sm:$0xf] %vm1200_vm0, %v2287_v5 }
 0x3a9   : > { %2467 = vrot.lane.b32.xlu1 %v6670_v4, %s5731_s10  ;;  %v2289_v0 = vpop.permute.xlu0 %2288 }
 0x3aa   : > { %4784 = vst.msk [vmem:[%s5962_s14 + $0x90] sm:$0xf] %vm1200_vm0, %v2289_v0 }
 0x3ab   : > { %v2291_v44 = vpop.permute.xlu1 %2290  ;;  %2469 = vrot.lane.b32.xlu0 %v6731_v28, %s5731_s10 }
 0x3ac   : > { %4785 = vst.msk [vmem:[%s5962_s14 + $0x94] sm:$0xf] %vm1200_vm0, %v2291_v44 }
 0x3ad   : > { %2471 = vrot.lane.b32.xlu1 %v6746_v54, %s5731_s10  ;;  %v2293_v11 = vpop.permute.xlu0 %2292 }
 0x3ae   : > { %4786 = vst.msk [vmem:[%s5962_s14 + $0x98] sm:$0xf] %vm1200_vm0, %v2293_v11 }
 0x3af   : > { %v2295_v53 = vpop.permute.xlu1 %2294  ;;  %2538 = vrot.lane.b32.xlu0 %v5965_v48, %s5732_s7 }
 0x3b0   : > { %4787 = vst.msk [vmem:[%s5962_s14 + $0x9c] sm:$0xf] %vm1200_vm0, %v2295_v53 }
 0x3b1   : > { %2540 = vrot.lane.b32.xlu1 %v5978_v51, %s5732_s7  ;;  %v2297_v27 = vpop.permute.xlu0 %2296 }
 0x3b2   : > { %4788 = vst.msk [vmem:[%s5962_s14 + $0xa0] sm:$0xf] %vm1200_vm0, %v2297_v27 }
 0x3b3   : > { %v2299_v43 = vpop.permute.xlu1 %2298  ;;  %2542 = vrot.lane.b32.xlu0 %v5997_v60, %s5732_s7 }
 0x3b4   : > { %4789 = vst.msk [vmem:[%s5962_s14 + $0xa4] sm:$0xf] %vm1200_vm0, %v2299_v43 }
 0x3b5   : > { %2544 = vrot.lane.b32.xlu1 %v6010_v63, %s5732_s7  ;;  %v2301_v16 = vpop.permute.xlu0 %2300 }
 0x3b6   : > { %4790 = vst.msk [vmem:[%s5962_s14 + $0xa8] sm:$0xf] %vm1200_vm0, %v2301_v16 }
 0x3b7   : > { %v2303_v59 = vpop.permute.xlu1 %2302  ;;  %2546 = vrot.lane.b32.xlu0 %v6030_v9, %s5732_s7 }
 0x3b8   : > { %4791 = vst.msk [vmem:[%s5962_s14 + $0xac] sm:$0xf] %vm1200_vm0, %v2303_v59 }
 0x3b9   : > { %2548 = vrot.lane.b32.xlu1 %v6043_v12, %s5732_s7  ;;  %v2305_v46 = vpop.permute.xlu0 %2304 }
 0x3ba   : > { %4792 = vst.msk [vmem:[%s5962_s14 + $0xb0] sm:$0xf] %vm1200_vm0, %v2305_v46 }
 0x3bb   : > { %v2307_v8 = vpop.permute.xlu1 %2306  ;;  %2550 = vrot.lane.b32.xlu0 %v6062_v21, %s5732_s7 }
 0x3bc   : > { %4793 = vst.msk [vmem:[%s5962_s14 + $0xb4] sm:$0xf] %vm1200_vm0, %v2307_v8 }
 0x3bd   : > { %2552 = vrot.lane.b32.xlu1 %v6075_v24, %s5732_s7  ;;  %v2309_v25 = vpop.permute.xlu0 %2308 }
 0x3be   : > { %4794 = vst.msk [vmem:[%s5962_s14 + $0xb8] sm:$0xf] %vm1200_vm0, %v2309_v25 }
 0x3bf   : > { %v2311_v1 = vpop.permute.xlu1 %2310  ;;  %2554 = vrot.lane.b32.xlu0 %v6094_v36, %s5732_s7 }
 0x3c0   : > { %4795 = vst.msk [vmem:[%s5962_s14 + $0xbc] sm:$0xf] %vm1200_vm0, %v2311_v1 }
 0x3c1   : > { %2556 = vrot.lane.b32.xlu1 %v6107_v41, %s5732_s7  ;;  %v2313_v7 = vpop.permute.xlu0 %2312 }
 0x3c2   : > { %4796 = vst.msk [vmem:[%s5962_s14 + $0xc0] sm:$0xf] %vm1200_vm0, %v2313_v7 }
 0x3c3   : > { %v2315_v13 = vpop.permute.xlu1 %2314  ;;  %2558 = vrot.lane.b32.xlu0 %v6126_v52, %s5732_s7 }
 0x3c4   : > { %4797 = vst.msk [vmem:[%s5962_s14 + $0xc4] sm:$0xf] %vm1200_vm0, %v2315_v13 }
 0x3c5   : > { %2560 = vrot.lane.b32.xlu1 %v6140_v56, %s5732_s7  ;;  %v2317_v19 = vpop.permute.xlu0 %2316 }
 0x3c6   : > { %4798 = vst.msk [vmem:[%s5962_s14 + $0xc8] sm:$0xf] %vm1200_vm0, %v2317_v19 }
 0x3c7   : > { %v2319_v22 = vpop.permute.xlu1 %2318  ;;  %2562 = vrot.lane.b32.xlu0 %v6159_v6, %s5732_s7 }
 0x3c8   : > { %4799 = vst.msk [vmem:[%s5962_s14 + $0xcc] sm:$0xf] %vm1200_vm0, %v2319_v22 }
 0x3c9   : > { %2564 = vrot.lane.b32.xlu1 %v6172_v10, %s5732_s7  ;;  %v2321_v40 = vpop.permute.xlu0 %2320 }
 0x3ca   : > { %4800 = vst.msk [vmem:[%s5962_s14 + $0xd0] sm:$0xf] %vm1200_vm0, %v2321_v40 }
 0x3cb   : > { %v2323_v38 = vpop.permute.xlu1 %2322  ;;  %2566 = vrot.lane.b32.xlu0 %v6204_v20, %s5732_s7 }
 0x3cc   : > { %4801 = vst.msk [vmem:[%s5962_s14 + $0xd4] sm:$0xf] %vm1200_vm0, %v2323_v38 }
 0x3cd   : > { %2568 = vrot.lane.b32.xlu1 %v6214_v26, %s5732_s7  ;;  %v2325_v39 = vpop.permute.xlu0 %2324 }
 0x3ce   : > { %4802 = vst.msk [vmem:[%s5962_s14 + $0xd8] sm:$0xf] %vm1200_vm0, %v2325_v39 }
 0x3cf   : > { %v2327_v5 = vpop.permute.xlu1 %2326  ;;  %2570 = vrot.lane.b32.xlu0 %v6249_v42, %s5732_s7 }
 0x3d0   : > { %4803 = vst.msk [vmem:[%s5962_s14 + $0xdc] sm:$0xf] %vm1200_vm0, %v2327_v5 }
 0x3d1   : > { %2572 = vrot.lane.b32.xlu1 %v6262_v45, %s5732_s7  ;;  %v2329_v0 = vpop.permute.xlu0 %2328 }
 0x3d2   : > { %4804 = vst.msk [vmem:[%s5962_s14 + $0xe0] sm:$0xf] %vm1200_vm0, %v2329_v0 }
 0x3d3   : > { %v2331_v44 = vpop.permute.xlu1 %2330  ;;  %2574 = vrot.lane.b32.xlu0 %v6297_v61, %s5732_s7 }
 0x3d4   : > { %4805 = vst.msk [vmem:[%s5962_s14 + $0xe4] sm:$0xf] %vm1200_vm0, %v2331_v44 }
 0x3d5   : > { %2576 = vrot.lane.b32.xlu1 %v6310_v3, %s5732_s7  ;;  %v2333_v58 = vpop.permute.xlu0 %2332 }
 0x3d6   : > { %4806 = vst.msk [vmem:[%s5962_s14 + $0xe8] sm:$0xf] %vm1200_vm0, %v2333_v58 }
 0x3d7   : > { %v2335_v23 = vpop.permute.xlu1 %2334  ;;  %2578 = vrot.lane.b32.xlu0 %v6367_v49, %s5732_s7 }
 0x3d8   : > { %4807 = vst.msk [vmem:[%s5962_s14 + $0xec] sm:$0xf] %vm1200_vm0, %v2335_v23 }
 0x3d9   : > { %2580 = vrot.lane.b32.xlu1 %v6382_v31, %s5732_s7  ;;  %v2337_v11 = vpop.permute.xlu0 %2336 }
 0x3da   : > { %4808 = vst.msk [vmem:[%s5962_s14 + $0xf0] sm:$0xf] %vm1200_vm0, %v2337_v11 }
 0x3db   : > { %v2339_v53 = vpop.permute.xlu1 %2338  ;;  %2582 = vrot.lane.b32.xlu0 %v6439_v35, %s5732_s7 }
 0x3dc   : > { %4809 = vst.msk [vmem:[%s5962_s14 + $0xf4] sm:$0xf] %vm1200_vm0, %v2339_v53 }
 0x3dd   : > { %2584 = vrot.lane.b32.xlu1 %v6454_v50, %s5732_s7  ;;  %v2341_v27 = vpop.permute.xlu0 %2340 }
 0x3de   : > { %4810 = vst.msk [vmem:[%s5962_s14 + $0xf8] sm:$0xf] %vm1200_vm0, %v2341_v27 }
 0x3df   : > { %v2343_v43 = vpop.permute.xlu1 %2342  ;;  %2586 = vrot.lane.b32.xlu0 %v6511_v29, %s5732_s7 }
 0x3e0   : > { %4811 = vst.msk [vmem:[%s5962_s14 + $0xfc] sm:$0xf] %vm1200_vm0, %v2343_v43 }
 0x3e1   : > { %2588 = vrot.lane.b32.xlu1 %v6526_v55, %s5732_s7  ;;  %v2410_v17 = vpop.permute.xlu0 %2409 }
 0x3e2   : > { %4812 = vst.msk [vmem:[%s5962_s14 + $0x100] sm:$0xf] %vm1200_vm0, %v2410_v17 }
 0x3e3   : > { %v2412_v37 = vpop.permute.xlu1 %2411  ;;  %2590 = vrot.lane.b32.xlu0 %v6583_v34, %s5732_s7 }
 0x3e4   : > { %4813 = vst.msk [vmem:[%s5962_s14 + $0x104] sm:$0xf] %vm1200_vm0, %v2412_v37 }
 0x3e5   : > { %2592 = vrot.lane.b32.xlu1 %v6598_v47, %s5732_s7  ;;  %v2414_v16 = vpop.permute.xlu0 %2413 }
 0x3e6   : > { %4814 = vst.msk [vmem:[%s5962_s14 + $0x108] sm:$0xf] %vm1200_vm0, %v2414_v16 }
 0x3e7   : > { %v2416_v59 = vpop.permute.xlu1 %2415  ;;  %2594 = vrot.lane.b32.xlu0 %v6655_v2, %s5732_s7 }
 0x3e8   : > { %4815 = vst.msk [vmem:[%s5962_s14 + $0x10c] sm:$0xf] %vm1200_vm0, %v2416_v59 }
 0x3e9   : > { %2596 = vrot.lane.b32.xlu1 %v6670_v4, %s5732_s7  ;;  %v2418_v46 = vpop.permute.xlu0 %2417 }
 0x3ea   : > { %4816 = vst.msk [vmem:[%s5962_s14 + $0x110] sm:$0xf] %vm1200_vm0, %v2418_v46 }
 0x3eb   : > { %v2420_v8 = vpop.permute.xlu1 %2419  ;;  %2598 = vrot.lane.b32.xlu0 %v6731_v28, %s5732_s7 }
 0x3ec   : > { %4817 = vst.msk [vmem:[%s5962_s14 + $0x114] sm:$0xf] %vm1200_vm0, %v2420_v8 }
 0x3ed   : > { %2600 = vrot.lane.b32.xlu1 %v6746_v54, %s5732_s7  ;;  %v2422_v15 = vpop.permute.xlu0 %2421 }
 0x3ee   : > { %4818 = vst.msk [vmem:[%s5962_s14 + $0x118] sm:$0xf] %vm1200_vm0, %v2422_v15 }
 0x3ef   : > { %v2424_v18 = vpop.permute.xlu1 %2423  ;;  %2667 = vrot.lane.b32.xlu0 %v5965_v48, %s5733_s11 }
 0x3f0   : > { %4819 = vst.msk [vmem:[%s5962_s14 + $0x11c] sm:$0xf] %vm1200_vm0, %v2424_v18 }
 0x3f1   : > { %2669 = vrot.lane.b32.xlu1 %v5978_v51, %s5733_s11  ;;  %v2426_v25 = vpop.permute.xlu0 %2425 }
 0x3f2   : > { %4820 = vst.msk [vmem:[%s5962_s14 + $0x120] sm:$0xf] %vm1200_vm0, %v2426_v25 }
 0x3f3   : > { %v2428_v1 = vpop.permute.xlu1 %2427  ;;  %2671 = vrot.lane.b32.xlu0 %v5997_v60, %s5733_s11 }
 0x3f4   : > { %4821 = vst.msk [vmem:[%s5962_s14 + $0x124] sm:$0xf] %vm1200_vm0, %v2428_v1 }
 0x3f5   : > { %2673 = vrot.lane.b32.xlu1 %v6010_v63, %s5733_s11  ;;  %v2430_v7 = vpop.permute.xlu0 %2429 }
 0x3f6   : > { %4822 = vst.msk [vmem:[%s5962_s14 + $0x128] sm:$0xf] %vm1200_vm0, %v2430_v7 }
 0x3f7   : > { %v2432_v13 = vpop.permute.xlu1 %2431  ;;  %2675 = vrot.lane.b32.xlu0 %v6030_v9, %s5733_s11 }
 0x3f8   : > { %4823 = vst.msk [vmem:[%s5962_s14 + $0x12c] sm:$0xf] %vm1200_vm0, %v2432_v13 }
 0x3f9   : > { %2677 = vrot.lane.b32.xlu1 %v6043_v12, %s5733_s11  ;;  %v2434_v14 = vpop.permute.xlu0 %2433 }
 0x3fa   : > { %4824 = vst.msk [vmem:[%s5962_s14 + $0x130] sm:$0xf] %vm1200_vm0, %v2434_v14 }
 0x3fb   : > { %v2436_v62 = vpop.permute.xlu1 %2435  ;;  %2679 = vrot.lane.b32.xlu0 %v6062_v21, %s5733_s11 }
 0x3fc   : > { %4825 = vst.msk [vmem:[%s5962_s14 + $0x134] sm:$0xf] %vm1200_vm0, %v2436_v62 }
 0x3fd   : > { %2681 = vrot.lane.b32.xlu1 %v6075_v24, %s5733_s11  ;;  %v2438_v19 = vpop.permute.xlu0 %2437 }
 0x3fe   : > { %4826 = vst.msk [vmem:[%s5962_s14 + $0x138] sm:$0xf] %vm1200_vm0, %v2438_v19 }
 0x3ff   : > { %v2440_v22 = vpop.permute.xlu1 %2439  ;;  %2683 = vrot.lane.b32.xlu0 %v6094_v36, %s5733_s11 }
 0x400   : > { %4827 = vst.msk [vmem:[%s5962_s14 + $0x13c] sm:$0xf] %vm1200_vm0, %v2440_v22 }
 0x401   : > { %2685 = vrot.lane.b32.xlu1 %v6107_v41, %s5733_s11  ;;  %v2442_v40 = vpop.permute.xlu0 %2441 }
 0x402   : > { %4828 = vst.msk [vmem:[%s5962_s14 + $0x140] sm:$0xf] %vm1200_vm0, %v2442_v40 }
 0x403   : > { %v2444_v38 = vpop.permute.xlu1 %2443  ;;  %2687 = vrot.lane.b32.xlu0 %v6126_v52, %s5733_s11 }
 0x404   : > { %4829 = vst.msk [vmem:[%s5962_s14 + $0x144] sm:$0xf] %vm1200_vm0, %v2444_v38 }
 0x405   : > { %2689 = vrot.lane.b32.xlu1 %v6140_v56, %s5733_s11  ;;  %v2446_v57 = vpop.permute.xlu0 %2445 }
 0x406   : > { %4830 = vst.msk [vmem:[%s5962_s14 + $0x148] sm:$0xf] %vm1200_vm0, %v2446_v57 }
 0x407   : > { %v2448_v39 = vpop.permute.xlu1 %2447  ;;  %2691 = vrot.lane.b32.xlu0 %v6159_v6, %s5733_s11 }
 0x408   : > { %4831 = vst.msk [vmem:[%s5962_s14 + $0x14c] sm:$0xf] %vm1200_vm0, %v2448_v39 }
 0x409   : > { %2693 = vrot.lane.b32.xlu1 %v6172_v10, %s5733_s11  ;;  %v2450_v5 = vpop.permute.xlu0 %2449 }
 0x40a   : > { %4832 = vst.msk [vmem:[%s5962_s14 + $0x150] sm:$0xf] %vm1200_vm0, %v2450_v5 }
 0x40b   : > { %v2452_v0 = vpop.permute.xlu1 %2451  ;;  %2695 = vrot.lane.b32.xlu0 %v6204_v20, %s5733_s11 }
 0x40c   : > { %4833 = vst.msk [vmem:[%s5962_s14 + $0x154] sm:$0xf] %vm1200_vm0, %v2452_v0 }
 0x40d   : > { %2697 = vrot.lane.b32.xlu1 %v6214_v26, %s5733_s11  ;;  %v2454_v44 = vpop.permute.xlu0 %2453 }
 0x40e   : > { %4834 = vst.msk [vmem:[%s5962_s14 + $0x158] sm:$0xf] %vm1200_vm0, %v2454_v44 }
 0x40f   : > { %v2456_v58 = vpop.permute.xlu1 %2455  ;;  %2699 = vrot.lane.b32.xlu0 %v6249_v42, %s5733_s11 }
 0x410   : > { %4835 = vst.msk [vmem:[%s5962_s14 + $0x15c] sm:$0xf] %vm1200_vm0, %v2456_v58 }
 0x411   : > { %2701 = vrot.lane.b32.xlu1 %v6262_v45, %s5733_s11  ;;  %v2458_v23 = vpop.permute.xlu0 %2457 }
 0x412   : > { %4836 = vst.msk [vmem:[%s5962_s14 + $0x160] sm:$0xf] %vm1200_vm0, %v2458_v23 }
 0x413   : > { %v2460_v11 = vpop.permute.xlu1 %2459  ;;  %2703 = vrot.lane.b32.xlu0 %v6297_v61, %s5733_s11 }
 0x414   : > { %4837 = vst.msk [vmem:[%s5962_s14 + $0x164] sm:$0xf] %vm1200_vm0, %v2460_v11 }
 0x415   : > { %2705 = vrot.lane.b32.xlu1 %v6310_v3, %s5733_s11  ;;  %v2462_v53 = vpop.permute.xlu0 %2461 }
 0x416   : > { %4838 = vst.msk [vmem:[%s5962_s14 + $0x168] sm:$0xf] %vm1200_vm0, %v2462_v53 }
 0x417   : > { %v2464_v27 = vpop.permute.xlu1 %2463  ;;  %2707 = vrot.lane.b32.xlu0 %v6367_v49, %s5733_s11 }
 0x418   : > { %4839 = vst.msk [vmem:[%s5962_s14 + $0x16c] sm:$0xf] %vm1200_vm0, %v2464_v27 }
 0x419   : > { %2709 = vrot.lane.b32.xlu1 %v6382_v31, %s5733_s11  ;;  %v2466_v43 = vpop.permute.xlu0 %2465 }
 0x41a   : > { %4840 = vst.msk [vmem:[%s5962_s14 + $0x170] sm:$0xf] %vm1200_vm0, %v2466_v43 }
 0x41b   : > { %v2468_v17 = vpop.permute.xlu1 %2467  ;;  %2711 = vrot.lane.b32.xlu0 %v6439_v35, %s5733_s11 }
 0x41c   : > { %4841 = vst.msk [vmem:[%s5962_s14 + $0x174] sm:$0xf] %vm1200_vm0, %v2468_v17 }
 0x41d   : > { %2713 = vrot.lane.b32.xlu1 %v6454_v50, %s5733_s11  ;;  %v2470_v37 = vpop.permute.xlu0 %2469 }
 0x41e   : > { %4842 = vst.msk [vmem:[%s5962_s14 + $0x178] sm:$0xf] %vm1200_vm0, %v2470_v37 }
 0x41f   : > { %v2472_v16 = vpop.permute.xlu1 %2471  ;;  %2715 = vrot.lane.b32.xlu0 %v6511_v29, %s5733_s11 }
 0x420   : > { %4843 = vst.msk [vmem:[%s5962_s14 + $0x17c] sm:$0xf] %vm1200_vm0, %v2472_v16 }
 0x421   : > { %2717 = vrot.lane.b32.xlu1 %v6526_v55, %s5733_s11  ;;  %v2539_v59 = vpop.permute.xlu0 %2538 }
 0x422   : > { %4844 = vst.msk [vmem:[%s5962_s14 + $0x180] sm:$0xf] %vm1200_vm0, %v2539_v59 }
 0x423   : > { %v2541_v46 = vpop.permute.xlu1 %2540  ;;  %2719 = vrot.lane.b32.xlu0 %v6583_v34, %s5733_s11 }
 0x424   : > { %4845 = vst.msk [vmem:[%s5962_s14 + $0x184] sm:$0xf] %vm1200_vm0, %v2541_v46 }
 0x425   : > { %2721 = vrot.lane.b32.xlu1 %v6598_v47, %s5733_s11  ;;  %v2543_v8 = vpop.permute.xlu0 %2542 }
 0x426   : > { %4846 = vst.msk [vmem:[%s5962_s14 + $0x188] sm:$0xf] %vm1200_vm0, %v2543_v8 }
 0x427   : > { %v2545_v15 = vpop.permute.xlu1 %2544  ;;  %2723 = vrot.lane.b32.xlu0 %v6655_v2, %s5733_s11 }
 0x428   : > { %4847 = vst.msk [vmem:[%s5962_s14 + $0x18c] sm:$0xf] %vm1200_vm0, %v2545_v15 }
 0x429   : > { %2725 = vrot.lane.b32.xlu1 %v6670_v4, %s5733_s11  ;;  %v2547_v18 = vpop.permute.xlu0 %2546 }
 0x42a   : > { %4848 = vst.msk [vmem:[%s5962_s14 + $0x190] sm:$0xf] %vm1200_vm0, %v2547_v18 }
 0x42b   : > { %v2549_v25 = vpop.permute.xlu1 %2548  ;;  %2727 = vrot.lane.b32.xlu0 %v6731_v28, %s5733_s11 }
 0x42c   : > { %4849 = vst.msk [vmem:[%s5962_s14 + $0x194] sm:$0xf] %vm1200_vm0, %v2549_v25  ;;  %v429_v25 = vsub.s32 4, %v5923_v30 }
 0x42d   : > { %2729 = vrot.lane.b32.xlu1 %v6746_v54, %s5733_s11  ;;  %v2551_v1 = vpop.permute.xlu0 %2550 }
 0x42e   : > { %4850 = vst.msk [vmem:[%s5962_s14 + $0x198] sm:$0xf] %vm1200_vm0, %v2551_v1 }
 0x42f   : > { %v2553_v7 = vpop.permute.xlu1 %2552  ;;  %2796 = vrot.lane.b32.xlu0 %v5965_v48, %s5734_s12 }
 0x430   : > { %4851 = vst.msk [vmem:[%s5962_s14 + $0x19c] sm:$0xf] %vm1200_vm0, %v2553_v7  ;;  %v430_v7 = vrot.slane %v5928_v32, %v429_v25 }
 0x431   : > { %2798 = vrot.lane.b32.xlu1 %v5978_v51, %s5734_s12  ;;  %v2555_v13 = vpop.permute.xlu0 %2554 }
 0x432   : > { %4852 = vst.msk [vmem:[%s5962_s14 + $0x1a0] sm:$0xf] %vm1200_vm0, %v2555_v13  ;;  %v7774_v30 = vrot.slane %v430_v7, %v5931_v33 }
 0x433   : > { %v2557_v14 = vpop.permute.xlu1 %2556  ;;  %2800 = vrot.lane.b32.xlu0 %v5997_v60, %s5734_s12 }
 0x434   : > { %4853 = vst.msk [vmem:[%s5962_s14 + $0x1a4] sm:$0xf] %vm1200_vm0, %v2557_v14 }
 0x435   : > { %2802 = vrot.lane.b32.xlu1 %v6010_v63, %s5734_s12  ;;  %v2559_v62 = vpop.permute.xlu0 %2558 }
 0x436   : > { %4854 = vst.msk [vmem:[%s5962_s14 + $0x1a8] sm:$0xf] %vm1200_vm0, %v2559_v62 }
 0x437   : > { %v2561_v19 = vpop.permute.xlu1 %2560  ;;  %2804 = vrot.lane.b32.xlu0 %v6030_v9, %s5734_s12 }
 0x438   : > { %4855 = vst.msk [vmem:[%s5962_s14 + $0x1ac] sm:$0xf] %vm1200_vm0, %v2561_v19 }
 0x439   : > { %2806 = vrot.lane.b32.xlu1 %v6043_v12, %s5734_s12  ;;  %v2563_v22 = vpop.permute.xlu0 %2562 }
 0x43a   : > { %4856 = vst.msk [vmem:[%s5962_s14 + $0x1b0] sm:$0xf] %vm1200_vm0, %v2563_v22  ;;  %v5452_v13 = vpop.f32.mrb[0].mxu1 }
 0x43b   : > { %v2565_v40 = vpop.permute.xlu1 %2564  ;;  %2808 = vrot.lane.b32.xlu0 %v6062_v21, %s5734_s12  ;;  %v913_v62 = vpop.f32.mrb[1].mxu1  ;;  %v922_v32 = vadd.f32 %v5452_v13, %v7774_v30 }
 0x43c   : > { %4857 = vst.msk [vmem:[%s5962_s14 + $0x1b4] sm:$0xf] %vm1200_vm0, %v2565_v40  ;;  %v5453_v19 = vpop.f32.mrb[2].mxu1 }
 0x43d   : > { %2810 = vrot.lane.b32.xlu1 %v6075_v24, %s5734_s12  ;;  %v2567_v38 = vpop.permute.xlu0 %2566  ;;  %v916_v40 = vpop.f32.mrb[3].mxu1  ;;  %v7794_v33 = vpack.c.bf16 %v922_v32, %v922_v32 }
 0x43e   : > { %4858 = vst.msk [vmem:[%s5962_s14 + $0x1b8] sm:$0xf] %vm1200_vm0, %v2567_v38  ;;  %v914_v38 = vadd.f32 %v913_v62, %v7774_v30 }
 0x43f   : > { %v2569_v57 = vpop.permute.xlu1 %2568  ;;  %2812 = vrot.lane.b32.xlu0 %v6094_v36, %s5734_s12  ;;  %3297 = vst.msk [vmem:[%s7790_s8 + $0x8] sm:$0xf] %vm1200_vm0, %v7794_v33 }
 0x440   : > { %4859 = vst.msk [vmem:[%s5962_s14 + $0x1bc] sm:$0xf] %vm1200_vm0, %v2569_v57  ;;  %v925_v57 = vadd.f32 %v5453_v19, %v7774_v30 }
 0x441   : > { %2814 = vrot.lane.b32.xlu1 %v6107_v41, %s5734_s12  ;;  %v2571_v39 = vpop.permute.xlu0 %2570 }
 0x442   : > { %4860 = vst.msk [vmem:[%s5962_s14 + $0x1c0] sm:$0xf] %vm1200_vm0, %v2571_v39  ;;  %v917_v39 = vadd.f32 %v916_v40, %v7774_v30 }
 0x443   : > { %v2573_v5 = vpop.permute.xlu1 %2572  ;;  %2816 = vrot.lane.b32.xlu0 %v6126_v52, %s5734_s12 }
 0x444   : > { %4861 = vst.msk [vmem:[%s5962_s14 + $0x1c4] sm:$0xf] %vm1200_vm0, %v2573_v5 }
 0x445   : > { %2818 = vrot.lane.b32.xlu1 %v6140_v56, %s5734_s12  ;;  %v2575_v0 = vpop.permute.xlu0 %2574 }
 0x446   : > { %4862 = vst.msk [vmem:[%s5962_s14 + $0x1c8] sm:$0xf] %vm1200_vm0, %v2575_v0  ;;  %v7796_v0 = vpack.c.bf16 %v914_v38, %v914_v38 }
 0x447   : > { %v2577_v44 = vpop.permute.xlu1 %2576  ;;  %2820 = vrot.lane.b32.xlu0 %v6159_v6, %s5734_s12 }
 0x448   : > { %4863 = vst.msk [vmem:[%s5962_s14 + $0x1cc] sm:$0xf] %vm1200_vm0, %v2577_v44  ;;  %v7798_v44 = vpack.c.bf16 %v925_v57, %v925_v57  ;;  %3295 = vst.msk [vmem:[%s7790_s8] sm:$0xf] %vm1200_vm0, %v7796_v0 }
 0x449   : > { %2822 = vrot.lane.b32.xlu1 %v6172_v10, %s5734_s12  ;;  %v2579_v58 = vpop.permute.xlu0 %2578 }
 0x44a   : > { %4864 = vst.msk [vmem:[%s5962_s14 + $0x1d0] sm:$0xf] %vm1200_vm0, %v2579_v58  ;;  %v7800_v58 = vpack.c.bf16 %v917_v39, %v917_v39  ;;  %3298 = vst.msk [vmem:[%s7790_s8 + $0xc] sm:$0xf] %vm1200_vm0, %v7798_v44 }
 0x44b   : > { %v2581_v23 = vpop.permute.xlu1 %2580  ;;  %2824 = vrot.lane.b32.xlu0 %v6204_v20, %s5734_s12 }
 0x44c   : > { %4865 = vst.msk [vmem:[%s5962_s14 + $0x1d4] sm:$0xf] %vm1200_vm0, %v2581_v23  ;;  %3296 = vst.msk [vmem:[%s7790_s8 + $0x4] sm:$0xf] %vm1200_vm0, %v7800_v58 }
 0x44d   : > { %2826 = vrot.lane.b32.xlu1 %v6214_v26, %s5734_s12  ;;  %v2583_v11 = vpop.permute.xlu0 %2582 }
 0x44e   : > { %4866 = vst.msk [vmem:[%s5962_s14 + $0x1d8] sm:$0xf] %vm1200_vm0, %v2583_v11  ;;  %v5456_v11 = vpop.f32.mrb[4].mxu1 }
 0x44f   : > { %v2585_v53 = vpop.permute.xlu1 %2584  ;;  %2828 = vrot.lane.b32.xlu0 %v6249_v42, %s5734_s12 }
 0x450   : > { %4867 = vst.msk [vmem:[%s5962_s14 + $0x1dc] sm:$0xf] %vm1200_vm0, %v2585_v53 }
 0x451   : > { %2830 = vrot.lane.b32.xlu1 %v6262_v45, %s5734_s12  ;;  %v2587_v27 = vpop.permute.xlu0 %2586 }
 0x452   : > { %4868 = vst.msk [vmem:[%s5962_s14 + $0x1e0] sm:$0xf] %vm1200_vm0, %v2587_v27  ;;  %v938_v27 = vadd.f32 %v5456_v11, %v7774_v30 }
 0x453   : > { %v2589_v43 = vpop.permute.xlu1 %2588  ;;  %2832 = vrot.lane.b32.xlu0 %v6297_v61, %s5734_s12 }
 0x454   : > { %4869 = vst.msk [vmem:[%s5962_s14 + $0x1e4] sm:$0xf] %vm1200_vm0, %v2589_v43  ;;  %v929_v43 = vpop.f32.mrb[5].mxu1 }
 0x455   : > { %2834 = vrot.lane.b32.xlu1 %v6310_v3, %s5734_s12  ;;  %v2591_v17 = vpop.permute.xlu0 %2590 }
 0x456   : > { %4870 = vst.msk [vmem:[%s5962_s14 + $0x1e8] sm:$0xf] %vm1200_vm0, %v2591_v17  ;;  %v930_v17 = vadd.f32 %v929_v43, %v7774_v30 }
 0x457   : > { %v2593_v37 = vpop.permute.xlu1 %2592  ;;  %2836 = vrot.lane.b32.xlu0 %v6367_v49, %s5734_s12 }
 0x458   : > { %4871 = vst.msk [vmem:[%s5962_s14 + $0x1ec] sm:$0xf] %vm1200_vm0, %v2593_v37  ;;  %v5457_v37 = vpop.f32.mrb[6].mxu1 }
 0x459   : > { %2838 = vrot.lane.b32.xlu1 %v6382_v31, %s5734_s12  ;;  %v2595_v16 = vpop.permute.xlu0 %2594 }
 0x45a   : > { %4872 = vst.msk [vmem:[%s5962_s14 + $0x1f0] sm:$0xf] %vm1200_vm0, %v2595_v16 }
 0x45b   : > { %v2597_v59 = vpop.permute.xlu1 %2596  ;;  %2840 = vrot.lane.b32.xlu0 %v6439_v35, %s5734_s12 }
 0x45c   : > { %4873 = vst.msk [vmem:[%s5962_s14 + $0x1f4] sm:$0xf] %vm1200_vm0, %v2597_v59  ;;  %v7826_v59 = vpack.c.bf16 %v938_v27, %v938_v27 }
 0x45d   : > { %2842 = vrot.lane.b32.xlu1 %v6454_v50, %s5734_s12  ;;  %v2599_v46 = vpop.permute.xlu0 %2598 }
 0x45e   : > { %4874 = vst.msk [vmem:[%s5962_s14 + $0x1f8] sm:$0xf] %vm1200_vm0, %v2599_v46  ;;  %v941_v46 = vadd.f32 %v5457_v37, %v7774_v30  ;;  %3301 = vst.msk [vmem:[%s7790_s8 + $0x18] sm:$0xf] %vm1200_vm0, %v7826_v59 }
 0x45f   : > { %v2601_v8 = vpop.permute.xlu1 %2600  ;;  %2844 = vrot.lane.b32.xlu0 %v6511_v29, %s5734_s12 }
 0x460   : > { %4875 = vst.msk [vmem:[%s5962_s14 + $0x1fc] sm:$0xf] %vm1200_vm0, %v2601_v8  ;;  %v932_v8 = vpop.f32.mrb[7].mxu1 }
 0x461   : > { %2846 = vrot.lane.b32.xlu1 %v6526_v55, %s5734_s12  ;;  %v2668_v15 = vpop.permute.xlu0 %2667 }
 0x462   : > { %4876 = vst.msk [vmem:[%s5962_s14 + $0x200] sm:$0xf] %vm1200_vm0, %v2668_v15  ;;  %v7831_v15 = vpack.c.bf16 %v930_v17, %v930_v17 }
 0x463   : > { %v2670_v18 = vpop.permute.xlu1 %2669  ;;  %2848 = vrot.lane.b32.xlu0 %v6583_v34, %s5734_s12 }
 0x464   : > { %4877 = vst.msk [vmem:[%s5962_s14 + $0x204] sm:$0xf] %vm1200_vm0, %v2670_v18  ;;  %v933_v18 = vadd.f32 %v932_v8, %v7774_v30  ;;  %3299 = vst.msk [vmem:[%s7790_s8 + $0x10] sm:$0xf] %vm1200_vm0, %v7831_v15 }
 0x465   : > { %2850 = vrot.lane.b32.xlu1 %v6598_v47, %s5734_s12  ;;  %v2672_v1 = vpop.permute.xlu0 %2671 }
 0x466   : > { %4878 = vst.msk [vmem:[%s5962_s14 + $0x208] sm:$0xf] %vm1200_vm0, %v2672_v1  ;;  %v7839_v1 = vpack.c.bf16 %v941_v46, %v941_v46  ;;  %v7846_v7 = vpack.c.bf16 %v933_v18, %v933_v18 }
 0x467   : > { %v2674_v14 = vpop.permute.xlu1 %2673  ;;  %2852 = vrot.lane.b32.xlu0 %v6655_v2, %s5734_s12 }
 0x468   : > { %4879 = vst.msk [vmem:[%s5962_s14 + $0x20c] sm:$0xf] %vm1200_vm0, %v2674_v14  ;;  %3302 = vst.msk [vmem:[%s7790_s8 + $0x1c] sm:$0xf] %vm1200_vm0, %v7839_v1  ;;  %v5460_v14 = vpop.f32.mrb[8].mxu1 }
 0x469   : > { %2854 = vrot.lane.b32.xlu1 %v6670_v4, %s5734_s12  ;;  %v2676_v22 = vpop.permute.xlu0 %2675  ;;  %3300 = vst.msk [vmem:[%s7790_s8 + $0x14] sm:$0xf] %vm1200_vm0, %v7846_v7  ;;  %v954_v19 = vadd.f32 %v5460_v14, %v7774_v30 }
 0x46a   : > { %4880 = vst.msk [vmem:[%s5962_s14 + $0x210] sm:$0xf] %vm1200_vm0, %v2676_v22  ;;  %v945_v22 = vpop.f32.mrb[9].mxu1 }
 0x46b   : > { %v2678_v5 = vpop.permute.xlu1 %2677  ;;  %2856 = vrot.lane.b32.xlu0 %v6731_v28, %s5734_s12  ;;  %v946_v40 = vadd.f32 %v945_v22, %v7774_v30  ;;  %v5461_v32 = vpop.f32.mrb[10].mxu1  ;;  %v7866_v57 = vpack.c.bf16 %v954_v19, %v954_v19 }
 0x46c   : > { %4881 = vst.msk [vmem:[%s5962_s14 + $0x214] sm:$0xf] %vm1200_vm0, %v2678_v5  ;;  %v957_v39 = vadd.f32 %v5461_v32, %v7774_v30  ;;  %v948_v5 = vpop.f32.mrb[11].mxu1 }
 0x46d   : > { %2858 = vrot.lane.b32.xlu1 %v6746_v54, %s5734_s12  ;;  %v2680_v23 = vpop.permute.xlu0 %2679  ;;  %v949_v11 = vadd.f32 %v948_v5, %v7774_v30  ;;  %3305 = vst.msk [vmem:[%s7790_s8 + $0x28] sm:$0xf] %vm1200_vm0, %v7866_v57  ;;  %v5464_v37 = vpop.f32.mrb[12].mxu1 }
 0x46e   : > { %4882 = vst.msk [vmem:[%s5962_s14 + $0x218] sm:$0xf] %vm1200_vm0, %v2680_v23  ;;  %v7871_v23 = vpack.c.bf16 %v946_v40, %v946_v40  ;;  %v7879_v27 = vpack.c.bf16 %v957_v39, %v957_v39  ;;  %v970_v46 = vadd.f32 %v5464_v37, %v7774_v30  ;;  %v961_v8 = vpop.f32.mrb[13].mxu1 }
 0x46f   : > { %v2682_v53 = vpop.permute.xlu1 %2681  ;;  %2925 = vrot.lane.b32.xlu0 %v5965_v48, %s5735_s24  ;;  %v7886_v43 = vpack.c.bf16 %v949_v11, %v949_v11  ;;  %v962_v18 = vadd.f32 %v961_v8, %v7774_v30 }
 0x470   : > { %4883 = vst.msk [vmem:[%s5962_s14 + $0x21c] sm:$0xf] %vm1200_vm0, %v2682_v53  ;;  %3303 = vst.msk [vmem:[%s7790_s8 + $0x20] sm:$0xf] %vm1200_vm0, %v7871_v23  ;;  %v7906_v14 = vpack.c.bf16 %v970_v46, %v970_v46 }
 0x471   : > { %2927 = vrot.lane.b32.xlu1 %v5978_v51, %s5735_s24  ;;  %v2684_v16 = vpop.permute.xlu0 %2683  ;;  %3306 = vst.msk [vmem:[%s7790_s8 + $0x2c] sm:$0xf] %vm1200_vm0, %v7879_v27  ;;  %3304 = vst.msk [vmem:[%s7790_s8 + $0x24] sm:$0xf] %vm1200_vm0, %v7886_v43  ;;  %v7911_v22 = vpack.c.bf16 %v962_v18, %v962_v18 }
 0x472   : > { %4884 = vst.msk [vmem:[%s5962_s14 + $0x220] sm:$0xf] %vm1200_vm0, %v2684_v16  ;;  %3309 = vst.msk [vmem:[%s7790_s8 + $0x38] sm:$0xf] %vm1200_vm0, %v7906_v14 }
 0x473   : > { %v2686_v25 = vpop.permute.xlu1 %2685  ;;  %2929 = vrot.lane.b32.xlu0 %v5997_v60, %s5735_s24  ;;  %3307 = vst.msk [vmem:[%s7790_s8 + $0x30] sm:$0xf] %vm1200_vm0, %v7911_v22 }
 0x474   : > { %4885 = vst.msk [vmem:[%s5962_s14 + $0x224] sm:$0xf] %vm1200_vm0, %v2686_v25  ;;  %v5465_v25 = vpop.f32.mrb[14].mxu1 }
 0x475   : > { %2931 = vrot.lane.b32.xlu1 %v6010_v63, %s5735_s24  ;;  %v2688_v13 = vpop.permute.xlu0 %2687  ;;  %v964_v19 = vpop.f32.mrb[15].mxu1 }
 0x476   : > { %4886 = vst.msk [vmem:[%s5962_s14 + $0x228] sm:$0xf] %vm1200_vm0, %v2688_v13  ;;  %v965_v40 = vadd.f32 %v964_v19, %v7774_v30  ;;  %v5468_v11 = vpop.f32.mrb[16].mxu1 }
 0x477   : > { %v2690_v62 = vpop.permute.xlu1 %2689  ;;  %2933 = vrot.lane.b32.xlu0 %v6030_v9, %s5735_s24  ;;  %v977_v37 = vpop.f32.mrb[17].mxu1 }
 0x478   : > { %4887 = vst.msk [vmem:[%s5962_s14 + $0x22c] sm:$0xf] %vm1200_vm0, %v2690_v62  ;;  %v973_v62 = vadd.f32 %v5465_v25, %v7774_v30  ;;  %v7926_v39 = vpack.c.bf16 %v965_v40, %v965_v40  ;;  %v5469_v46 = vpop.f32.mrb[18].mxu1 }
 0x479   : > { %2935 = vrot.lane.b32.xlu1 %v6043_v12, %s5735_s24  ;;  %v2692_v38 = vpop.permute.xlu0 %2691  ;;  %v989_v25 = vadd.f32 %v5469_v46, %v7774_v30 }
 0x47a   : > { %4888 = vst.msk [vmem:[%s5962_s14 + $0x230] sm:$0xf] %vm1200_vm0, %v2692_v38  ;;  %v7919_v38 = vpack.c.bf16 %v973_v62, %v973_v62  ;;  %3308 = vst.msk [vmem:[%s7790_s8 + $0x34] sm:$0xf] %vm1200_vm0, %v7926_v39 }
 0x47b   : > { %v2694_v53 = vpop.permute.xlu1 %2693  ;;  %2937 = vrot.lane.b32.xlu0 %v6062_v21, %s5735_s24 }
 0x47c   : > { %4889 = vst.msk [vmem:[%s5962_s14 + $0x234] sm:$0xf] %vm1200_vm0, %v2694_v53  ;;  %3310 = vst.msk [vmem:[%s7790_s8 + $0x3c] sm:$0xf] %vm1200_vm0, %v7919_v38 }
 0x47d   : > { %2939 = vrot.lane.b32.xlu1 %v6075_v24, %s5735_s24  ;;  %v2696_v17 = vpop.permute.xlu0 %2695 }
 0x47e   : > { %4890 = vst.msk [vmem:[%s5962_s14 + $0x238] sm:$0xf] %vm1200_vm0, %v2696_v17  ;;  %v986_v17 = vadd.f32 %v5468_v11, %v7774_v30 }
 0x47f   : > { %v2698_v16 = vpop.permute.xlu1 %2697  ;;  %2941 = vrot.lane.b32.xlu0 %v6094_v36, %s5735_s24 }
 0x480   : > { %4891 = vst.msk [vmem:[%s5962_s14 + $0x23c] sm:$0xf] %vm1200_vm0, %v2698_v16  ;;  %v978_v16 = vadd.f32 %v977_v37, %v7774_v30  ;;  %v7946_v18 = vpack.c.bf16 %v986_v17, %v986_v17 }
 0x481   : > { %2943 = vrot.lane.b32.xlu1 %v6107_v41, %s5735_s24  ;;  %v2700_v13 = vpop.permute.xlu0 %2699 }
 0x482   : > { %4892 = vst.msk [vmem:[%s5962_s14 + $0x240] sm:$0xf] %vm1200_vm0, %v2700_v13  ;;  %v980_v13 = vpop.f32.mrb[19].mxu1  ;;  %v7951_v62 = vpack.c.bf16 %v978_v16, %v978_v16  ;;  %3313 = vst.msk [vmem:[%s7790_s8 + $0x48] sm:$0xf] %vm1200_vm0, %v7946_v18 }
 0x483   : > { %v2702_v32 = vpop.permute.xlu1 %2701  ;;  %2945 = vrot.lane.b32.xlu0 %v6126_v52, %s5735_s24  ;;  %v981_v19 = vadd.f32 %v980_v13, %v7774_v30 }
 0x484   : > { %4893 = vst.msk [vmem:[%s5962_s14 + $0x244] sm:$0xf] %vm1200_vm0, %v2702_v32  ;;  %v7959_v32 = vpack.c.bf16 %v989_v25, %v989_v25  ;;  %3311 = vst.msk [vmem:[%s7790_s8 + $0x40] sm:$0xf] %vm1200_vm0, %v7951_v62 }
 0x485   : > { %2947 = vrot.lane.b32.xlu1 %v6140_v56, %s5735_s24  ;;  %v2704_v5 = vpop.permute.xlu0 %2703 }
 0x486   : > { %4894 = vst.msk [vmem:[%s5962_s14 + $0x248] sm:$0xf] %vm1200_vm0, %v2704_v5  ;;  %v7966_v5 = vpack.c.bf16 %v981_v19, %v981_v19  ;;  %3314 = vst.msk [vmem:[%s7790_s8 + $0x4c] sm:$0xf] %vm1200_vm0, %v7959_v32 }
 0x487   : > { %v2706_v53 = vpop.permute.xlu1 %2705  ;;  %2949 = vrot.lane.b32.xlu0 %v6159_v6, %s5735_s24 }
 0x488   : > { %4895 = vst.msk [vmem:[%s5962_s14 + $0x24c] sm:$0xf] %vm1200_vm0, %v2706_v53  ;;  %3312 = vst.msk [vmem:[%s7790_s8 + $0x44] sm:$0xf] %vm1200_vm0, %v7966_v5  ;;  %v5472_v53 = vpop.f32.mrb[20].mxu1 }
 0x489   : > { %2951 = vrot.lane.b32.xlu1 %v6172_v10, %s5735_s24  ;;  %v2708_v8 = vpop.permute.xlu0 %2707  ;;  %v1002_v37 = vadd.f32 %v5472_v53, %v7774_v30  ;;  %v993_v16 = vpop.f32.mrb[21].mxu1 }
 0x48a   : > { %4896 = vst.msk [vmem:[%s5962_s14 + $0x250] sm:$0xf] %vm1200_vm0, %v2708_v8  ;;  %v994_v46 = vadd.f32 %v993_v16, %v7774_v30  ;;  %v5473_v8 = vpop.f32.mrb[22].mxu1 }
 0x48b   : > { %v2710_v40 = vpop.permute.xlu1 %2709  ;;  %2953 = vrot.lane.b32.xlu0 %v6204_v20, %s5735_s24  ;;  %v7986_v13 = vpack.c.bf16 %v1002_v37, %v1002_v37  ;;  %v1005_v19 = vadd.f32 %v5473_v8, %v7774_v30 }
 0x48c   : > { %4897 = vst.msk [vmem:[%s5962_s14 + $0x254] sm:$0xf] %vm1200_vm0, %v2710_v40  ;;  %v996_v40 = vpop.f32.mrb[23].mxu1 }
 0x48d   : > { %2955 = vrot.lane.b32.xlu1 %v6214_v26, %s5735_s24  ;;  %v2712_v11 = vpop.permute.xlu0 %2711  ;;  %9302 = vst [vmem:[#allocation8_spill] sm:$0xff] %v7986_v13  ;;  %v997_v53 = vadd.f32 %v996_v40, %v7774_v30  ;;  %3317 = vst.msk [vmem:[%s7790_s8 + $0x58] sm:$0xf] %vm1200_vm0, %v7986_v13  ;;  %v7999_v37 = vpack.c.bf16 %v1005_v19, %v1005_v19  ;;  %v5476_v8 = vpop.f32.mrb[24].mxu1 }
 0x48e   : > { %4898 = vst.msk [vmem:[%s5962_s14 + $0x258] sm:$0xf] %vm1200_vm0, %v2712_v11  ;;  %v7991_v11 = vpack.c.bf16 %v994_v46, %v994_v46  ;;  %v1018_v19 = vadd.f32 %v5476_v8, %v7774_v30  ;;  %v1009_v40 = vpop.f32.mrb[25].mxu1 }
 0x48f   : > { %v2714_v17 = vpop.permute.xlu1 %2713  ;;  %2957 = vrot.lane.b32.xlu0 %v6249_v42, %s5735_s24  ;;  %9303 = vst [vmem:[#allocation9_spill] sm:$0xff] %v7999_v37  ;;  %v8006_v16 = vpack.c.bf16 %v997_v53, %v997_v53  ;;  %3318 = vst.msk [vmem:[%s7790_s8 + $0x5c] sm:$0xf] %vm1200_vm0, %v7999_v37  ;;  %v1010_v53 = vadd.f32 %v1009_v40, %v7774_v30 }
 0x490   : > { %4899 = vst.msk [vmem:[%s5962_s14 + $0x25c] sm:$0xf] %vm1200_vm0, %v2714_v17  ;;  %3315 = vst.msk [vmem:[%s7790_s8 + $0x50] sm:$0xf] %vm1200_vm0, %v7991_v11  ;;  %v8026_v37 = vpack.c.bf16 %v1018_v19, %v1018_v19 }
 0x491   : > { %2959 = vrot.lane.b32.xlu1 %v6262_v45, %s5735_s24  ;;  %v2716_v25 = vpop.permute.xlu0 %2715  ;;  %9304 = vst [vmem:[#allocation10_spill] sm:$0xff] %v8006_v16  ;;  %3316 = vst.msk [vmem:[%s7790_s8 + $0x54] sm:$0xf] %vm1200_vm0, %v8006_v16  ;;  %v8031_v16 = vpack.c.bf16 %v1010_v53, %v1010_v53 }
 0x492   : > { %4900 = vst.msk [vmem:[%s5962_s14 + $0x260] sm:$0xf] %vm1200_vm0, %v2716_v25  ;;  %9305 = vst [vmem:[#allocation11_spill] sm:$0xff] %v8026_v37 }
 0x493   : > { %v2718_v17 = vpop.permute.xlu1 %2717  ;;  %2961 = vrot.lane.b32.xlu0 %v6297_v61, %s5735_s24  ;;  %9306 = vst [vmem:[#allocation12_spill] sm:$0xff] %v8031_v16  ;;  %3321 = vst.msk [vmem:[%s7790_s8 + $0x68] sm:$0xf] %vm1200_vm0, %v8026_v37 }
 0x494   : > { %4901 = vst.msk [vmem:[%s5962_s14 + $0x264] sm:$0xf] %vm1200_vm0, %v2718_v17  ;;  %v5477_v17 = vpop.f32.mrb[26].mxu1  ;;  %3319 = vst.msk [vmem:[%s7790_s8 + $0x60] sm:$0xf] %vm1200_vm0, %v8031_v16 }
 0x495   : > { %2963 = vrot.lane.b32.xlu1 %v6310_v3, %s5735_s24  ;;  %v2720_v46 = vpop.permute.xlu0 %2719  ;;  %v1021_v13 = vadd.f32 %v5477_v17, %v7774_v30  ;;  %v1012_v8 = vpop.f32.mrb[27].mxu1 }
 0x496   : > { %4902 = vst.msk [vmem:[%s5962_s14 + $0x268] sm:$0xf] %vm1200_vm0, %v2720_v46 }
 0x497   : > { %v2722_v25 = vpop.permute.xlu1 %2721  ;;  %2965 = vrot.lane.b32.xlu0 %v6367_v49, %s5735_s24  ;;  %v8039_v19 = vpack.c.bf16 %v1021_v13, %v1021_v13  ;;  %v5480_v13 = vpop.f32.mrb[28].mxu1 }
 0x498   : > { %4903 = vst.msk [vmem:[%s5962_s14 + $0x26c] sm:$0xf] %vm1200_vm0, %v2722_v25  ;;  %v1013_v25 = vadd.f32 %v1012_v8, %v7774_v30  ;;  %v1034_v8 = vadd.f32 %v5480_v13, %v7774_v30 }
 0x499   : > { %2967 = vrot.lane.b32.xlu1 %v6382_v31, %s5735_s24  ;;  %v2724_v46 = vpop.permute.xlu0 %2723  ;;  %9307 = vst [vmem:[#allocation13_spill] sm:$0xff] %v8039_v19  ;;  %3322 = vst.msk [vmem:[%s7790_s8 + $0x6c] sm:$0xf] %vm1200_vm0, %v8039_v19 }
 0x49a   : > { %4904 = vst.msk [vmem:[%s5962_s14 + $0x270] sm:$0xf] %vm1200_vm0, %v2724_v46  ;;  %v8046_v17 = vpack.c.bf16 %v1013_v25, %v1013_v25  ;;  %v1025_v25 = vpop.f32.mrb[29].mxu1  ;;  %v8066_v37 = vpack.c.bf16 %v1034_v8, %v1034_v8 }
 0x49b   : > { %v2726_v40 = vpop.permute.xlu1 %2725  ;;  %2969 = vrot.lane.b32.xlu0 %v6439_v35, %s5735_s24  ;;  %v5481_v19 = vpop.f32.mrb[30].mxu1 }
 0x49c   : > { %4905 = vst.msk [vmem:[%s5962_s14 + $0x274] sm:$0xf] %vm1200_vm0, %v2726_v40  ;;  %9308 = vst [vmem:[#allocation14_spill] sm:$0xff] %v8046_v17  ;;  %v1026_v40 = vadd.f32 %v1025_v25, %v7774_v30  ;;  %v1028_v13 = vpop.f32.mrb[31].mxu1 }
 0x49d   : > { %2971 = vrot.lane.b32.xlu1 %v6454_v50, %s5735_s24  ;;  %v2728_v53 = vpop.permute.xlu0 %2727  ;;  %3320 = vst.msk [vmem:[%s7790_s8 + $0x64] sm:$0xf] %vm1200_vm0, %v8046_v17  ;;  %v1037_v17 = vadd.f32 %v5481_v19, %v7774_v30  ;;  %3325 = vst.msk [vmem:[%s7790_s8 + $0x78] sm:$0xf] %vm1200_vm0, %v8066_v37 }
 0x49e   : > { %4906 = vst.msk [vmem:[%s5962_s14 + $0x278] sm:$0xf] %vm1200_vm0, %v2728_v53  ;;  %v8071_v16 = vpack.c.bf16 %v1026_v40, %v1026_v40 }
 0x49f   : > { %v2730_v46 = vpop.permute.xlu1 %2729  ;;  %2973 = vrot.lane.b32.xlu0 %v6511_v29, %s5735_s24  ;;  %v8079_v8 = vpack.c.bf16 %v1037_v17, %v1037_v17 }
 0x4a0   : > { %4907 = vst.msk [vmem:[%s5962_s14 + $0x27c] sm:$0xf] %vm1200_vm0, %v2730_v46  ;;  %v1029_v46 = vadd.f32 %v1028_v13, %v7774_v30  ;;  %3323 = vst.msk [vmem:[%s7790_s8 + $0x70] sm:$0xf] %vm1200_vm0, %v8071_v16 }
 0x4a1   : > { %2975 = vrot.lane.b32.xlu1 %v6526_v55, %s5735_s24  ;;  %v2797_v53 = vpop.permute.xlu0 %2796  ;;  %3326 = vst.msk [vmem:[%s7790_s8 + $0x7c] sm:$0xf] %vm1200_vm0, %v8079_v8 }
 0x4a2   : > { %4908 = vst.msk [vmem:[%s5962_s14 + $0x280] sm:$0xf] %vm1200_vm0, %v2797_v53  ;;  %v8086_v19 = vpack.c.bf16 %v1029_v46, %v1029_v46 }
 0x4a3   : > { %v2799_v25 = vpop.permute.xlu1 %2798  ;;  %2977 = vrot.lane.b32.xlu0 %v6583_v34, %s5735_s24 }
 0x4a4   : > { %4909 = vst.msk [vmem:[%s5962_s14 + $0x284] sm:$0xf] %vm1200_vm0, %v2799_v25  ;;  %3324 = vst.msk [vmem:[%s7790_s8 + $0x74] sm:$0xf] %vm1200_vm0, %v8086_v19 }
 0x4a5   : > { %2979 = vrot.lane.b32.xlu1 %v6598_v47, %s5735_s24  ;;  %v2801_v30 = vpop.permute.xlu0 %2800 }
 0x4a6   : > { %4910 = vst.msk [vmem:[%s5962_s14 + $0x288] sm:$0xf] %vm1200_vm0, %v2801_v30 }
 0x4a7   : > { %v2803_v17 = vpop.permute.xlu1 %2802  ;;  %2981 = vrot.lane.b32.xlu0 %v6655_v2, %s5735_s24 }
 0x4a8   : > { %4911 = vst.msk [vmem:[%s5962_s14 + $0x28c] sm:$0xf] %vm1200_vm0, %v2803_v17 }
 0x4a9   : > { %2983 = vrot.lane.b32.xlu1 %v6670_v4, %s5735_s24  ;;  %v2805_v40 = vpop.permute.xlu0 %2804 }
 0x4aa   : > { %4912 = vst.msk [vmem:[%s5962_s14 + $0x290] sm:$0xf] %vm1200_vm0, %v2805_v40 }
 0x4ab   : > { %v2807_v53 = vpop.permute.xlu1 %2806  ;;  %2985 = vrot.lane.b32.xlu0 %v6731_v28, %s5735_s24 }
 0x4ac   : > { %4913 = vst.msk [vmem:[%s5962_s14 + $0x294] sm:$0xf] %vm1200_vm0, %v2807_v53 }
 0x4ad   : > { %2987 = vrot.lane.b32.xlu1 %v6746_v54, %s5735_s24  ;;  %v2809_v13 = vpop.permute.xlu0 %2808 }
 0x4ae   : > { %4914 = vst.msk [vmem:[%s5962_s14 + $0x298] sm:$0xf] %vm1200_vm0, %v2809_v13 }
 0x4af   : > { %v2811_v46 = vpop.permute.xlu1 %2810  ;;  %3054 = vrot.lane.b32.xlu0 %v5965_v48, %s5736_s18 }
 0x4b0   : > { %4915 = vst.msk [vmem:[%s5962_s14 + $0x29c] sm:$0xf] %vm1200_vm0, %v2811_v46 }
 0x4b1   : > { %3056 = vrot.lane.b32.xlu1 %v5978_v51, %s5736_s18  ;;  %v2813_v25 = vpop.permute.xlu0 %2812 }
 0x4b2   : > { %4916 = vst.msk [vmem:[%s5962_s14 + $0x2a0] sm:$0xf] %vm1200_vm0, %v2813_v25 }
 0x4b3   : > { %v2815_v30 = vpop.permute.xlu1 %2814  ;;  %3058 = vrot.lane.b32.xlu0 %v5997_v60, %s5736_s18 }
 0x4b4   : > { %4917 = vst.msk [vmem:[%s5962_s14 + $0x2a4] sm:$0xf] %vm1200_vm0, %v2815_v30 }
 0x4b5   : > { %3060 = vrot.lane.b32.xlu1 %v6010_v63, %s5736_s18  ;;  %v2817_v48 = vpop.permute.xlu0 %2816 }
 0x4b6   : > { %4918 = vst.msk [vmem:[%s5962_s14 + $0x2a8] sm:$0xf] %vm1200_vm0, %v2817_v48 }
 0x4b7   : > { %v2819_v17 = vpop.permute.xlu1 %2818  ;;  %3062 = vrot.lane.b32.xlu0 %v6030_v9, %s5736_s18 }
 0x4b8   : > { %4919 = vst.msk [vmem:[%s5962_s14 + $0x2ac] sm:$0xf] %vm1200_vm0, %v2819_v17 }
 0x4b9   : > { %3064 = vrot.lane.b32.xlu1 %v6043_v12, %s5736_s18  ;;  %v2821_v51 = vpop.permute.xlu0 %2820 }
 0x4ba   : > { %4920 = vst.msk [vmem:[%s5962_s14 + $0x2b0] sm:$0xf] %vm1200_vm0, %v2821_v51 }
 0x4bb   : > { %v2823_v60 = vpop.permute.xlu1 %2822  ;;  %3066 = vrot.lane.b32.xlu0 %v6062_v21, %s5736_s18 }
 0x4bc   : > { %4921 = vst.msk [vmem:[%s5962_s14 + $0x2b4] sm:$0xf] %vm1200_vm0, %v2823_v60 }
 0x4bd   : > { %3068 = vrot.lane.b32.xlu1 %v6075_v24, %s5736_s18  ;;  %v2825_v63 = vpop.permute.xlu0 %2824 }
 0x4be   : > { %4922 = vst.msk [vmem:[%s5962_s14 + $0x2b8] sm:$0xf] %vm1200_vm0, %v2825_v63 }
 0x4bf   : > { %v2827_v9 = vpop.permute.xlu1 %2826  ;;  %3070 = vrot.lane.b32.xlu0 %v6094_v36, %s5736_s18 }
 0x4c0   : > { %4923 = vst.msk [vmem:[%s5962_s14 + $0x2bc] sm:$0xf] %vm1200_vm0, %v2827_v9 }
 0x4c1   : > { %3072 = vrot.lane.b32.xlu1 %v6107_v41, %s5736_s18  ;;  %v2829_v12 = vpop.permute.xlu0 %2828 }
 0x4c2   : > { %4924 = vst.msk [vmem:[%s5962_s14 + $0x2c0] sm:$0xf] %vm1200_vm0, %v2829_v12 }
 0x4c3   : > { %v2831_v21 = vpop.permute.xlu1 %2830  ;;  %3074 = vrot.lane.b32.xlu0 %v6126_v52, %s5736_s18 }
 0x4c4   : > { %4925 = vst.msk [vmem:[%s5962_s14 + $0x2c4] sm:$0xf] %vm1200_vm0, %v2831_v21 }
 0x4c5   : > { %3076 = vrot.lane.b32.xlu1 %v6140_v56, %s5736_s18  ;;  %v2833_v24 = vpop.permute.xlu0 %2832 }
 0x4c6   : > { %4926 = vst.msk [vmem:[%s5962_s14 + $0x2c8] sm:$0xf] %vm1200_vm0, %v2833_v24 }
 0x4c7   : > { %v2835_v36 = vpop.permute.xlu1 %2834  ;;  %3078 = vrot.lane.b32.xlu0 %v6159_v6, %s5736_s18 }
 0x4c8   : > { %4927 = vst.msk [vmem:[%s5962_s14 + $0x2cc] sm:$0xf] %vm1200_vm0, %v2835_v36 }
 0x4c9   : > { %3080 = vrot.lane.b32.xlu1 %v6172_v10, %s5736_s18  ;;  %v2837_v41 = vpop.permute.xlu0 %2836 }
 0x4ca   : > { %4928 = vst.msk [vmem:[%s5962_s14 + $0x2d0] sm:$0xf] %vm1200_vm0, %v2837_v41 }
 0x4cb   : > { %v2839_v52 = vpop.permute.xlu1 %2838  ;;  %3082 = vrot.lane.b32.xlu0 %v6204_v20, %s5736_s18 }
 0x4cc   : > { %4929 = vst.msk [vmem:[%s5962_s14 + $0x2d4] sm:$0xf] %vm1200_vm0, %v2839_v52  ;;  %v9309_v52 = vld [vmem:[#allocation10_spill] sm:$0xff] }
 0x4cd   : > { %3084 = vrot.lane.b32.xlu1 %v6214_v26, %s5736_s18  ;;  %v2841_v56 = vpop.permute.xlu0 %2840 }
 0x4ce   : > { %4930 = vst.msk [vmem:[%s5962_s14 + $0x2d8] sm:$0xf] %vm1200_vm0, %v2841_v56 }
 0x4cf   : > { %v2843_v6 = vpop.permute.xlu1 %2842  ;;  %3086 = vrot.lane.b32.xlu0 %v6249_v42, %s5736_s18 }
 0x4d0   : > { %4931 = vst.msk [vmem:[%s5962_s14 + $0x2dc] sm:$0xf] %vm1200_vm0, %v2843_v6 }
 0x4d1   : > { %3088 = vrot.lane.b32.xlu1 %v6262_v45, %s5736_s18  ;;  %v2845_v10 = vpop.permute.xlu0 %2844 }
 0x4d2   : > { %4932 = vst.msk [vmem:[%s5962_s14 + $0x2e0] sm:$0xf] %vm1200_vm0, %v2845_v10  ;;  %v9310_v10 = vld [vmem:[#allocation8_spill] sm:$0xff] }
 0x4d3   : > { %v2847_v20 = vpop.permute.xlu1 %2846  ;;  %3090 = vrot.lane.b32.xlu0 %v6297_v61, %s5736_s18 }
 0x4d4   : > { %4933 = vst.msk [vmem:[%s5962_s14 + $0x2e4] sm:$0xf] %vm1200_vm0, %v2847_v20  ;;  %v9311_v20 = vld [vmem:[#allocation9_spill] sm:$0xff] }
 0x4d5   : > { %3092 = vrot.lane.b32.xlu1 %v6310_v3, %s5736_s18  ;;  %v2849_v26 = vpop.permute.xlu0 %2848 }
 0x4d6   : > { %4934 = vst.msk [vmem:[%s5962_s14 + $0x2e8] sm:$0xf] %vm1200_vm0, %v2849_v26 }
 0x4d7   : > { %v2851_v42 = vpop.permute.xlu1 %2850  ;;  %3094 = vrot.lane.b32.xlu0 %v6367_v49, %s5736_s18 }
 0x4d8   : > { %4935 = vst.msk [vmem:[%s5962_s14 + $0x2ec] sm:$0xf] %vm1200_vm0, %v2851_v42 }
 0x4d9   : > { %3096 = vrot.lane.b32.xlu1 %v6382_v31, %s5736_s18  ;;  %v2853_v45 = vpop.permute.xlu0 %2852 }
 0x4da   : > { %4936 = vst.msk [vmem:[%s5962_s14 + $0x2f0] sm:$0xf] %vm1200_vm0, %v2853_v45  ;;  %v9312_v45 = vld [vmem:[#allocation12_spill] sm:$0xff] }
 0x4db   : > { %v2855_v61 = vpop.permute.xlu1 %2854  ;;  %3098 = vrot.lane.b32.xlu0 %v6439_v35, %s5736_s18 }
 0x4dc   : > { %4937 = vst.msk [vmem:[%s5962_s14 + $0x2f4] sm:$0xf] %vm1200_vm0, %v2855_v61  ;;  %v9313_v61 = vld [vmem:[#allocation14_spill] sm:$0xff] }
 0x4dd   : > { %3100 = vrot.lane.b32.xlu1 %v6454_v50, %s5736_s18  ;;  %v2857_v3 = vpop.permute.xlu0 %2856 }
 0x4de   : > { %4938 = vst.msk [vmem:[%s5962_s14 + $0x2f8] sm:$0xf] %vm1200_vm0, %v2857_v3 }
 0x4df   : > { %v2859_v49 = vpop.permute.xlu1 %2858  ;;  %3102 = vrot.lane.b32.xlu0 %v6511_v29, %s5736_s18 }
 0x4e0   : > { %4939 = vst.msk [vmem:[%s5962_s14 + $0x2fc] sm:$0xf] %vm1200_vm0, %v2859_v49 }
 0x4e1   : > { %3104 = vrot.lane.b32.xlu1 %v6526_v55, %s5736_s18  ;;  %v2926_v31 = vpop.permute.xlu0 %2925 }
 0x4e2   : > { %4940 = vst.msk [vmem:[%s5962_s14 + $0x300] sm:$0xf] %vm1200_vm0, %v2926_v31  ;;  %v9314_v31 = vld [vmem:[#allocation11_spill] sm:$0xff] }
 0x4e3   : > { %v2928_v35 = vpop.permute.xlu1 %2927  ;;  %3106 = vrot.lane.b32.xlu0 %v6583_v34, %s5736_s18 }
 0x4e4   : > { %4941 = vst.msk [vmem:[%s5962_s14 + $0x304] sm:$0xf] %vm1200_vm0, %v2928_v35  ;;  %v9315_v35 = vld [vmem:[#allocation13_spill] sm:$0xff] }
 0x4e5   : > { %3108 = vrot.lane.b32.xlu1 %v6598_v47, %s5736_s18  ;;  %v2930_v50 = vpop.permute.xlu0 %2929 }
 0x4e6   : > { %4942 = vst.msk [vmem:[%s5962_s14 + $0x308] sm:$0xf] %vm1200_vm0, %v2930_v50 }
 0x4e7   : > { %v2932_v29 = vpop.permute.xlu1 %2931  ;;  %3110 = vrot.lane.b32.xlu0 %v6655_v2, %s5736_s18 }
 0x4e8   : > { %4943 = vst.msk [vmem:[%s5962_s14 + $0x30c] sm:$0xf] %vm1200_vm0, %v2932_v29 }
 0x4e9   : > { %3112 = vrot.lane.b32.xlu1 %v6670_v4, %s5736_s18  ;;  %v2934_v55 = vpop.permute.xlu0 %2933 }
 0x4ea   : > { %4944 = vst.msk [vmem:[%s5962_s14 + $0x310] sm:$0xf] %vm1200_vm0, %v2934_v55 }
 0x4eb   : > { %v2936_v34 = vpop.permute.xlu1 %2935  ;;  %3114 = vrot.lane.b32.xlu0 %v6731_v28, %s5736_s18 }
 0x4ec   : > { %4945 = vst.msk [vmem:[%s5962_s14 + $0x314] sm:$0xf] %vm1200_vm0, %v2936_v34 }
 0x4ed   : > { %3116 = vrot.lane.b32.xlu1 %v6746_v54, %s5736_s18  ;;  %v2938_v47 = vpop.permute.xlu0 %2937 }
 0x4ee   : > { %4946 = vst.msk [vmem:[%s5962_s14 + $0x318] sm:$0xf] %vm1200_vm0, %v2938_v47 }
 0x4ef   : > { %v2940_v2 = vpop.permute.xlu1 %2939  ;;  %3327 = vrot.lane.b32.xlu0 %v7796_v0, %s5730_s17 }
 0x4f0   : > { %4947 = vst.msk [vmem:[%s5962_s14 + $0x31c] sm:$0xf] %vm1200_vm0, %v2940_v2 }
 0x4f1   : > { %3329 = vrot.lane.b32.xlu1 %v7800_v58, %s5730_s17  ;;  %v2942_v4 = vpop.permute.xlu0 %2941 }
 0x4f2   : > { %4948 = vst.msk [vmem:[%s5962_s14 + $0x320] sm:$0xf] %vm1200_vm0, %v2942_v4 }
 0x4f3   : > { %v2944_v28 = vpop.permute.xlu1 %2943  ;;  %3331 = vrot.lane.b32.xlu0 %v7794_v33, %s5730_s17 }
 0x4f4   : > { %4949 = vst.msk [vmem:[%s5962_s14 + $0x324] sm:$0xf] %vm1200_vm0, %v2944_v28 }
 0x4f5   : > { %3333 = vrot.lane.b32.xlu1 %v7798_v44, %s5730_s17  ;;  %v2946_v54 = vpop.permute.xlu0 %2945 }
 0x4f6   : > { %4950 = vst.msk [vmem:[%s5962_s14 + $0x328] sm:$0xf] %vm1200_vm0, %v2946_v54 }
 0x4f7   : > { %v2948_v40 = vpop.permute.xlu1 %2947  ;;  %3335 = vrot.lane.b32.xlu0 %v7831_v15, %s5730_s17 }
 0x4f8   : > { %4951 = vst.msk [vmem:[%s5962_s14 + $0x32c] sm:$0xf] %vm1200_vm0, %v2948_v40 }
 0x4f9   : > { %3337 = vrot.lane.b32.xlu1 %v7846_v7, %s5730_s17  ;;  %v2950_v53 = vpop.permute.xlu0 %2949 }
 0x4fa   : > { %4952 = vst.msk [vmem:[%s5962_s14 + $0x330] sm:$0xf] %vm1200_vm0, %v2950_v53 }
 0x4fb   : > { %v2952_v13 = vpop.permute.xlu1 %2951  ;;  %3339 = vrot.lane.b32.xlu0 %v7826_v59, %s5730_s17 }
 0x4fc   : > { %4953 = vst.msk [vmem:[%s5962_s14 + $0x334] sm:$0xf] %vm1200_vm0, %v2952_v13 }
 0x4fd   : > { %3341 = vrot.lane.b32.xlu1 %v7839_v1, %s5730_s17  ;;  %v2954_v46 = vpop.permute.xlu0 %2953 }
 0x4fe   : > { %4954 = vst.msk [vmem:[%s5962_s14 + $0x338] sm:$0xf] %vm1200_vm0, %v2954_v46 }
 0x4ff   : > { %v2956_v25 = vpop.permute.xlu1 %2955  ;;  %3343 = vrot.lane.b32.xlu0 %v7871_v23, %s5730_s17 }
 0x500   : > { %4955 = vst.msk [vmem:[%s5962_s14 + $0x33c] sm:$0xf] %vm1200_vm0, %v2956_v25 }
 0x501   : > { %3345 = vrot.lane.b32.xlu1 %v7886_v43, %s5730_s17  ;;  %v2958_v30 = vpop.permute.xlu0 %2957 }
 0x502   : > { %4956 = vst.msk [vmem:[%s5962_s14 + $0x340] sm:$0xf] %vm1200_vm0, %v2958_v30 }
 0x503   : > { %v2960_v48 = vpop.permute.xlu1 %2959  ;;  %3347 = vrot.lane.b32.xlu0 %v7866_v57, %s5730_s17 }
 0x504   : > { %4957 = vst.msk [vmem:[%s5962_s14 + $0x344] sm:$0xf] %vm1200_vm0, %v2960_v48 }
 0x505   : > { %3349 = vrot.lane.b32.xlu1 %v7879_v27, %s5730_s17  ;;  %v2962_v17 = vpop.permute.xlu0 %2961 }
 0x506   : > { %4958 = vst.msk [vmem:[%s5962_s14 + $0x348] sm:$0xf] %vm1200_vm0, %v2962_v17 }
 0x507   : > { %v2964_v51 = vpop.permute.xlu1 %2963  ;;  %3351 = vrot.lane.b32.xlu0 %v7911_v22, %s5730_s17 }
 0x508   : > { %4959 = vst.msk [vmem:[%s5962_s14 + $0x34c] sm:$0xf] %vm1200_vm0, %v2964_v51 }
 0x509   : > { %3353 = vrot.lane.b32.xlu1 %v7926_v39, %s5730_s17  ;;  %v2966_v60 = vpop.permute.xlu0 %2965 }
 0x50a   : > { %4960 = vst.msk [vmem:[%s5962_s14 + $0x350] sm:$0xf] %vm1200_vm0, %v2966_v60 }
 0x50b   : > { %v2968_v63 = vpop.permute.xlu1 %2967  ;;  %3355 = vrot.lane.b32.xlu0 %v7906_v14, %s5730_s17 }
 0x50c   : > { %4961 = vst.msk [vmem:[%s5962_s14 + $0x354] sm:$0xf] %vm1200_vm0, %v2968_v63 }
 0x50d   : > { %3357 = vrot.lane.b32.xlu1 %v7919_v38, %s5730_s17  ;;  %v2970_v9 = vpop.permute.xlu0 %2969 }
 0x50e   : > { %4962 = vst.msk [vmem:[%s5962_s14 + $0x358] sm:$0xf] %vm1200_vm0, %v2970_v9 }
 0x50f   : > { %v2972_v12 = vpop.permute.xlu1 %2971  ;;  %3359 = vrot.lane.b32.xlu0 %v7951_v62, %s5730_s17 }
 0x510   : > { %4963 = vst.msk [vmem:[%s5962_s14 + $0x35c] sm:$0xf] %vm1200_vm0, %v2972_v12 }
 0x511   : > { %3361 = vrot.lane.b32.xlu1 %v7966_v5, %s5730_s17  ;;  %v2974_v21 = vpop.permute.xlu0 %2973 }
 0x512   : > { %4964 = vst.msk [vmem:[%s5962_s14 + $0x360] sm:$0xf] %vm1200_vm0, %v2974_v21 }
 0x513   : > { %v2976_v24 = vpop.permute.xlu1 %2975  ;;  %3363 = vrot.lane.b32.xlu0 %v7946_v18, %s5730_s17 }
 0x514   : > { %4965 = vst.msk [vmem:[%s5962_s14 + $0x364] sm:$0xf] %vm1200_vm0, %v2976_v24 }
 0x515   : > { %3365 = vrot.lane.b32.xlu1 %v7959_v32, %s5730_s17  ;;  %v2978_v36 = vpop.permute.xlu0 %2977 }
 0x516   : > { %4966 = vst.msk [vmem:[%s5962_s14 + $0x368] sm:$0xf] %vm1200_vm0, %v2978_v36 }
 0x517   : > { %v2980_v41 = vpop.permute.xlu1 %2979  ;;  %3367 = vrot.lane.b32.xlu0 %v7991_v11, %s5730_s17 }
 0x518   : > { %4967 = vst.msk [vmem:[%s5962_s14 + $0x36c] sm:$0xf] %vm1200_vm0, %v2980_v41 }
 0x519   : > { %3369 = vrot.lane.b32.xlu1 %v9309_v52, %s5730_s17  ;;  %v2982_v56 = vpop.permute.xlu0 %2981 }
 0x51a   : > { %4968 = vst.msk [vmem:[%s5962_s14 + $0x370] sm:$0xf] %vm1200_vm0, %v2982_v56 }
 0x51b   : > { %v2984_v6 = vpop.permute.xlu1 %2983  ;;  %3371 = vrot.lane.b32.xlu0 %v9310_v10, %s5730_s17 }
 0x51c   : > { %4969 = vst.msk [vmem:[%s5962_s14 + $0x374] sm:$0xf] %vm1200_vm0, %v2984_v6 }
 0x51d   : > { %3373 = vrot.lane.b32.xlu1 %v9311_v20, %s5730_s17  ;;  %v2986_v26 = vpop.permute.xlu0 %2985 }
 0x51e   : > { %4970 = vst.msk [vmem:[%s5962_s14 + $0x378] sm:$0xf] %vm1200_vm0, %v2986_v26 }
 0x51f   : > { %v2988_v42 = vpop.permute.xlu1 %2987  ;;  %3375 = vrot.lane.b32.xlu0 %v9312_v45, %s5730_s17 }
 0x520   : > { %4971 = vst.msk [vmem:[%s5962_s14 + $0x37c] sm:$0xf] %vm1200_vm0, %v2988_v42 }
 0x521   : > { %3377 = vrot.lane.b32.xlu1 %v9313_v61, %s5730_s17  ;;  %v3055_v3 = vpop.permute.xlu0 %3054 }
 0x522   : > { %4972 = vst.msk [vmem:[%s5962_s14 + $0x380] sm:$0xf] %vm1200_vm0, %v3055_v3 }
 0x523   : > { %v3057_v49 = vpop.permute.xlu1 %3056  ;;  %3379 = vrot.lane.b32.xlu0 %v9314_v31, %s5730_s17 }
 0x524   : > { %4973 = vst.msk [vmem:[%s5962_s14 + $0x384] sm:$0xf] %vm1200_vm0, %v3057_v49 }
 0x525   : > { %3381 = vrot.lane.b32.xlu1 %v9315_v35, %s5730_s17  ;;  %v3059_v50 = vpop.permute.xlu0 %3058 }
 0x526   : > { %4974 = vst.msk [vmem:[%s5962_s14 + $0x388] sm:$0xf] %vm1200_vm0, %v3059_v50 }
 0x527   : > { %v3061_v29 = vpop.permute.xlu1 %3060  ;;  %3383 = vrot.lane.b32.xlu0 %v8071_v16, %s5730_s17 }
 0x528   : > { %4975 = vst.msk [vmem:[%s5962_s14 + $0x38c] sm:$0xf] %vm1200_vm0, %v3061_v29 }
 0x529   : > { %3385 = vrot.lane.b32.xlu1 %v8086_v19, %s5730_s17  ;;  %v3063_v55 = vpop.permute.xlu0 %3062 }
 0x52a   : > { %4976 = vst.msk [vmem:[%s5962_s14 + $0x390] sm:$0xf] %vm1200_vm0, %v3063_v55 }
 0x52b   : > { %v3065_v34 = vpop.permute.xlu1 %3064  ;;  %3387 = vrot.lane.b32.xlu0 %v8066_v37, %s5730_s17 }
 0x52c   : > { %4977 = vst.msk [vmem:[%s5962_s14 + $0x394] sm:$0xf] %vm1200_vm0, %v3065_v34 }
 0x52d   : > { %3389 = vrot.lane.b32.xlu1 %v8079_v8, %s5730_s17  ;;  %v3067_v47 = vpop.permute.xlu0 %3066 }
 0x52e   : > { %4978 = vst.msk [vmem:[%s5962_s14 + $0x398] sm:$0xf] %vm1200_vm0, %v3067_v47 }
 0x52f   : > { %v3069_v2 = vpop.permute.xlu1 %3068  ;;  %3456 = vrot.lane.b32.xlu0 %v7796_v0, %s5731_s10 }
 0x530   : > { %4979 = vst.msk [vmem:[%s5962_s14 + $0x39c] sm:$0xf] %vm1200_vm0, %v3069_v2 }
 0x531   : > { %3458 = vrot.lane.b32.xlu1 %v7800_v58, %s5731_s10  ;;  %v3071_v4 = vpop.permute.xlu0 %3070 }
 0x532   : > { %4980 = vst.msk [vmem:[%s5962_s14 + $0x3a0] sm:$0xf] %vm1200_vm0, %v3071_v4 }
 0x533   : > { %v3073_v28 = vpop.permute.xlu1 %3072  ;;  %3460 = vrot.lane.b32.xlu0 %v7794_v33, %s5731_s10 }
 0x534   : > { %4981 = vst.msk [vmem:[%s5962_s14 + $0x3a4] sm:$0xf] %vm1200_vm0, %v3073_v28 }
 0x535   : > { %3462 = vrot.lane.b32.xlu1 %v7798_v44, %s5731_s10  ;;  %v3075_v54 = vpop.permute.xlu0 %3074 }
 0x536   : > { %4982 = vst.msk [vmem:[%s5962_s14 + $0x3a8] sm:$0xf] %vm1200_vm0, %v3075_v54 }
 0x537   : > { %v3077_v40 = vpop.permute.xlu1 %3076  ;;  %3464 = vrot.lane.b32.xlu0 %v7831_v15, %s5731_s10 }
 0x538   : > { %4983 = vst.msk [vmem:[%s5962_s14 + $0x3ac] sm:$0xf] %vm1200_vm0, %v3077_v40 }
 0x539   : > { %3466 = vrot.lane.b32.xlu1 %v7846_v7, %s5731_s10  ;;  %v3079_v53 = vpop.permute.xlu0 %3078 }
 0x53a   : > { %4984 = vst.msk [vmem:[%s5962_s14 + $0x3b0] sm:$0xf] %vm1200_vm0, %v3079_v53 }
 0x53b   : > { %v3081_v13 = vpop.permute.xlu1 %3080  ;;  %3468 = vrot.lane.b32.xlu0 %v7826_v59, %s5731_s10 }
 0x53c   : > { %4985 = vst.msk [vmem:[%s5962_s14 + $0x3b4] sm:$0xf] %vm1200_vm0, %v3081_v13 }
 0x53d   : > { %3470 = vrot.lane.b32.xlu1 %v7839_v1, %s5731_s10  ;;  %v3083_v46 = vpop.permute.xlu0 %3082 }
 0x53e   : > { %4986 = vst.msk [vmem:[%s5962_s14 + $0x3b8] sm:$0xf] %vm1200_vm0, %v3083_v46 }
 0x53f   : > { %v3085_v25 = vpop.permute.xlu1 %3084  ;;  %3472 = vrot.lane.b32.xlu0 %v7871_v23, %s5731_s10 }
 0x540   : > { %4987 = vst.msk [vmem:[%s5962_s14 + $0x3bc] sm:$0xf] %vm1200_vm0, %v3085_v25 }
 0x541   : > { %3474 = vrot.lane.b32.xlu1 %v7886_v43, %s5731_s10  ;;  %v3087_v30 = vpop.permute.xlu0 %3086 }
 0x542   : > { %4988 = vst.msk [vmem:[%s5962_s14 + $0x3c0] sm:$0xf] %vm1200_vm0, %v3087_v30 }
 0x543   : > { %v3089_v48 = vpop.permute.xlu1 %3088  ;;  %3476 = vrot.lane.b32.xlu0 %v7866_v57, %s5731_s10 }
 0x544   : > { %4989 = vst.msk [vmem:[%s5962_s14 + $0x3c4] sm:$0xf] %vm1200_vm0, %v3089_v48 }
 0x545   : > { %3478 = vrot.lane.b32.xlu1 %v7879_v27, %s5731_s10  ;;  %v3091_v17 = vpop.permute.xlu0 %3090 }
 0x546   : > { %4990 = vst.msk [vmem:[%s5962_s14 + $0x3c8] sm:$0xf] %vm1200_vm0, %v3091_v17 }
 0x547   : > { %v3093_v51 = vpop.permute.xlu1 %3092  ;;  %3480 = vrot.lane.b32.xlu0 %v7911_v22, %s5731_s10 }
 0x548   : > { %4991 = vst.msk [vmem:[%s5962_s14 + $0x3cc] sm:$0xf] %vm1200_vm0, %v3093_v51 }
 0x549   : > { %3482 = vrot.lane.b32.xlu1 %v7926_v39, %s5731_s10  ;;  %v3095_v60 = vpop.permute.xlu0 %3094 }
 0x54a   : > { %4992 = vst.msk [vmem:[%s5962_s14 + $0x3d0] sm:$0xf] %vm1200_vm0, %v3095_v60 }
 0x54b   : > { %v3097_v63 = vpop.permute.xlu1 %3096  ;;  %3484 = vrot.lane.b32.xlu0 %v7906_v14, %s5731_s10 }
 0x54c   : > { %4993 = vst.msk [vmem:[%s5962_s14 + $0x3d4] sm:$0xf] %vm1200_vm0, %v3097_v63 }
 0x54d   : > { %3486 = vrot.lane.b32.xlu1 %v7919_v38, %s5731_s10  ;;  %v3099_v9 = vpop.permute.xlu0 %3098 }
 0x54e   : > { %4994 = vst.msk [vmem:[%s5962_s14 + $0x3d8] sm:$0xf] %vm1200_vm0, %v3099_v9 }
 0x54f   : > { %v3101_v12 = vpop.permute.xlu1 %3100  ;;  %3488 = vrot.lane.b32.xlu0 %v7951_v62, %s5731_s10 }
 0x550   : > { %4995 = vst.msk [vmem:[%s5962_s14 + $0x3dc] sm:$0xf] %vm1200_vm0, %v3101_v12 }
 0x551   : > { %3490 = vrot.lane.b32.xlu1 %v7966_v5, %s5731_s10  ;;  %v3103_v21 = vpop.permute.xlu0 %3102 }
 0x552   : > { %4996 = vst.msk [vmem:[%s5962_s14 + $0x3e0] sm:$0xf] %vm1200_vm0, %v3103_v21 }
 0x553   : > { %v3105_v24 = vpop.permute.xlu1 %3104  ;;  %3492 = vrot.lane.b32.xlu0 %v7946_v18, %s5731_s10 }
 0x554   : > { %4997 = vst.msk [vmem:[%s5962_s14 + $0x3e4] sm:$0xf] %vm1200_vm0, %v3105_v24 }
 0x555   : > { %3494 = vrot.lane.b32.xlu1 %v7959_v32, %s5731_s10  ;;  %v3107_v36 = vpop.permute.xlu0 %3106 }
 0x556   : > { %4998 = vst.msk [vmem:[%s5962_s14 + $0x3e8] sm:$0xf] %vm1200_vm0, %v3107_v36 }
 0x557   : > { %v3109_v41 = vpop.permute.xlu1 %3108  ;;  %3496 = vrot.lane.b32.xlu0 %v7991_v11, %s5731_s10 }
 0x558   : > { %4999 = vst.msk [vmem:[%s5962_s14 + $0x3ec] sm:$0xf] %vm1200_vm0, %v3109_v41 }
 0x559   : > { %3498 = vrot.lane.b32.xlu1 %v9309_v52, %s5731_s10  ;;  %v3111_v56 = vpop.permute.xlu0 %3110 }
 0x55a   : > { %5000 = vst.msk [vmem:[%s5962_s14 + $0x3f0] sm:$0xf] %vm1200_vm0, %v3111_v56 }
 0x55b   : > { %v3113_v6 = vpop.permute.xlu1 %3112  ;;  %3500 = vrot.lane.b32.xlu0 %v9310_v10, %s5731_s10 }
 0x55c   : > { %5001 = vst.msk [vmem:[%s5962_s14 + $0x3f4] sm:$0xf] %vm1200_vm0, %v3113_v6 }
 0x55d   : > { %3502 = vrot.lane.b32.xlu1 %v9311_v20, %s5731_s10  ;;  %v3115_v26 = vpop.permute.xlu0 %3114 }
 0x55e   : > { %5002 = vst.msk [vmem:[%s5962_s14 + $0x3f8] sm:$0xf] %vm1200_vm0, %v3115_v26 }
 0x55f   : > { %v3117_v42 = vpop.permute.xlu1 %3116  ;;  %3504 = vrot.lane.b32.xlu0 %v9312_v45, %s5731_s10 }
 0x560   : > { %5003 = vst.msk [vmem:[%s5962_s14 + $0x3fc] sm:$0xf] %vm1200_vm0, %v3117_v42 }
 0x561   : > { %3506 = vrot.lane.b32.xlu1 %v9313_v61, %s5731_s10  ;;  %v3328_v3 = vpop.permute.xlu0 %3327 }
 0x562   : > { %5036 = vst.msk [vmem:[%s7790_s8 + $0x80] sm:$0xf] %vm1200_vm0, %v3328_v3 }
 0x563   : > { %v3330_v49 = vpop.permute.xlu1 %3329  ;;  %3508 = vrot.lane.b32.xlu0 %v9314_v31, %s5731_s10 }
 0x564   : > { %5037 = vst.msk [vmem:[%s7790_s8 + $0x84] sm:$0xf] %vm1200_vm0, %v3330_v49 }
 0x565   : > { %3510 = vrot.lane.b32.xlu1 %v9315_v35, %s5731_s10  ;;  %v3332_v50 = vpop.permute.xlu0 %3331 }
 0x566   : > { %5038 = vst.msk [vmem:[%s7790_s8 + $0x88] sm:$0xf] %vm1200_vm0, %v3332_v50 }
 0x567   : > { %v3334_v29 = vpop.permute.xlu1 %3333  ;;  %3512 = vrot.lane.b32.xlu0 %v8071_v16, %s5731_s10 }
 0x568   : > { %5039 = vst.msk [vmem:[%s7790_s8 + $0x8c] sm:$0xf] %vm1200_vm0, %v3334_v29 }
 0x569   : > { %3514 = vrot.lane.b32.xlu1 %v8086_v19, %s5731_s10  ;;  %v3336_v55 = vpop.permute.xlu0 %3335 }
 0x56a   : > { %5040 = vst.msk [vmem:[%s7790_s8 + $0x90] sm:$0xf] %vm1200_vm0, %v3336_v55 }
 0x56b   : > { %v3338_v34 = vpop.permute.xlu1 %3337  ;;  %3516 = vrot.lane.b32.xlu0 %v8066_v37, %s5731_s10 }
 0x56c   : > { %5041 = vst.msk [vmem:[%s7790_s8 + $0x94] sm:$0xf] %vm1200_vm0, %v3338_v34 }
 0x56d   : > { %3518 = vrot.lane.b32.xlu1 %v8079_v8, %s5731_s10  ;;  %v3340_v47 = vpop.permute.xlu0 %3339 }
 0x56e   : > { %5042 = vst.msk [vmem:[%s7790_s8 + $0x98] sm:$0xf] %vm1200_vm0, %v3340_v47 }
 0x56f   : > { %v3342_v2 = vpop.permute.xlu1 %3341  ;;  %3585 = vrot.lane.b32.xlu0 %v7796_v0, %s5732_s7 }
 0x570   : > { %5043 = vst.msk [vmem:[%s7790_s8 + $0x9c] sm:$0xf] %vm1200_vm0, %v3342_v2 }
 0x571   : > { %3587 = vrot.lane.b32.xlu1 %v7800_v58, %s5732_s7  ;;  %v3344_v4 = vpop.permute.xlu0 %3343 }
 0x572   : > { %5044 = vst.msk [vmem:[%s7790_s8 + $0xa0] sm:$0xf] %vm1200_vm0, %v3344_v4 }
 0x573   : > { %v3346_v28 = vpop.permute.xlu1 %3345  ;;  %3589 = vrot.lane.b32.xlu0 %v7794_v33, %s5732_s7 }
 0x574   : > { %5045 = vst.msk [vmem:[%s7790_s8 + $0xa4] sm:$0xf] %vm1200_vm0, %v3346_v28 }
 0x575   : > { %3591 = vrot.lane.b32.xlu1 %v7798_v44, %s5732_s7  ;;  %v3348_v54 = vpop.permute.xlu0 %3347 }
 0x576   : > { %5046 = vst.msk [vmem:[%s7790_s8 + $0xa8] sm:$0xf] %vm1200_vm0, %v3348_v54 }
 0x577   : > { %v3350_v40 = vpop.permute.xlu1 %3349  ;;  %3593 = vrot.lane.b32.xlu0 %v7831_v15, %s5732_s7 }
 0x578   : > { %5047 = vst.msk [vmem:[%s7790_s8 + $0xac] sm:$0xf] %vm1200_vm0, %v3350_v40 }
 0x579   : > { %3595 = vrot.lane.b32.xlu1 %v7846_v7, %s5732_s7  ;;  %v3352_v53 = vpop.permute.xlu0 %3351 }
 0x57a   : > { %5048 = vst.msk [vmem:[%s7790_s8 + $0xb0] sm:$0xf] %vm1200_vm0, %v3352_v53 }
 0x57b   : > { %v3354_v13 = vpop.permute.xlu1 %3353  ;;  %3597 = vrot.lane.b32.xlu0 %v7826_v59, %s5732_s7 }
 0x57c   : > { %5049 = vst.msk [vmem:[%s7790_s8 + $0xb4] sm:$0xf] %vm1200_vm0, %v3354_v13 }
 0x57d   : > { %3599 = vrot.lane.b32.xlu1 %v7839_v1, %s5732_s7  ;;  %v3356_v46 = vpop.permute.xlu0 %3355 }
 0x57e   : > { %5050 = vst.msk [vmem:[%s7790_s8 + $0xb8] sm:$0xf] %vm1200_vm0, %v3356_v46 }
 0x57f   : > { %v3358_v25 = vpop.permute.xlu1 %3357  ;;  %3601 = vrot.lane.b32.xlu0 %v7871_v23, %s5732_s7 }
 0x580   : > { %5051 = vst.msk [vmem:[%s7790_s8 + $0xbc] sm:$0xf] %vm1200_vm0, %v3358_v25 }
 0x581   : > { %3603 = vrot.lane.b32.xlu1 %v7886_v43, %s5732_s7  ;;  %v3360_v30 = vpop.permute.xlu0 %3359 }
 0x582   : > { %5052 = vst.msk [vmem:[%s7790_s8 + $0xc0] sm:$0xf] %vm1200_vm0, %v3360_v30 }
 0x583   : > { %v3362_v48 = vpop.permute.xlu1 %3361  ;;  %3605 = vrot.lane.b32.xlu0 %v7866_v57, %s5732_s7 }
 0x584   : > { %5053 = vst.msk [vmem:[%s7790_s8 + $0xc4] sm:$0xf] %vm1200_vm0, %v3362_v48 }
 0x585   : > { %3607 = vrot.lane.b32.xlu1 %v7879_v27, %s5732_s7  ;;  %v3364_v17 = vpop.permute.xlu0 %3363 }
 0x586   : > { %5054 = vst.msk [vmem:[%s7790_s8 + $0xc8] sm:$0xf] %vm1200_vm0, %v3364_v17 }
 0x587   : > { %v3366_v51 = vpop.permute.xlu1 %3365  ;;  %3609 = vrot.lane.b32.xlu0 %v7911_v22, %s5732_s7 }
 0x588   : > { %5055 = vst.msk [vmem:[%s7790_s8 + $0xcc] sm:$0xf] %vm1200_vm0, %v3366_v51 }
 0x589   : > { %3611 = vrot.lane.b32.xlu1 %v7926_v39, %s5732_s7  ;;  %v3368_v60 = vpop.permute.xlu0 %3367 }
 0x58a   : > { %5056 = vst.msk [vmem:[%s7790_s8 + $0xd0] sm:$0xf] %vm1200_vm0, %v3368_v60 }
 0x58b   : > { %v3370_v63 = vpop.permute.xlu1 %3369  ;;  %3613 = vrot.lane.b32.xlu0 %v7906_v14, %s5732_s7 }
 0x58c   : > { %5057 = vst.msk [vmem:[%s7790_s8 + $0xd4] sm:$0xf] %vm1200_vm0, %v3370_v63 }
 0x58d   : > { %3615 = vrot.lane.b32.xlu1 %v7919_v38, %s5732_s7  ;;  %v3372_v9 = vpop.permute.xlu0 %3371 }
 0x58e   : > { %5058 = vst.msk [vmem:[%s7790_s8 + $0xd8] sm:$0xf] %vm1200_vm0, %v3372_v9 }
 0x58f   : > { %v3374_v12 = vpop.permute.xlu1 %3373  ;;  %3617 = vrot.lane.b32.xlu0 %v7951_v62, %s5732_s7 }
 0x590   : > { %5059 = vst.msk [vmem:[%s7790_s8 + $0xdc] sm:$0xf] %vm1200_vm0, %v3374_v12 }
 0x591   : > { %3619 = vrot.lane.b32.xlu1 %v7966_v5, %s5732_s7  ;;  %v3376_v21 = vpop.permute.xlu0 %3375 }
 0x592   : > { %5060 = vst.msk [vmem:[%s7790_s8 + $0xe0] sm:$0xf] %vm1200_vm0, %v3376_v21 }
 0x593   : > { %v3378_v24 = vpop.permute.xlu1 %3377  ;;  %3621 = vrot.lane.b32.xlu0 %v7946_v18, %s5732_s7 }
 0x594   : > { %5061 = vst.msk [vmem:[%s7790_s8 + $0xe4] sm:$0xf] %vm1200_vm0, %v3378_v24 }
 0x595   : > { %3623 = vrot.lane.b32.xlu1 %v7959_v32, %s5732_s7  ;;  %v3380_v36 = vpop.permute.xlu0 %3379 }
 0x596   : > { %5062 = vst.msk [vmem:[%s7790_s8 + $0xe8] sm:$0xf] %vm1200_vm0, %v3380_v36 }
 0x597   : > { %v3382_v41 = vpop.permute.xlu1 %3381  ;;  %3625 = vrot.lane.b32.xlu0 %v7991_v11, %s5732_s7 }
 0x598   : > { %5063 = vst.msk [vmem:[%s7790_s8 + $0xec] sm:$0xf] %vm1200_vm0, %v3382_v41 }
 0x599   : > { %3627 = vrot.lane.b32.xlu1 %v9309_v52, %s5732_s7  ;;  %v3384_v56 = vpop.permute.xlu0 %3383 }
 0x59a   : > { %5064 = vst.msk [vmem:[%s7790_s8 + $0xf0] sm:$0xf] %vm1200_vm0, %v3384_v56 }
 0x59b   : > { %v3386_v6 = vpop.permute.xlu1 %3385  ;;  %3629 = vrot.lane.b32.xlu0 %v9310_v10, %s5732_s7 }
 0x59c   : > { %5065 = vst.msk [vmem:[%s7790_s8 + $0xf4] sm:$0xf] %vm1200_vm0, %v3386_v6 }
 0x59d   : > { %3631 = vrot.lane.b32.xlu1 %v9311_v20, %s5732_s7  ;;  %v3388_v26 = vpop.permute.xlu0 %3387 }
 0x59e   : > { %5066 = vst.msk [vmem:[%s7790_s8 + $0xf8] sm:$0xf] %vm1200_vm0, %v3388_v26 }
 0x59f   : > { %v3390_v42 = vpop.permute.xlu1 %3389  ;;  %3633 = vrot.lane.b32.xlu0 %v9312_v45, %s5732_s7 }
 0x5a0   : > { %5067 = vst.msk [vmem:[%s7790_s8 + $0xfc] sm:$0xf] %vm1200_vm0, %v3390_v42 }
 0x5a1   : > { %3635 = vrot.lane.b32.xlu1 %v9313_v61, %s5732_s7  ;;  %v3457_v3 = vpop.permute.xlu0 %3456 }
 0x5a2   : > { %5068 = vst.msk [vmem:[%s7790_s8 + $0x100] sm:$0xf] %vm1200_vm0, %v3457_v3 }
 0x5a3   : > { %v3459_v49 = vpop.permute.xlu1 %3458  ;;  %3637 = vrot.lane.b32.xlu0 %v9314_v31, %s5732_s7 }
 0x5a4   : > { %5069 = vst.msk [vmem:[%s7790_s8 + $0x104] sm:$0xf] %vm1200_vm0, %v3459_v49 }
 0x5a5   : > { %3639 = vrot.lane.b32.xlu1 %v9315_v35, %s5732_s7  ;;  %v3461_v50 = vpop.permute.xlu0 %3460 }
 0x5a6   : > { %5070 = vst.msk [vmem:[%s7790_s8 + $0x108] sm:$0xf] %vm1200_vm0, %v3461_v50 }
 0x5a7   : > { %v3463_v29 = vpop.permute.xlu1 %3462  ;;  %3641 = vrot.lane.b32.xlu0 %v8071_v16, %s5732_s7 }
 0x5a8   : > { %5071 = vst.msk [vmem:[%s7790_s8 + $0x10c] sm:$0xf] %vm1200_vm0, %v3463_v29 }
 0x5a9   : > { %3643 = vrot.lane.b32.xlu1 %v8086_v19, %s5732_s7  ;;  %v3465_v55 = vpop.permute.xlu0 %3464 }
 0x5aa   : > { %5072 = vst.msk [vmem:[%s7790_s8 + $0x110] sm:$0xf] %vm1200_vm0, %v3465_v55 }
 0x5ab   : > { %v3467_v34 = vpop.permute.xlu1 %3466  ;;  %3645 = vrot.lane.b32.xlu0 %v8066_v37, %s5732_s7 }
 0x5ac   : > { %5073 = vst.msk [vmem:[%s7790_s8 + $0x114] sm:$0xf] %vm1200_vm0, %v3467_v34 }
 0x5ad   : > { %3647 = vrot.lane.b32.xlu1 %v8079_v8, %s5732_s7  ;;  %v3469_v47 = vpop.permute.xlu0 %3468 }
 0x5ae   : > { %5074 = vst.msk [vmem:[%s7790_s8 + $0x118] sm:$0xf] %vm1200_vm0, %v3469_v47 }
 0x5af   : > { %v3471_v2 = vpop.permute.xlu1 %3470  ;;  %3714 = vrot.lane.b32.xlu0 %v7796_v0, %s5733_s11 }
 0x5b0   : > { %5075 = vst.msk [vmem:[%s7790_s8 + $0x11c] sm:$0xf] %vm1200_vm0, %v3471_v2 }
 0x5b1   : > { %3716 = vrot.lane.b32.xlu1 %v7800_v58, %s5733_s11  ;;  %v3473_v4 = vpop.permute.xlu0 %3472 }
 0x5b2   : > { %5076 = vst.msk [vmem:[%s7790_s8 + $0x120] sm:$0xf] %vm1200_vm0, %v3473_v4 }
 0x5b3   : > { %v3475_v28 = vpop.permute.xlu1 %3474  ;;  %3718 = vrot.lane.b32.xlu0 %v7794_v33, %s5733_s11 }
 0x5b4   : > { %5077 = vst.msk [vmem:[%s7790_s8 + $0x124] sm:$0xf] %vm1200_vm0, %v3475_v28 }
 0x5b5   : > { %3720 = vrot.lane.b32.xlu1 %v7798_v44, %s5733_s11  ;;  %v3477_v54 = vpop.permute.xlu0 %3476 }
 0x5b6   : > { %5078 = vst.msk [vmem:[%s7790_s8 + $0x128] sm:$0xf] %vm1200_vm0, %v3477_v54 }
 0x5b7   : > { %v3479_v40 = vpop.permute.xlu1 %3478  ;;  %3722 = vrot.lane.b32.xlu0 %v7831_v15, %s5733_s11 }
 0x5b8   : > { %5079 = vst.msk [vmem:[%s7790_s8 + $0x12c] sm:$0xf] %vm1200_vm0, %v3479_v40 }
 0x5b9   : > { %3724 = vrot.lane.b32.xlu1 %v7846_v7, %s5733_s11  ;;  %v3481_v53 = vpop.permute.xlu0 %3480 }
 0x5ba   : > { %5080 = vst.msk [vmem:[%s7790_s8 + $0x130] sm:$0xf] %vm1200_vm0, %v3481_v53 }
 0x5bb   : > { %v3483_v13 = vpop.permute.xlu1 %3482  ;;  %3726 = vrot.lane.b32.xlu0 %v7826_v59, %s5733_s11 }
 0x5bc   : > { %5081 = vst.msk [vmem:[%s7790_s8 + $0x134] sm:$0xf] %vm1200_vm0, %v3483_v13 }
 0x5bd   : > { %3728 = vrot.lane.b32.xlu1 %v7839_v1, %s5733_s11  ;;  %v3485_v46 = vpop.permute.xlu0 %3484 }
 0x5be   : > { %5082 = vst.msk [vmem:[%s7790_s8 + $0x138] sm:$0xf] %vm1200_vm0, %v3485_v46 }
 0x5bf   : > { %v3487_v25 = vpop.permute.xlu1 %3486  ;;  %3730 = vrot.lane.b32.xlu0 %v7871_v23, %s5733_s11 }
 0x5c0   : > { %5083 = vst.msk [vmem:[%s7790_s8 + $0x13c] sm:$0xf] %vm1200_vm0, %v3487_v25 }
 0x5c1   : > { %3732 = vrot.lane.b32.xlu1 %v7886_v43, %s5733_s11  ;;  %v3489_v30 = vpop.permute.xlu0 %3488 }
 0x5c2   : > { %5084 = vst.msk [vmem:[%s7790_s8 + $0x140] sm:$0xf] %vm1200_vm0, %v3489_v30 }
 0x5c3   : > { %v3491_v48 = vpop.permute.xlu1 %3490  ;;  %3734 = vrot.lane.b32.xlu0 %v7866_v57, %s5733_s11 }
 0x5c4   : > { %5085 = vst.msk [vmem:[%s7790_s8 + $0x144] sm:$0xf] %vm1200_vm0, %v3491_v48 }
 0x5c5   : > { %3736 = vrot.lane.b32.xlu1 %v7879_v27, %s5733_s11  ;;  %v3493_v17 = vpop.permute.xlu0 %3492 }
 0x5c6   : > { %5086 = vst.msk [vmem:[%s7790_s8 + $0x148] sm:$0xf] %vm1200_vm0, %v3493_v17 }
 0x5c7   : > { %v3495_v51 = vpop.permute.xlu1 %3494  ;;  %3738 = vrot.lane.b32.xlu0 %v7911_v22, %s5733_s11 }
 0x5c8   : > { %5087 = vst.msk [vmem:[%s7790_s8 + $0x14c] sm:$0xf] %vm1200_vm0, %v3495_v51 }
 0x5c9   : > { %3740 = vrot.lane.b32.xlu1 %v7926_v39, %s5733_s11  ;;  %v3497_v60 = vpop.permute.xlu0 %3496 }
 0x5ca   : > { %5088 = vst.msk [vmem:[%s7790_s8 + $0x150] sm:$0xf] %vm1200_vm0, %v3497_v60 }
 0x5cb   : > { %v3499_v63 = vpop.permute.xlu1 %3498  ;;  %3742 = vrot.lane.b32.xlu0 %v7906_v14, %s5733_s11 }
 0x5cc   : > { %5089 = vst.msk [vmem:[%s7790_s8 + $0x154] sm:$0xf] %vm1200_vm0, %v3499_v63 }
 0x5cd   : > { %3744 = vrot.lane.b32.xlu1 %v7919_v38, %s5733_s11  ;;  %v3501_v9 = vpop.permute.xlu0 %3500 }
 0x5ce   : > { %5090 = vst.msk [vmem:[%s7790_s8 + $0x158] sm:$0xf] %vm1200_vm0, %v3501_v9 }
 0x5cf   : > { %v3503_v12 = vpop.permute.xlu1 %3502  ;;  %3746 = vrot.lane.b32.xlu0 %v7951_v62, %s5733_s11 }
 0x5d0   : > { %5091 = vst.msk [vmem:[%s7790_s8 + $0x15c] sm:$0xf] %vm1200_vm0, %v3503_v12 }
 0x5d1   : > { %3748 = vrot.lane.b32.xlu1 %v7966_v5, %s5733_s11  ;;  %v3505_v21 = vpop.permute.xlu0 %3504 }
 0x5d2   : > { %5092 = vst.msk [vmem:[%s7790_s8 + $0x160] sm:$0xf] %vm1200_vm0, %v3505_v21 }
 0x5d3   : > { %v3507_v24 = vpop.permute.xlu1 %3506  ;;  %3750 = vrot.lane.b32.xlu0 %v7946_v18, %s5733_s11 }
 0x5d4   : > { %5093 = vst.msk [vmem:[%s7790_s8 + $0x164] sm:$0xf] %vm1200_vm0, %v3507_v24 }
 0x5d5   : > { %3752 = vrot.lane.b32.xlu1 %v7959_v32, %s5733_s11  ;;  %v3509_v36 = vpop.permute.xlu0 %3508 }
 0x5d6   : > { %5094 = vst.msk [vmem:[%s7790_s8 + $0x168] sm:$0xf] %vm1200_vm0, %v3509_v36 }
 0x5d7   : > { %v3511_v41 = vpop.permute.xlu1 %3510  ;;  %3754 = vrot.lane.b32.xlu0 %v7991_v11, %s5733_s11 }
 0x5d8   : > { %5095 = vst.msk [vmem:[%s7790_s8 + $0x16c] sm:$0xf] %vm1200_vm0, %v3511_v41 }
 0x5d9   : > { %3756 = vrot.lane.b32.xlu1 %v9309_v52, %s5733_s11  ;;  %v3513_v56 = vpop.permute.xlu0 %3512 }
 0x5da   : > { %5096 = vst.msk [vmem:[%s7790_s8 + $0x170] sm:$0xf] %vm1200_vm0, %v3513_v56 }
 0x5db   : > { %v3515_v6 = vpop.permute.xlu1 %3514  ;;  %3758 = vrot.lane.b32.xlu0 %v9310_v10, %s5733_s11 }
 0x5dc   : > { %5097 = vst.msk [vmem:[%s7790_s8 + $0x174] sm:$0xf] %vm1200_vm0, %v3515_v6 }
 0x5dd   : > { %3760 = vrot.lane.b32.xlu1 %v9311_v20, %s5733_s11  ;;  %v3517_v26 = vpop.permute.xlu0 %3516 }
 0x5de   : > { %5098 = vst.msk [vmem:[%s7790_s8 + $0x178] sm:$0xf] %vm1200_vm0, %v3517_v26 }
 0x5df   : > { %v3519_v42 = vpop.permute.xlu1 %3518  ;;  %3762 = vrot.lane.b32.xlu0 %v9312_v45, %s5733_s11 }
 0x5e0   : > { %5099 = vst.msk [vmem:[%s7790_s8 + $0x17c] sm:$0xf] %vm1200_vm0, %v3519_v42 }
 0x5e1   : > { %3764 = vrot.lane.b32.xlu1 %v9313_v61, %s5733_s11  ;;  %v3586_v3 = vpop.permute.xlu0 %3585 }
 0x5e2   : > { %5100 = vst.msk [vmem:[%s7790_s8 + $0x180] sm:$0xf] %vm1200_vm0, %v3586_v3 }
 0x5e3   : > { %v3588_v49 = vpop.permute.xlu1 %3587  ;;  %3766 = vrot.lane.b32.xlu0 %v9314_v31, %s5733_s11 }
 0x5e4   : > { %5101 = vst.msk [vmem:[%s7790_s8 + $0x184] sm:$0xf] %vm1200_vm0, %v3588_v49 }
 0x5e5   : > { %3768 = vrot.lane.b32.xlu1 %v9315_v35, %s5733_s11  ;;  %v3590_v50 = vpop.permute.xlu0 %3589 }
 0x5e6   : > { %5102 = vst.msk [vmem:[%s7790_s8 + $0x188] sm:$0xf] %vm1200_vm0, %v3590_v50 }
 0x5e7   : > { %v3592_v29 = vpop.permute.xlu1 %3591  ;;  %3770 = vrot.lane.b32.xlu0 %v8071_v16, %s5733_s11 }
 0x5e8   : > { %5103 = vst.msk [vmem:[%s7790_s8 + $0x18c] sm:$0xf] %vm1200_vm0, %v3592_v29 }
 0x5e9   : > { %3772 = vrot.lane.b32.xlu1 %v8086_v19, %s5733_s11  ;;  %v3594_v55 = vpop.permute.xlu0 %3593 }
 0x5ea   : > { %5104 = vst.msk [vmem:[%s7790_s8 + $0x190] sm:$0xf] %vm1200_vm0, %v3594_v55 }
 0x5eb   : > { %v3596_v34 = vpop.permute.xlu1 %3595  ;;  %3774 = vrot.lane.b32.xlu0 %v8066_v37, %s5733_s11 }
 0x5ec   : > { %5105 = vst.msk [vmem:[%s7790_s8 + $0x194] sm:$0xf] %vm1200_vm0, %v3596_v34 }
 0x5ed   : > { %3776 = vrot.lane.b32.xlu1 %v8079_v8, %s5733_s11  ;;  %v3598_v47 = vpop.permute.xlu0 %3597 }
 0x5ee   : > { %5106 = vst.msk [vmem:[%s7790_s8 + $0x198] sm:$0xf] %vm1200_vm0, %v3598_v47 }
 0x5ef   : > { %v3600_v2 = vpop.permute.xlu1 %3599  ;;  %3843 = vrot.lane.b32.xlu0 %v7796_v0, %s5734_s12 }
 0x5f0   : > { %5107 = vst.msk [vmem:[%s7790_s8 + $0x19c] sm:$0xf] %vm1200_vm0, %v3600_v2 }
 0x5f1   : > { %3845 = vrot.lane.b32.xlu1 %v7800_v58, %s5734_s12  ;;  %v3602_v4 = vpop.permute.xlu0 %3601 }
 0x5f2   : > { %5108 = vst.msk [vmem:[%s7790_s8 + $0x1a0] sm:$0xf] %vm1200_vm0, %v3602_v4 }
 0x5f3   : > { %v3604_v28 = vpop.permute.xlu1 %3603  ;;  %3847 = vrot.lane.b32.xlu0 %v7794_v33, %s5734_s12 }
 0x5f4   : > { %5109 = vst.msk [vmem:[%s7790_s8 + $0x1a4] sm:$0xf] %vm1200_vm0, %v3604_v28 }
 0x5f5   : > { %3849 = vrot.lane.b32.xlu1 %v7798_v44, %s5734_s12  ;;  %v3606_v54 = vpop.permute.xlu0 %3605 }
 0x5f6   : > { %5110 = vst.msk [vmem:[%s7790_s8 + $0x1a8] sm:$0xf] %vm1200_vm0, %v3606_v54 }
 0x5f7   : > { %v3608_v40 = vpop.permute.xlu1 %3607  ;;  %3851 = vrot.lane.b32.xlu0 %v7831_v15, %s5734_s12 }
 0x5f8   : > { %5111 = vst.msk [vmem:[%s7790_s8 + $0x1ac] sm:$0xf] %vm1200_vm0, %v3608_v40 }
 0x5f9   : > { %3853 = vrot.lane.b32.xlu1 %v7846_v7, %s5734_s12  ;;  %v3610_v53 = vpop.permute.xlu0 %3609 }
 0x5fa   : > { %5112 = vst.msk [vmem:[%s7790_s8 + $0x1b0] sm:$0xf] %vm1200_vm0, %v3610_v53 }
 0x5fb   : > { %v3612_v13 = vpop.permute.xlu1 %3611  ;;  %3855 = vrot.lane.b32.xlu0 %v7826_v59, %s5734_s12 }
 0x5fc   : > { %5113 = vst.msk [vmem:[%s7790_s8 + $0x1b4] sm:$0xf] %vm1200_vm0, %v3612_v13 }
 0x5fd   : > { %3857 = vrot.lane.b32.xlu1 %v7839_v1, %s5734_s12  ;;  %v3614_v46 = vpop.permute.xlu0 %3613 }
 0x5fe   : > { %5114 = vst.msk [vmem:[%s7790_s8 + $0x1b8] sm:$0xf] %vm1200_vm0, %v3614_v46 }
 0x5ff   : > { %v3616_v25 = vpop.permute.xlu1 %3615  ;;  %3859 = vrot.lane.b32.xlu0 %v7871_v23, %s5734_s12 }
 0x600   : > { %5115 = vst.msk [vmem:[%s7790_s8 + $0x1bc] sm:$0xf] %vm1200_vm0, %v3616_v25 }
 0x601   : > { %3861 = vrot.lane.b32.xlu1 %v7886_v43, %s5734_s12  ;;  %v3618_v30 = vpop.permute.xlu0 %3617 }
 0x602   : > { %5116 = vst.msk [vmem:[%s7790_s8 + $0x1c0] sm:$0xf] %vm1200_vm0, %v3618_v30 }
 0x603   : > { %v3620_v48 = vpop.permute.xlu1 %3619  ;;  %3863 = vrot.lane.b32.xlu0 %v7866_v57, %s5734_s12 }
 0x604   : > { %5117 = vst.msk [vmem:[%s7790_s8 + $0x1c4] sm:$0xf] %vm1200_vm0, %v3620_v48 }
 0x605   : > { %3865 = vrot.lane.b32.xlu1 %v7879_v27, %s5734_s12  ;;  %v3622_v17 = vpop.permute.xlu0 %3621 }
 0x606   : > { %5118 = vst.msk [vmem:[%s7790_s8 + $0x1c8] sm:$0xf] %vm1200_vm0, %v3622_v17 }
 0x607   : > { %v3624_v51 = vpop.permute.xlu1 %3623  ;;  %3867 = vrot.lane.b32.xlu0 %v7911_v22, %s5734_s12 }
 0x608   : > { %5119 = vst.msk [vmem:[%s7790_s8 + $0x1cc] sm:$0xf] %vm1200_vm0, %v3624_v51 }
 0x609   : > { %3869 = vrot.lane.b32.xlu1 %v7926_v39, %s5734_s12  ;;  %v3626_v60 = vpop.permute.xlu0 %3625 }
 0x60a   : > { %5120 = vst.msk [vmem:[%s7790_s8 + $0x1d0] sm:$0xf] %vm1200_vm0, %v3626_v60 }
 0x60b   : > { %v3628_v63 = vpop.permute.xlu1 %3627  ;;  %3871 = vrot.lane.b32.xlu0 %v7906_v14, %s5734_s12 }
 0x60c   : > { %5121 = vst.msk [vmem:[%s7790_s8 + $0x1d4] sm:$0xf] %vm1200_vm0, %v3628_v63 }
 0x60d   : > { %3873 = vrot.lane.b32.xlu1 %v7919_v38, %s5734_s12  ;;  %v3630_v9 = vpop.permute.xlu0 %3629 }
 0x60e   : > { %5122 = vst.msk [vmem:[%s7790_s8 + $0x1d8] sm:$0xf] %vm1200_vm0, %v3630_v9 }
 0x60f   : > { %v3632_v12 = vpop.permute.xlu1 %3631  ;;  %3875 = vrot.lane.b32.xlu0 %v7951_v62, %s5734_s12 }
 0x610   : > { %5123 = vst.msk [vmem:[%s7790_s8 + $0x1dc] sm:$0xf] %vm1200_vm0, %v3632_v12 }
 0x611   : > { %3877 = vrot.lane.b32.xlu1 %v7966_v5, %s5734_s12  ;;  %v3634_v21 = vpop.permute.xlu0 %3633 }
 0x612   : > { %5124 = vst.msk [vmem:[%s7790_s8 + $0x1e0] sm:$0xf] %vm1200_vm0, %v3634_v21 }
 0x613   : > { %v3636_v24 = vpop.permute.xlu1 %3635  ;;  %3879 = vrot.lane.b32.xlu0 %v7946_v18, %s5734_s12 }
 0x614   : > { %5125 = vst.msk [vmem:[%s7790_s8 + $0x1e4] sm:$0xf] %vm1200_vm0, %v3636_v24 }
 0x615   : > { %3881 = vrot.lane.b32.xlu1 %v7959_v32, %s5734_s12  ;;  %v3638_v36 = vpop.permute.xlu0 %3637 }
 0x616   : > { %5126 = vst.msk [vmem:[%s7790_s8 + $0x1e8] sm:$0xf] %vm1200_vm0, %v3638_v36 }
 0x617   : > { %v3640_v41 = vpop.permute.xlu1 %3639  ;;  %3883 = vrot.lane.b32.xlu0 %v7991_v11, %s5734_s12 }
 0x618   : > { %5127 = vst.msk [vmem:[%s7790_s8 + $0x1ec] sm:$0xf] %vm1200_vm0, %v3640_v41 }
 0x619   : > { %3885 = vrot.lane.b32.xlu1 %v9309_v52, %s5734_s12  ;;  %v3642_v56 = vpop.permute.xlu0 %3641 }
 0x61a   : > { %5128 = vst.msk [vmem:[%s7790_s8 + $0x1f0] sm:$0xf] %vm1200_vm0, %v3642_v56 }
 0x61b   : > { %v3644_v6 = vpop.permute.xlu1 %3643  ;;  %3887 = vrot.lane.b32.xlu0 %v9310_v10, %s5734_s12 }
 0x61c   : > { %5129 = vst.msk [vmem:[%s7790_s8 + $0x1f4] sm:$0xf] %vm1200_vm0, %v3644_v6 }
 0x61d   : > { %3889 = vrot.lane.b32.xlu1 %v9311_v20, %s5734_s12  ;;  %v3646_v26 = vpop.permute.xlu0 %3645 }
 0x61e   : > { %5130 = vst.msk [vmem:[%s7790_s8 + $0x1f8] sm:$0xf] %vm1200_vm0, %v3646_v26 }
 0x61f   : > { %v3648_v42 = vpop.permute.xlu1 %3647  ;;  %3891 = vrot.lane.b32.xlu0 %v9312_v45, %s5734_s12 }
 0x620   : > { %5131 = vst.msk [vmem:[%s7790_s8 + $0x1fc] sm:$0xf] %vm1200_vm0, %v3648_v42 }
 0x621   : > { %3893 = vrot.lane.b32.xlu1 %v9313_v61, %s5734_s12  ;;  %v3715_v3 = vpop.permute.xlu0 %3714 }
 0x622   : > { %5132 = vst.msk [vmem:[%s7790_s8 + $0x200] sm:$0xf] %vm1200_vm0, %v3715_v3 }
 0x623   : > { %v3717_v49 = vpop.permute.xlu1 %3716  ;;  %3895 = vrot.lane.b32.xlu0 %v9314_v31, %s5734_s12 }
 0x624   : > { %5133 = vst.msk [vmem:[%s7790_s8 + $0x204] sm:$0xf] %vm1200_vm0, %v3717_v49 }
 0x625   : > { %3897 = vrot.lane.b32.xlu1 %v9315_v35, %s5734_s12  ;;  %v3719_v50 = vpop.permute.xlu0 %3718 }
 0x626   : > { %5134 = vst.msk [vmem:[%s7790_s8 + $0x208] sm:$0xf] %vm1200_vm0, %v3719_v50 }
 0x627   : > { %v3721_v29 = vpop.permute.xlu1 %3720  ;;  %3899 = vrot.lane.b32.xlu0 %v8071_v16, %s5734_s12 }
 0x628   : > { %5135 = vst.msk [vmem:[%s7790_s8 + $0x20c] sm:$0xf] %vm1200_vm0, %v3721_v29 }
 0x629   : > { %3901 = vrot.lane.b32.xlu1 %v8086_v19, %s5734_s12  ;;  %v3723_v55 = vpop.permute.xlu0 %3722 }
 0x62a   : > { %5136 = vst.msk [vmem:[%s7790_s8 + $0x210] sm:$0xf] %vm1200_vm0, %v3723_v55 }
 0x62b   : > { %v3725_v34 = vpop.permute.xlu1 %3724  ;;  %3903 = vrot.lane.b32.xlu0 %v8066_v37, %s5734_s12 }
 0x62c   : > { %5137 = vst.msk [vmem:[%s7790_s8 + $0x214] sm:$0xf] %vm1200_vm0, %v3725_v34 }
 0x62d   : > { %3905 = vrot.lane.b32.xlu1 %v8079_v8, %s5734_s12  ;;  %v3727_v47 = vpop.permute.xlu0 %3726 }
 0x62e   : > { %5138 = vst.msk [vmem:[%s7790_s8 + $0x218] sm:$0xf] %vm1200_vm0, %v3727_v47 }
 0x62f   : > { %v3729_v2 = vpop.permute.xlu1 %3728  ;;  %3972 = vrot.lane.b32.xlu0 %v7796_v0, %s5735_s24 }
 0x630   : > { %5139 = vst.msk [vmem:[%s7790_s8 + $0x21c] sm:$0xf] %vm1200_vm0, %v3729_v2 }
 0x631   : > { %3974 = vrot.lane.b32.xlu1 %v7800_v58, %s5735_s24  ;;  %v3731_v4 = vpop.permute.xlu0 %3730 }
 0x632   : > { %5140 = vst.msk [vmem:[%s7790_s8 + $0x220] sm:$0xf] %vm1200_vm0, %v3731_v4 }
 0x633   : > { %v3733_v28 = vpop.permute.xlu1 %3732  ;;  %3976 = vrot.lane.b32.xlu0 %v7794_v33, %s5735_s24 }
 0x634   : > { %5141 = vst.msk [vmem:[%s7790_s8 + $0x224] sm:$0xf] %vm1200_vm0, %v3733_v28 }
 0x635   : > { %3978 = vrot.lane.b32.xlu1 %v7798_v44, %s5735_s24  ;;  %v3735_v54 = vpop.permute.xlu0 %3734 }
 0x636   : > { %5142 = vst.msk [vmem:[%s7790_s8 + $0x228] sm:$0xf] %vm1200_vm0, %v3735_v54 }
 0x637   : > { %v3737_v40 = vpop.permute.xlu1 %3736  ;;  %3980 = vrot.lane.b32.xlu0 %v7831_v15, %s5735_s24 }
 0x638   : > { %5143 = vst.msk [vmem:[%s7790_s8 + $0x22c] sm:$0xf] %vm1200_vm0, %v3737_v40 }
 0x639   : > { %3982 = vrot.lane.b32.xlu1 %v7846_v7, %s5735_s24  ;;  %v3739_v53 = vpop.permute.xlu0 %3738 }
 0x63a   : > { %5144 = vst.msk [vmem:[%s7790_s8 + $0x230] sm:$0xf] %vm1200_vm0, %v3739_v53 }
 0x63b   : > { %v3741_v13 = vpop.permute.xlu1 %3740  ;;  %3984 = vrot.lane.b32.xlu0 %v7826_v59, %s5735_s24 }
 0x63c   : > { %5145 = vst.msk [vmem:[%s7790_s8 + $0x234] sm:$0xf] %vm1200_vm0, %v3741_v13 }
 0x63d   : > { %3986 = vrot.lane.b32.xlu1 %v7839_v1, %s5735_s24  ;;  %v3743_v46 = vpop.permute.xlu0 %3742 }
 0x63e   : > { %5146 = vst.msk [vmem:[%s7790_s8 + $0x238] sm:$0xf] %vm1200_vm0, %v3743_v46 }
 0x63f   : > { %v3745_v25 = vpop.permute.xlu1 %3744  ;;  %3988 = vrot.lane.b32.xlu0 %v7871_v23, %s5735_s24 }
 0x640   : > { %5147 = vst.msk [vmem:[%s7790_s8 + $0x23c] sm:$0xf] %vm1200_vm0, %v3745_v25 }
 0x641   : > { %3990 = vrot.lane.b32.xlu1 %v7886_v43, %s5735_s24  ;;  %v3747_v30 = vpop.permute.xlu0 %3746 }
 0x642   : > { %5148 = vst.msk [vmem:[%s7790_s8 + $0x240] sm:$0xf] %vm1200_vm0, %v3747_v30 }
 0x643   : > { %v3749_v48 = vpop.permute.xlu1 %3748  ;;  %3992 = vrot.lane.b32.xlu0 %v7866_v57, %s5735_s24 }
 0x644   : > { %5149 = vst.msk [vmem:[%s7790_s8 + $0x244] sm:$0xf] %vm1200_vm0, %v3749_v48 }
 0x645   : > { %3994 = vrot.lane.b32.xlu1 %v7879_v27, %s5735_s24  ;;  %v3751_v17 = vpop.permute.xlu0 %3750 }
 0x646   : > { %5150 = vst.msk [vmem:[%s7790_s8 + $0x248] sm:$0xf] %vm1200_vm0, %v3751_v17 }
 0x647   : > { %v3753_v51 = vpop.permute.xlu1 %3752  ;;  %3996 = vrot.lane.b32.xlu0 %v7911_v22, %s5735_s24 }
 0x648   : > { %5151 = vst.msk [vmem:[%s7790_s8 + $0x24c] sm:$0xf] %vm1200_vm0, %v3753_v51 }
 0x649   : > { %3998 = vrot.lane.b32.xlu1 %v7926_v39, %s5735_s24  ;;  %v3755_v60 = vpop.permute.xlu0 %3754 }
 0x64a   : > { %5152 = vst.msk [vmem:[%s7790_s8 + $0x250] sm:$0xf] %vm1200_vm0, %v3755_v60 }
 0x64b   : > { %v3757_v63 = vpop.permute.xlu1 %3756  ;;  %4000 = vrot.lane.b32.xlu0 %v7906_v14, %s5735_s24 }
 0x64c   : > { %5153 = vst.msk [vmem:[%s7790_s8 + $0x254] sm:$0xf] %vm1200_vm0, %v3757_v63 }
 0x64d   : > { %4002 = vrot.lane.b32.xlu1 %v7919_v38, %s5735_s24  ;;  %v3759_v9 = vpop.permute.xlu0 %3758 }
 0x64e   : > { %5154 = vst.msk [vmem:[%s7790_s8 + $0x258] sm:$0xf] %vm1200_vm0, %v3759_v9 }
 0x64f   : > { %v3761_v12 = vpop.permute.xlu1 %3760  ;;  %4004 = vrot.lane.b32.xlu0 %v7951_v62, %s5735_s24 }
 0x650   : > { %5155 = vst.msk [vmem:[%s7790_s8 + $0x25c] sm:$0xf] %vm1200_vm0, %v3761_v12 }
 0x651   : > { %4006 = vrot.lane.b32.xlu1 %v7966_v5, %s5735_s24  ;;  %v3763_v21 = vpop.permute.xlu0 %3762 }
 0x652   : > { %5156 = vst.msk [vmem:[%s7790_s8 + $0x260] sm:$0xf] %vm1200_vm0, %v3763_v21 }
 0x653   : > { %v3765_v24 = vpop.permute.xlu1 %3764  ;;  %4008 = vrot.lane.b32.xlu0 %v7946_v18, %s5735_s24 }
 0x654   : > { %5157 = vst.msk [vmem:[%s7790_s8 + $0x264] sm:$0xf] %vm1200_vm0, %v3765_v24 }
 0x655   : > { %4010 = vrot.lane.b32.xlu1 %v7959_v32, %s5735_s24  ;;  %v3767_v36 = vpop.permute.xlu0 %3766 }
 0x656   : > { %5158 = vst.msk [vmem:[%s7790_s8 + $0x268] sm:$0xf] %vm1200_vm0, %v3767_v36 }
 0x657   : > { %v3769_v41 = vpop.permute.xlu1 %3768  ;;  %4012 = vrot.lane.b32.xlu0 %v7991_v11, %s5735_s24 }
 0x658   : > { %5159 = vst.msk [vmem:[%s7790_s8 + $0x26c] sm:$0xf] %vm1200_vm0, %v3769_v41 }
 0x659   : > { %4014 = vrot.lane.b32.xlu1 %v9309_v52, %s5735_s24  ;;  %v3771_v56 = vpop.permute.xlu0 %3770 }
 0x65a   : > { %5160 = vst.msk [vmem:[%s7790_s8 + $0x270] sm:$0xf] %vm1200_vm0, %v3771_v56 }
 0x65b   : > { %v3773_v6 = vpop.permute.xlu1 %3772  ;;  %4016 = vrot.lane.b32.xlu0 %v9310_v10, %s5735_s24 }
 0x65c   : > { %5161 = vst.msk [vmem:[%s7790_s8 + $0x274] sm:$0xf] %vm1200_vm0, %v3773_v6 }
 0x65d   : > { %4018 = vrot.lane.b32.xlu1 %v9311_v20, %s5735_s24  ;;  %v3775_v26 = vpop.permute.xlu0 %3774 }
 0x65e   : > { %5162 = vst.msk [vmem:[%s7790_s8 + $0x278] sm:$0xf] %vm1200_vm0, %v3775_v26 }
 0x65f   : > { %v3777_v42 = vpop.permute.xlu1 %3776  ;;  %4020 = vrot.lane.b32.xlu0 %v9312_v45, %s5735_s24 }
 0x660   : > { %5163 = vst.msk [vmem:[%s7790_s8 + $0x27c] sm:$0xf] %vm1200_vm0, %v3777_v42 }
 0x661   : > { %4022 = vrot.lane.b32.xlu1 %v9313_v61, %s5735_s24  ;;  %v3844_v3 = vpop.permute.xlu0 %3843 }
 0x662   : > { %5164 = vst.msk [vmem:[%s7790_s8 + $0x280] sm:$0xf] %vm1200_vm0, %v3844_v3 }
 0x663   : > { %v3846_v49 = vpop.permute.xlu1 %3845  ;;  %4024 = vrot.lane.b32.xlu0 %v9314_v31, %s5735_s24 }
 0x664   : > { %5165 = vst.msk [vmem:[%s7790_s8 + $0x284] sm:$0xf] %vm1200_vm0, %v3846_v49 }
 0x665   : > { %4026 = vrot.lane.b32.xlu1 %v9315_v35, %s5735_s24  ;;  %v3848_v50 = vpop.permute.xlu0 %3847 }
 0x666   : > { %5166 = vst.msk [vmem:[%s7790_s8 + $0x288] sm:$0xf] %vm1200_vm0, %v3848_v50 }
 0x667   : > { %v3850_v29 = vpop.permute.xlu1 %3849  ;;  %4028 = vrot.lane.b32.xlu0 %v8071_v16, %s5735_s24 }
 0x668   : > { %5167 = vst.msk [vmem:[%s7790_s8 + $0x28c] sm:$0xf] %vm1200_vm0, %v3850_v29 }
 0x669   : > { %4030 = vrot.lane.b32.xlu1 %v8086_v19, %s5735_s24  ;;  %v3852_v55 = vpop.permute.xlu0 %3851 }
 0x66a   : > { %5168 = vst.msk [vmem:[%s7790_s8 + $0x290] sm:$0xf] %vm1200_vm0, %v3852_v55 }
 0x66b   : > { %v3854_v34 = vpop.permute.xlu1 %3853  ;;  %4032 = vrot.lane.b32.xlu0 %v8066_v37, %s5735_s24 }
 0x66c   : > { %5169 = vst.msk [vmem:[%s7790_s8 + $0x294] sm:$0xf] %vm1200_vm0, %v3854_v34 }
 0x66d   : > { %4034 = vrot.lane.b32.xlu1 %v8079_v8, %s5735_s24  ;;  %v3856_v47 = vpop.permute.xlu0 %3855 }
 0x66e   : > { %5170 = vst.msk [vmem:[%s7790_s8 + $0x298] sm:$0xf] %vm1200_vm0, %v3856_v47 }
 0x66f   : > { %v3858_v2 = vpop.permute.xlu1 %3857  ;;  %4101 = vrot.lane.b32.xlu0 %v7796_v0, %s5736_s18 }
 0x670   : > { %5171 = vst.msk [vmem:[%s7790_s8 + $0x29c] sm:$0xf] %vm1200_vm0, %v3858_v2 }
 0x671   : > { %4103 = vrot.lane.b32.xlu1 %v7800_v58, %s5736_s18  ;;  %v3860_v4 = vpop.permute.xlu0 %3859 }
 0x672   : > { %5172 = vst.msk [vmem:[%s7790_s8 + $0x2a0] sm:$0xf] %vm1200_vm0, %v3860_v4 }
 0x673   : > { %v3862_v28 = vpop.permute.xlu1 %3861  ;;  %4105 = vrot.lane.b32.xlu0 %v7794_v33, %s5736_s18 }
 0x674   : > { %5173 = vst.msk [vmem:[%s7790_s8 + $0x2a4] sm:$0xf] %vm1200_vm0, %v3862_v28 }
 0x675   : > { %4107 = vrot.lane.b32.xlu1 %v7798_v44, %s5736_s18  ;;  %v3864_v0 = vpop.permute.xlu0 %3863 }
 0x676   : > { %5174 = vst.msk [vmem:[%s7790_s8 + $0x2a8] sm:$0xf] %vm1200_vm0, %v3864_v0 }
 0x677   : > { %v3866_v54 = vpop.permute.xlu1 %3865  ;;  %4109 = vrot.lane.b32.xlu0 %v7831_v15, %s5736_s18 }
 0x678   : > { %5175 = vst.msk [vmem:[%s7790_s8 + $0x2ac] sm:$0xf] %vm1200_vm0, %v3866_v54 }
 0x679   : > { %4111 = vrot.lane.b32.xlu1 %v7846_v7, %s5736_s18  ;;  %v3868_v33 = vpop.permute.xlu0 %3867 }
 0x67a   : > { %5176 = vst.msk [vmem:[%s7790_s8 + $0x2b0] sm:$0xf] %vm1200_vm0, %v3868_v33 }
 0x67b   : > { %v3870_v58 = vpop.permute.xlu1 %3869  ;;  %4113 = vrot.lane.b32.xlu0 %v7826_v59, %s5736_s18 }
 0x67c   : > { %5177 = vst.msk [vmem:[%s7790_s8 + $0x2b4] sm:$0xf] %vm1200_vm0, %v3870_v58 }
 0x67d   : > { %4115 = vrot.lane.b32.xlu1 %v7839_v1, %s5736_s18  ;;  %v3872_v44 = vpop.permute.xlu0 %3871 }
 0x67e   : > { %5178 = vst.msk [vmem:[%s7790_s8 + $0x2b8] sm:$0xf] %vm1200_vm0, %v3872_v44 }
 0x67f   : > { %v3874_v15 = vpop.permute.xlu1 %3873  ;;  %4117 = vrot.lane.b32.xlu0 %v7871_v23, %s5736_s18 }
 0x680   : > { %5179 = vst.msk [vmem:[%s7790_s8 + $0x2bc] sm:$0xf] %vm1200_vm0, %v3874_v15 }
 0x681   : > { %4119 = vrot.lane.b32.xlu1 %v7886_v43, %s5736_s18  ;;  %v3876_v59 = vpop.permute.xlu0 %3875 }
 0x682   : > { %5180 = vst.msk [vmem:[%s7790_s8 + $0x2c0] sm:$0xf] %vm1200_vm0, %v3876_v59 }
 0x683   : > { %v3878_v7 = vpop.permute.xlu1 %3877  ;;  %4121 = vrot.lane.b32.xlu0 %v7866_v57, %s5736_s18 }
 0x684   : > { %5181 = vst.msk [vmem:[%s7790_s8 + $0x2c4] sm:$0xf] %vm1200_vm0, %v3878_v7 }
 0x685   : > { %4123 = vrot.lane.b32.xlu1 %v7879_v27, %s5736_s18  ;;  %v3880_v1 = vpop.permute.xlu0 %3879 }
 0x686   : > { %5182 = vst.msk [vmem:[%s7790_s8 + $0x2c8] sm:$0xf] %vm1200_vm0, %v3880_v1 }
 0x687   : > { %v3882_v23 = vpop.permute.xlu1 %3881  ;;  %4125 = vrot.lane.b32.xlu0 %v7911_v22, %s5736_s18 }
 0x688   : > { %5183 = vst.msk [vmem:[%s7790_s8 + $0x2cc] sm:$0xf] %vm1200_vm0, %v3882_v23 }
 0x689   : > { %4127 = vrot.lane.b32.xlu1 %v7926_v39, %s5736_s18  ;;  %v3884_v57 = vpop.permute.xlu0 %3883 }
 0x68a   : > { %5184 = vst.msk [vmem:[%s7790_s8 + $0x2d0] sm:$0xf] %vm1200_vm0, %v3884_v57 }
 0x68b   : > { %v3886_v43 = vpop.permute.xlu1 %3885  ;;  %4129 = vrot.lane.b32.xlu0 %v7906_v14, %s5736_s18 }
 0x68c   : > { %5185 = vst.msk [vmem:[%s7790_s8 + $0x2d4] sm:$0xf] %vm1200_vm0, %v3886_v43 }
 0x68d   : > { %4131 = vrot.lane.b32.xlu1 %v7919_v38, %s5736_s18  ;;  %v3888_v27 = vpop.permute.xlu0 %3887 }
 0x68e   : > { %5186 = vst.msk [vmem:[%s7790_s8 + $0x2d8] sm:$0xf] %vm1200_vm0, %v3888_v27 }
 0x68f   : > { %v3890_v22 = vpop.permute.xlu1 %3889  ;;  %4133 = vrot.lane.b32.xlu0 %v7951_v62, %s5736_s18 }
 0x690   : > { %5187 = vst.msk [vmem:[%s7790_s8 + $0x2dc] sm:$0xf] %vm1200_vm0, %v3890_v22 }
 0x691   : > { %4135 = vrot.lane.b32.xlu1 %v7966_v5, %s5736_s18  ;;  %v3892_v14 = vpop.permute.xlu0 %3891 }
 0x692   : > { %5188 = vst.msk [vmem:[%s7790_s8 + $0x2e0] sm:$0xf] %vm1200_vm0, %v3892_v14 }
 0x693   : > { %v3894_v39 = vpop.permute.xlu1 %3893  ;;  %4137 = vrot.lane.b32.xlu0 %v7946_v18, %s5736_s18 }
 0x694   : > { %5189 = vst.msk [vmem:[%s7790_s8 + $0x2e4] sm:$0xf] %vm1200_vm0, %v3894_v39 }
 0x695   : > { %4139 = vrot.lane.b32.xlu1 %v7959_v32, %s5736_s18  ;;  %v3896_v38 = vpop.permute.xlu0 %3895 }
 0x696   : > { %5190 = vst.msk [vmem:[%s7790_s8 + $0x2e8] sm:$0xf] %vm1200_vm0, %v3896_v38 }
 0x697   : > { %v3898_v62 = vpop.permute.xlu1 %3897  ;;  %4141 = vrot.lane.b32.xlu0 %v7991_v11, %s5736_s18 }
 0x698   : > { %5191 = vst.msk [vmem:[%s7790_s8 + $0x2ec] sm:$0xf] %vm1200_vm0, %v3898_v62 }
 0x699   : > { %4143 = vrot.lane.b32.xlu1 %v9309_v52, %s5736_s18  ;;  %v3900_v18 = vpop.permute.xlu0 %3899 }
 0x69a   : > { %5192 = vst.msk [vmem:[%s7790_s8 + $0x2f0] sm:$0xf] %vm1200_vm0, %v3900_v18 }
 0x69b   : > { %v3902_v5 = vpop.permute.xlu1 %3901  ;;  %4145 = vrot.lane.b32.xlu0 %v9310_v10, %s5736_s18 }
 0x69c   : > { %5193 = vst.msk [vmem:[%s7790_s8 + $0x2f4] sm:$0xf] %vm1200_vm0, %v3902_v5 }
 0x69d   : > { %4147 = vrot.lane.b32.xlu1 %v9311_v20, %s5736_s18  ;;  %v3904_v32 = vpop.permute.xlu0 %3903 }
 0x69e   : > { %5194 = vst.msk [vmem:[%s7790_s8 + $0x2f8] sm:$0xf] %vm1200_vm0, %v3904_v32 }
 0x69f   : > { %v3906_v11 = vpop.permute.xlu1 %3905  ;;  %4149 = vrot.lane.b32.xlu0 %v9312_v45, %s5736_s18 }
 0x6a0   : > { %5195 = vst.msk [vmem:[%s7790_s8 + $0x2fc] sm:$0xf] %vm1200_vm0, %v3906_v11 }
 0x6a1   : > { %4151 = vrot.lane.b32.xlu1 %v9313_v61, %s5736_s18  ;;  %v3973_v52 = vpop.permute.xlu0 %3972 }
 0x6a2   : > { %5196 = vst.msk [vmem:[%s7790_s8 + $0x300] sm:$0xf] %vm1200_vm0, %v3973_v52 }
 0x6a3   : > { %v3975_v10 = vpop.permute.xlu1 %3974  ;;  %4153 = vrot.lane.b32.xlu0 %v9314_v31, %s5736_s18 }
 0x6a4   : > { %5197 = vst.msk [vmem:[%s7790_s8 + $0x304] sm:$0xf] %vm1200_vm0, %v3975_v10 }
 0x6a5   : > { %4155 = vrot.lane.b32.xlu1 %v9315_v35, %s5736_s18  ;;  %v3977_v20 = vpop.permute.xlu0 %3976 }
 0x6a6   : > { %5198 = vst.msk [vmem:[%s7790_s8 + $0x308] sm:$0xf] %vm1200_vm0, %v3977_v20 }
 0x6a7   : > { %v3979_v45 = vpop.permute.xlu1 %3978  ;;  %4157 = vrot.lane.b32.xlu0 %v8071_v16, %s5736_s18 }
 0x6a8   : > { %5199 = vst.msk [vmem:[%s7790_s8 + $0x30c] sm:$0xf] %vm1200_vm0, %v3979_v45 }
 0x6a9   : > { %4159 = vrot.lane.b32.xlu1 %v8086_v19, %s5736_s18  ;;  %v3981_v61 = vpop.permute.xlu0 %3980 }
 0x6aa   : > { %5200 = vst.msk [vmem:[%s7790_s8 + $0x310] sm:$0xf] %vm1200_vm0, %v3981_v61 }
 0x6ab   : > { %v3983_v31 = vpop.permute.xlu1 %3982  ;;  %4161 = vrot.lane.b32.xlu0 %v8066_v37, %s5736_s18 }
 0x6ac   : > { %5201 = vst.msk [vmem:[%s7790_s8 + $0x314] sm:$0xf] %vm1200_vm0, %v3983_v31 }
 0x6ad   : > { %4163 = vrot.lane.b32.xlu1 %v8079_v8, %s5736_s18  ;;  %v3985_v16 = vpop.permute.xlu0 %3984 }
 0x6ae   : > { %5202 = vst.msk [vmem:[%s7790_s8 + $0x318] sm:$0xf] %vm1200_vm0, %v3985_v16 }
 0x6af   : > { %v3987_v19 = vpop.permute.xlu1 %3986 }
 0x6b0   : > { %5203 = vst.msk [vmem:[%s7790_s8 + $0x31c] sm:$0xf] %vm1200_vm0, %v3987_v19 }
 0x6b1   : > { %v3989_v35 = vpop.permute.xlu0 %3988 }
 0x6b2   : > { %5204 = vst.msk [vmem:[%s7790_s8 + $0x320] sm:$0xf] %vm1200_vm0, %v3989_v35 }
 0x6b3   : > { %v3991_v37 = vpop.permute.xlu1 %3990 }
 0x6b4   : > { %5205 = vst.msk [vmem:[%s7790_s8 + $0x324] sm:$0xf] %vm1200_vm0, %v3991_v37 }
 0x6b5   : > { %v3993_v40 = vpop.permute.xlu0 %3992 }
 0x6b6   : > { %5206 = vst.msk [vmem:[%s7790_s8 + $0x328] sm:$0xf] %vm1200_vm0, %v3993_v40 }
 0x6b7   : > { %v3995_v8 = vpop.permute.xlu1 %3994 }
 0x6b8   : > { %5207 = vst.msk [vmem:[%s7790_s8 + $0x32c] sm:$0xf] %vm1200_vm0, %v3995_v8 }
 0x6b9   : > { %v3997_v53 = vpop.permute.xlu0 %3996 }
 0x6ba   : > { %5208 = vst.msk [vmem:[%s7790_s8 + $0x330] sm:$0xf] %vm1200_vm0, %v3997_v53 }
 0x6bb   : > { %v3999_v13 = vpop.permute.xlu1 %3998 }
 0x6bc   : > { %5209 = vst.msk [vmem:[%s7790_s8 + $0x334] sm:$0xf] %vm1200_vm0, %v3999_v13 }
 0x6bd   : > { %v4001_v46 = vpop.permute.xlu0 %4000 }
 0x6be   : > { %5210 = vst.msk [vmem:[%s7790_s8 + $0x338] sm:$0xf] %vm1200_vm0, %v4001_v46 }
 0x6bf   : > { %v4003_v25 = vpop.permute.xlu1 %4002 }
 0x6c0   : > { %5211 = vst.msk [vmem:[%s7790_s8 + $0x33c] sm:$0xf] %vm1200_vm0, %v4003_v25 }
 0x6c1   : > { %v4005_v30 = vpop.permute.xlu0 %4004 }
 0x6c2   : > { %5212 = vst.msk [vmem:[%s7790_s8 + $0x340] sm:$0xf] %vm1200_vm0, %v4005_v30 }
 0x6c3   : > { %v4007_v48 = vpop.permute.xlu1 %4006 }
 0x6c4   : > { %5213 = vst.msk [vmem:[%s7790_s8 + $0x344] sm:$0xf] %vm1200_vm0, %v4007_v48 }
 0x6c5   : > { %v4009_v17 = vpop.permute.xlu0 %4008 }
 0x6c6   : > { %5214 = vst.msk [vmem:[%s7790_s8 + $0x348] sm:$0xf] %vm1200_vm0, %v4009_v17 }
 0x6c7   : > { %v4011_v51 = vpop.permute.xlu1 %4010 }
 0x6c8   : > { %5215 = vst.msk [vmem:[%s7790_s8 + $0x34c] sm:$0xf] %vm1200_vm0, %v4011_v51 }
 0x6c9   : > { %v4013_v60 = vpop.permute.xlu0 %4012 }
 0x6ca   : > { %5216 = vst.msk [vmem:[%s7790_s8 + $0x350] sm:$0xf] %vm1200_vm0, %v4013_v60 }
 0x6cb   : > { %v4015_v63 = vpop.permute.xlu1 %4014 }
 0x6cc   : > { %5217 = vst.msk [vmem:[%s7790_s8 + $0x354] sm:$0xf] %vm1200_vm0, %v4015_v63 }
 0x6cd   : > { %v4017_v9 = vpop.permute.xlu0 %4016 }
 0x6ce   : > { %5218 = vst.msk [vmem:[%s7790_s8 + $0x358] sm:$0xf] %vm1200_vm0, %v4017_v9 }
 0x6cf   : > { %v4019_v12 = vpop.permute.xlu1 %4018 }
 0x6d0   : > { %5219 = vst.msk [vmem:[%s7790_s8 + $0x35c] sm:$0xf] %vm1200_vm0, %v4019_v12 }
 0x6d1   : > { %v4021_v21 = vpop.permute.xlu0 %4020 }
 0x6d2   : > { %5220 = vst.msk [vmem:[%s7790_s8 + $0x360] sm:$0xf] %vm1200_vm0, %v4021_v21 }
 0x6d3   : > { %v4023_v24 = vpop.permute.xlu1 %4022 }
 0x6d4   : > { %5221 = vst.msk [vmem:[%s7790_s8 + $0x364] sm:$0xf] %vm1200_vm0, %v4023_v24 }
 0x6d5   : > { %v4025_v36 = vpop.permute.xlu0 %4024 }
 0x6d6   : > { %5222 = vst.msk [vmem:[%s7790_s8 + $0x368] sm:$0xf] %vm1200_vm0, %v4025_v36 }
 0x6d7   : > { %v4027_v41 = vpop.permute.xlu1 %4026 }
 0x6d8   : > { %5223 = vst.msk [vmem:[%s7790_s8 + $0x36c] sm:$0xf] %vm1200_vm0, %v4027_v41 }
 0x6d9   : > { %v4029_v56 = vpop.permute.xlu0 %4028 }
 0x6da   : > { %5224 = vst.msk [vmem:[%s7790_s8 + $0x370] sm:$0xf] %vm1200_vm0, %v4029_v56 }
 0x6db   : > { %v4031_v6 = vpop.permute.xlu1 %4030 }
 0x6dc   : > { %5225 = vst.msk [vmem:[%s7790_s8 + $0x374] sm:$0xf] %vm1200_vm0, %v4031_v6 }
 0x6dd   : > { %v4033_v26 = vpop.permute.xlu0 %4032 }
 0x6de   : > { %5226 = vst.msk [vmem:[%s7790_s8 + $0x378] sm:$0xf] %vm1200_vm0, %v4033_v26 }
 0x6df   : > { %v4035_v42 = vpop.permute.xlu1 %4034 }
 0x6e0   : > { %5227 = vst.msk [vmem:[%s7790_s8 + $0x37c] sm:$0xf] %vm1200_vm0, %v4035_v42 }
 0x6e1   : > { %v4102_v3 = vpop.permute.xlu0 %4101 }
 0x6e2   : > { %5228 = vst.msk [vmem:[%s7790_s8 + $0x380] sm:$0xf] %vm1200_vm0, %v4102_v3 }
 0x6e3   : > { %v4104_v49 = vpop.permute.xlu1 %4103 }
 0x6e4   : > { %5229 = vst.msk [vmem:[%s7790_s8 + $0x384] sm:$0xf] %vm1200_vm0, %v4104_v49 }
 0x6e5   : > { %v4106_v50 = vpop.permute.xlu0 %4105 }
 0x6e6   : > { %5230 = vst.msk [vmem:[%s7790_s8 + $0x388] sm:$0xf] %vm1200_vm0, %v4106_v50 }
 0x6e7   : > { %v4108_v29 = vpop.permute.xlu1 %4107 }
 0x6e8   : > { %5231 = vst.msk [vmem:[%s7790_s8 + $0x38c] sm:$0xf] %vm1200_vm0, %v4108_v29 }
 0x6e9   : > { %v4110_v55 = vpop.permute.xlu0 %4109 }
 0x6ea   : > { %5232 = vst.msk [vmem:[%s7790_s8 + $0x390] sm:$0xf] %vm1200_vm0, %v4110_v55 }
 0x6eb   : > { %v4112_v34 = vpop.permute.xlu1 %4111 }
 0x6ec   : > { %5233 = vst.msk [vmem:[%s7790_s8 + $0x394] sm:$0xf] %vm1200_vm0, %v4112_v34 }
 0x6ed   : > { %v4114_v47 = vpop.permute.xlu0 %4113 }
 0x6ee   : > { %5234 = vst.msk [vmem:[%s7790_s8 + $0x398] sm:$0xf] %vm1200_vm0, %v4114_v47 }
 0x6ef   : > { %v4116_v2 = vpop.permute.xlu1 %4115 }
 0x6f0   : > { %5235 = vst.msk [vmem:[%s7790_s8 + $0x39c] sm:$0xf] %vm1200_vm0, %v4116_v2 }
 0x6f1   : > { %v4118_v4 = vpop.permute.xlu0 %4117 }
 0x6f2   : > { %5236 = vst.msk [vmem:[%s7790_s8 + $0x3a0] sm:$0xf] %vm1200_vm0, %v4118_v4 }
 0x6f3   : > { %v4120_v28 = vpop.permute.xlu1 %4119 }
 0x6f4   : > { %5237 = vst.msk [vmem:[%s7790_s8 + $0x3a4] sm:$0xf] %vm1200_vm0, %v4120_v28 }
 0x6f5   : > { %v4122_v0 = vpop.permute.xlu0 %4121 }
 0x6f6   : > { %5238 = vst.msk [vmem:[%s7790_s8 + $0x3a8] sm:$0xf] %vm1200_vm0, %v4122_v0 }
 0x6f7   : > { %v4124_v54 = vpop.permute.xlu1 %4123 }
 0x6f8   : > { %5239 = vst.msk [vmem:[%s7790_s8 + $0x3ac] sm:$0xf] %vm1200_vm0, %v4124_v54 }
 0x6f9   : > { %v4126_v33 = vpop.permute.xlu0 %4125 }
 0x6fa   : > { %5240 = vst.msk [vmem:[%s7790_s8 + $0x3b0] sm:$0xf] %vm1200_vm0, %v4126_v33 }
 0x6fb   : > { %v4128_v58 = vpop.permute.xlu1 %4127 }
 0x6fc   : > { %5241 = vst.msk [vmem:[%s7790_s8 + $0x3b4] sm:$0xf] %vm1200_vm0, %v4128_v58 }
 0x6fd   : > { %v4130_v44 = vpop.permute.xlu0 %4129 }
 0x6fe   : > { %5242 = vst.msk [vmem:[%s7790_s8 + $0x3b8] sm:$0xf] %vm1200_vm0, %v4130_v44 }
 0x6ff   : > { %v4132_v15 = vpop.permute.xlu1 %4131 }
 0x700   : > { %5243 = vst.msk [vmem:[%s7790_s8 + $0x3bc] sm:$0xf] %vm1200_vm0, %v4132_v15 }
 0x701   : > { %v4134_v59 = vpop.permute.xlu0 %4133 }
 0x702   : > { %5244 = vst.msk [vmem:[%s7790_s8 + $0x3c0] sm:$0xf] %vm1200_vm0, %v4134_v59 }
 0x703   : > { %v4136_v7 = vpop.permute.xlu1 %4135 }
 0x704   : > { %5245 = vst.msk [vmem:[%s7790_s8 + $0x3c4] sm:$0xf] %vm1200_vm0, %v4136_v7 }
 0x705   : > { %v4138_v1 = vpop.permute.xlu0 %4137 }
 0x706   : > { %5246 = vst.msk [vmem:[%s7790_s8 + $0x3c8] sm:$0xf] %vm1200_vm0, %v4138_v1 }
 0x707   : > { %v4140_v23 = vpop.permute.xlu1 %4139 }
 0x708   : > { %5247 = vst.msk [vmem:[%s7790_s8 + $0x3cc] sm:$0xf] %vm1200_vm0, %v4140_v23 }
 0x709   : > { %v4142_v57 = vpop.permute.xlu0 %4141 }
 0x70a   : > { %5248 = vst.msk [vmem:[%s7790_s8 + $0x3d0] sm:$0xf] %vm1200_vm0, %v4142_v57 }
 0x70b   : > { %v4144_v43 = vpop.permute.xlu1 %4143 }
 0x70c   : > { %5249 = vst.msk [vmem:[%s7790_s8 + $0x3d4] sm:$0xf] %vm1200_vm0, %v4144_v43 }
 0x70d   : > { %v4146_v27 = vpop.permute.xlu0 %4145 }
 0x70e   : > { %5250 = vst.msk [vmem:[%s7790_s8 + $0x3d8] sm:$0xf] %vm1200_vm0, %v4146_v27 }
 0x70f   : > { %v4148_v22 = vpop.permute.xlu1 %4147 }
 0x710   : > { %5251 = vst.msk [vmem:[%s7790_s8 + $0x3dc] sm:$0xf] %vm1200_vm0, %v4148_v22 }
 0x711   : > { %v4150_v14 = vpop.permute.xlu0 %4149 }
 0x712   : > { %5252 = vst.msk [vmem:[%s7790_s8 + $0x3e0] sm:$0xf] %vm1200_vm0, %v4150_v14 }
 0x713   : > { %v4152_v39 = vpop.permute.xlu1 %4151 }
 0x714   : > { %5253 = vst.msk [vmem:[%s7790_s8 + $0x3e4] sm:$0xf] %vm1200_vm0, %v4152_v39 }
 0x715   : > { %v4154_v38 = vpop.permute.xlu0 %4153 }
 0x716   : > { %5254 = vst.msk [vmem:[%s7790_s8 + $0x3e8] sm:$0xf] %vm1200_vm0, %v4154_v38 }
 0x717   : > { %v4156_v62 = vpop.permute.xlu1 %4155 }
 0x718   : > { %5255 = vst.msk [vmem:[%s7790_s8 + $0x3ec] sm:$0xf] %vm1200_vm0, %v4156_v62 }
 0x719   : > { %v4158_v18 = vpop.permute.xlu0 %4157 }
 0x71a   : > { %5256 = vst.msk [vmem:[%s7790_s8 + $0x3f0] sm:$0xf] %vm1200_vm0, %v4158_v18 }
 0x71b   : > { %v4160_v5 = vpop.permute.xlu1 %4159 }
 0x71c   : > { %5257 = vst.msk [vmem:[%s7790_s8 + $0x3f4] sm:$0xf] %vm1200_vm0, %v4160_v5 }
 0x71d   : > { %v4162_v32 = vpop.permute.xlu0 %4161 }
 0x71e   : > { %5258 = vst.msk [vmem:[%s7790_s8 + $0x3f8] sm:$0xf] %vm1200_vm0, %v4162_v32 }
 0x71f   : > { %v4164_v11 = vpop.permute.xlu1 %4163 }
 0x720   : > { %5259 = vst.msk [vmem:[%s7790_s8 + $0x3fc] sm:$0xf] %vm1200_vm0, %v4164_v11 }
 0x721 PF: > { %s20_s23 = sadd.s32 1, %s5724_s23   ;;  %s9316_s18 = smov %s5708_s19 }
 0x722   : > { %p17_p1 = scmp.ge.s32.totalorder %s20_s23, 4   ;;  %s9317_s19 = smov %s5712_s20 }
 0x723   : > { %s9318_s20 = smov %s5853_s9  ;;  %s9319_s21 = smov %s5720_s22 }
 0x724   : > { %s9320_s22 = smov %s9322_s6  ;;  %19 = sbr.rel (!%p17_p1) target bundleno = 5 (0x5), region = 121 }
 0x72b   :  { %4310 = vsyncpa [#allocation3], 1 }
 0x72c   :  { %4312 = vsyncpa [#allocation3 + $0x1], 1 }
 0x72d   :  { %4313 = vsyncpa [#allocation5], 1 }

</bundles_post_ra>
